<compile_context>
chip_gen: v6e
topology: v6e:2x2x1
jax: 0.10.0
libtpu: 0.0.40
codegen_flags: <defaults>
</compile_context>

<pallas_src>
import jax
import jax.numpy as jnp
import numpy as np
from jax.experimental import pallas as pl
from jax.experimental.pallas import tpu as pltpu


# ----------------------------- weight packing -------------------------------

def _banded_taps(w, in_w, row_pad, half_pad):
    """Per-kernel-row banded conv weights, stacked along K (tap-major).

    Returns (KH*row_pad, 2*half_pad) with
      row = tap*row_pad + cin*in_w + w_in
      col = parity*half_pad + cout*OWH + owh        (ow = 2*owh + parity)
      val = w[cout, cin, tap, w_in - ow]            (0 <= w_in - ow < KW)
    so `tap_stacked_rows @ B` does the W-direction taps + channel contraction
    of a VALID conv in one matmul, with output columns parity-split so the
    2x2 max-pool along W is a max of two aligned lane slabs.
    """
    w = np.asarray(w, np.float32)
    Cout, Cin, KH, KW = w.shape
    OW = in_w - KW + 1
    OWH = OW // 2
    wi = np.arange(in_w)[:, None, None]
    par = np.arange(2)[None, :, None]
    owh = np.arange(OWH)[None, None, :]
    j = wi - (2 * owh + par)                              # (in_w, 2, OWH)
    valid = ((j >= 0) & (j < KW)).astype(np.float32)
    jc = np.clip(j, 0, KW - 1)
    g = w[:, :, :, jc] * valid                            # (Cout,Cin,KH,in_w,2,OWH)
    b = np.transpose(g, (2, 1, 3, 4, 0, 5))               # (KH,Cin,in_w,2,Cout,OWH)
    b = b.reshape(KH, Cin * in_w, 2, Cout * OWH)
    b = np.pad(b, ((0, 0), (0, row_pad - Cin * in_w),
                   (0, 0), (0, half_pad - Cout * OWH)))
    return jnp.asarray(b.reshape(KH * row_pad, 2 * half_pad))


def pack_params(p):
    """One-time, batch-size-independent repacking of torch-layout weights."""
    # conv1: 56x28 -> 52x24 -> pool 26x12 ; conv2: 26x12 -> 22x8 -> pool 11x4
    B1 = _banded_taps(p['conv1_w'], 28, 28, 128)          # (140, 256)
    B2 = _banded_taps(p['conv2_w'], 12, 128, 64)          # (640, 128)
    cb1 = jnp.pad(jnp.repeat(p['conv1_b'], 12), (0, 128 - 72))[None, :]   # (1,128)
    cb2 = jnp.repeat(p['conv2_b'], 4)[None, :]                            # (1, 64)
    # fc1 permuted to the kernel's pooled layout: feature idx = r*64 + co*4 + ow,
    # torch flatten order f = co*44 + r*4 + ow.
    r = np.arange(11); co = np.arange(16); ow = np.arange(4)
    f = (co[None, :, None] * 44 + r[:, None, None] * 4
         + ow[None, None, :]).reshape(-1)
    W1 = jnp.asarray(np.asarray(p['fc1_w'], np.float32).T[f])             # (704,120)
    return dict(B1=B1, cb1=cb1, B2=B2, cb2=cb2,
                W1=W1, fb1=p['fc1_b'][None, :],
                W2=p['fc2_w'].T, fb2=p['fc2_b'][None, :],
                W3=p['fc3_w'].T, fb3=p['fc3_b'][None, :])


# ------------------------------ fused kernel --------------------------------

def _shift_up(v, k):
    """result[r] = v[r+k]; the k trailing rows (never used) become zeros."""
    if k == 0:
        return v
    pad = jnp.zeros((k, v.shape[1]), v.dtype)
    return jnp.concatenate([v[k:, :], pad], axis=0)


def net_kernel(x_ref, b1_ref, cb1_ref, b2_ref, cb2_ref,
               w1_ref, fb1_ref, w2_ref, fb2_ref, w3_ref, fb3_ref,
               o_ref, h1_ref, h2_ref):
    f32 = jnp.float32
    tb = o_ref.shape[0]      # samples per grid step
    m1 = tb * 32             # conv1-stage rows: 32/sample (26 valid)
    m2 = tb * 16             # conv2-stage rows: 16/sample (11 valid)

    # --- even/odd input-row streams (H parity of the 2x2 pool), stride-2 reads
    xe = x_ref[pl.ds(0, m1, stride=2), :]                  # (m1, 28) rows 0,2,..
    xo = x_ref[pl.ds(1, m1, stride=2), :]                  # (m1, 28) rows 1,3,..
    xe1, xo1 = _shift_up(xe, 1), _shift_up(xo, 1)
    xe2, xo2 = _shift_up(xe, 2), _shift_up(xo, 2)

    # --- conv1 (1->6, 5x5): tap-folded K=140, one matmul per output-row parity
    ye = jnp.concatenate([xe, xo, xe1, xo1, xe2], axis=1)  # (m1, 140) even rows
    yo = jnp.concatenate([xo, xe1, xo1, xe2, xo2], axis=1) # (m1, 140) odd rows
    ce = jnp.dot(ye, b1_ref[...], preferred_element_type=f32)   # (m1, 256)
    cd = jnp.dot(yo, b1_ref[...], preferred_element_type=f32)   # (m1, 256)

    # --- maxpool(2,2) + bias + ReLU (H parity = ce/cd, W parity = lane halves)
    p1 = jnp.maximum(ce, cd)
    p1 = jnp.maximum(p1[:, 0:128], p1[:, 128:256])
    h1_ref[...] = jnp.maximum(p1 + cb1_ref[...], 0.0)      # (m1, 128), 72 valid

    # --- conv2 (6->16, 5x5): same trick on the pooled activations -----------
    he = h1_ref[pl.ds(0, m2, stride=2), :]                 # (m2, 128)
    ho = h1_ref[pl.ds(1, m2, stride=2), :]
    he1, ho1 = _shift_up(he, 1), _shift_up(ho, 1)
    he2, ho2 = _shift_up(he, 2), _shift_up(ho, 2)
    y2e = jnp.concatenate([he, ho, he1, ho1, he2], axis=1)   # (m2, 640)
    y2o = jnp.concatenate([ho, he1, ho1, he2, ho2], axis=1)  # (m2, 640)
    c2e = jnp.dot(y2e, b2_ref[...], preferred_element_type=f32)  # (m2, 128)
    c2o = jnp.dot(y2o, b2_ref[...], preferred_element_type=f32)

    p2 = jnp.maximum(c2e, c2o)
    p2 = jnp.maximum(p2[:, 0:64], p2[:, 64:128])
    h2_ref[...] = jnp.maximum(p2 + cb2_ref[...], 0.0)      # (m2, 64)

    # --- flatten to (tb, 704) and run the classifier as full matmuls --------
    feat = jnp.concatenate(
        [h2_ref[pl.ds(r, tb, stride=16), :] for r in range(11)], axis=1)  # (tb,704)
    h = jnp.maximum(jnp.dot(feat, w1_ref[...], preferred_element_type=f32)
                    + fb1_ref[...], 0.0)
    h = jnp.maximum(jnp.dot(h, w2_ref[...], preferred_element_type=f32)
                    + fb2_ref[...], 0.0)
    logits = jnp.dot(h, w3_ref[...], preferred_element_type=f32) + fb3_ref[...]
    mx = jnp.max(logits, axis=-1, keepdims=True)
    sh = logits - mx
    lse = jnp.log(jnp.sum(jnp.exp(sh), axis=-1, keepdims=True))
    o_ref[...] = sh - lse


def net_forward(packed, x, tb=8):
    n = x.shape[0]
    xr = x.reshape(n, 56, 28)
    n_pad = (-(-n // tb)) * tb
    xr = jnp.pad(xr, ((0, n_pad - n), (0, 8), (0, 0)))     # 56 -> 64 rows/sample
    x2 = xr.reshape(n_pad * 64, 28)

    w_keys = ('B1', 'cb1', 'B2', 'cb2', 'W1', 'fb1', 'W2', 'fb2', 'W3', 'fb3')
    weights = [packed[k] for k in w_keys]

    out = pl.pallas_call(
        net_kernel,
        out_shape=jax.ShapeDtypeStruct((n_pad, 19), jnp.float32),
        grid_spec=pltpu.PrefetchScalarGridSpec(
            num_scalar_prefetch=0,
            grid=(n_pad // tb,),
            in_specs=[pl.BlockSpec((tb * 64, 28), lambda i: (i, 0))]
                     + [pl.BlockSpec(w.shape, lambda i: (0, 0)) for w in weights],
            out_specs=pl.BlockSpec((tb, 19), lambda i: (i, 0)),
            scratch_shapes=[pltpu.VMEM((tb * 32, 128), jnp.float32),   # pooled conv1
                            pltpu.VMEM((tb * 16, 64), jnp.float32)]),  # pooled conv2
        compiler_params=pltpu.CompilerParams(
            dimension_semantics=("parallel",)),
    )(x2, *weights)
    return out[:n]


net_forward_jit = jax.jit(net_forward, static_argnames=("tb",))


# ------------------------- pure-JAX reference check -------------------------

def net_forward_ref(params, x):
    def conv(x, w, b):
        y = jax.lax.conv_general_dilated(
            x, w, (1, 1), 'VALID', dimension_numbers=('NCHW', 'OIHW', 'NCHW'))
        return y + b.reshape(1, -1, 1, 1)

    def pool(x):
        return jax.lax.reduce_window(x, -jnp.inf, jax.lax.max,
                                     (1, 1, 2, 2), (1, 1, 2, 2), 'VALID')

    h = jax.nn.relu(pool(conv(x, params['conv1_w'], params['conv1_b'])))
    h = jax.nn.relu(pool(conv(h, params['conv2_w'], params['conv2_b'])))
    h = h.reshape(-1, 16 * 11 * 4)
    h = jax.nn.relu(h @ params['fc1_w'].T + params['fc1_b'])
    h = jax.nn.relu(h @ params['fc2_w'].T + params['fc2_b'])
    logits = h @ params['fc3_w'].T + params['fc3_b']
    return jax.nn.log_softmax(logits, axis=1)


# ------------------------------- params init --------------------------------

def init_params(key):
    ks = jax.random.split(key, 10)

    def u(k, shape, fan_in):   # torch-default-style uniform(-1/sqrt(fan_in), .)
        bound = 1.0 / np.sqrt(fan_in)
        return jax.random.uniform(k, shape, jnp.float32, -bound, bound)

    return dict(
        conv1_w=u(ks[0], (6, 1, 5, 5), 1 * 25),
        conv1_b=u(ks[1], (6,), 1 * 25),
        conv2_w=u(ks[2], (16, 6, 5, 5), 6 * 25),
        conv2_b=u(ks[3], (16,), 6 * 25),
        fc1_w=u(ks[4], (120, 704), 704),
        fc1_b=u(ks[5], (120,), 704),
        fc2_w=u(ks[6], (84, 120), 120),
        fc2_b=u(ks[7], (84,), 120),
        fc3_w=u(ks[8], (19, 84), 84),
        fc3_b=u(ks[9], (19,), 84),
    )


if __name__ == "__main__":
    key = jax.random.PRNGKey(0)
    kp, kx = jax.random.split(key)
    params = init_params(kp)
    # (N=10, C=1, H=56, W=28) -> encoder output (10, 16, 11, 4) -> 704 features
    # N=10 exercises both batch padding (->16) and a 2-step batch grid (TB=8).
    x = jax.random.normal(kx, (10, 1, 56, 28), jnp.float32)

    packed = jax.tree_util.tree_map(jax.block_until_ready, pack_params(params))

    out = jax.block_until_ready(net_forward_jit(packed, x))
    ref = jax.block_until_ready(net_forward_ref(params, x))

    assert out.shape == (10, 19) and out.dtype == jnp.float32
    np.testing.assert_allclose(np.asarray(out), np.asarray(ref),
                               rtol=2e-4, atol=2e-4)
    print("KERNEL_OK")
</pallas_src>

<mosaic_0001>
module attributes {stable_mosaic.version = 11 : i64} {
  func.func @net_kernel(%arg0: i32, %arg1: memref<512x28xf32, #tpu.memory_space<vmem>>, %arg2: memref<140x256xf32, #tpu.memory_space<vmem>>, %arg3: memref<1x128xf32, #tpu.memory_space<vmem>>, %arg4: memref<640x128xf32, #tpu.memory_space<vmem>>, %arg5: memref<1x64xf32, #tpu.memory_space<vmem>>, %arg6: memref<704x120xf32, #tpu.memory_space<vmem>>, %arg7: memref<1x120xf32, #tpu.memory_space<vmem>>, %arg8: memref<120x84xf32, #tpu.memory_space<vmem>>, %arg9: memref<1x84xf32, #tpu.memory_space<vmem>>, %arg10: memref<84x19xf32, #tpu.memory_space<vmem>>, %arg11: memref<1x19xf32, #tpu.memory_space<vmem>>, %arg12: memref<8x19xf32, #tpu.memory_space<vmem>>, %arg13: memref<256x128xf32, #tpu.memory_space<vmem>>, %arg14: memref<128x64xf32, #tpu.memory_space<vmem>>) attributes {dimension_semantics = [#tpu.dimension_semantics<parallel>], iteration_bounds = array<i64: 2>, scalar_prefetch = 0 : i64, scratch_operands = 2 : i64, tpu.core_type = #tpu.core_type<tc>, window_params = [{transform_indices = @transform_0, window_bounds = array<i64: 512, 28>}, {pipeline_mode = #tpu.pipeline_mode<synchronous>, transform_indices = @transform_1, window_bounds = array<i64: 140, 256>}, {pipeline_mode = #tpu.pipeline_mode<synchronous>, transform_indices = @transform_2, window_bounds = array<i64: 1, 128>}, {pipeline_mode = #tpu.pipeline_mode<synchronous>, transform_indices = @transform_3, window_bounds = array<i64: 640, 128>}, {pipeline_mode = #tpu.pipeline_mode<synchronous>, transform_indices = @transform_4, window_bounds = array<i64: 1, 64>}, {pipeline_mode = #tpu.pipeline_mode<synchronous>, transform_indices = @transform_5, window_bounds = array<i64: 704, 120>}, {pipeline_mode = #tpu.pipeline_mode<synchronous>, transform_indices = @transform_6, window_bounds = array<i64: 1, 120>}, {pipeline_mode = #tpu.pipeline_mode<synchronous>, transform_indices = @transform_7, window_bounds = array<i64: 120, 84>}, {pipeline_mode = #tpu.pipeline_mode<synchronous>, transform_indices = @transform_8, window_bounds = array<i64: 1, 84>}, {pipeline_mode = #tpu.pipeline_mode<synchronous>, transform_indices = @transform_9, window_bounds = array<i64: 84, 19>}, {pipeline_mode = #tpu.pipeline_mode<synchronous>, transform_indices = @transform_10, window_bounds = array<i64: 1, 19>}, {transform_indices = @transform_11, window_bounds = array<i64: 8, 19>}]} {
    %c0 = arith.constant 0 : index
    %c0_0 = arith.constant 0 : index
    %0 = tpu.strided_load %arg1[%c0, %c0_0] {strides = array<i32: 2, 1>} : memref<512x28xf32, #tpu.memory_space<vmem>>, vector<256x28xf32>
    %c1 = arith.constant 1 : index
    %c0_1 = arith.constant 0 : index
    %1 = tpu.strided_load %arg1[%c1, %c0_1] {strides = array<i32: 2, 1>} : memref<512x28xf32, #tpu.memory_space<vmem>>, vector<256x28xf32>
    %cst = arith.constant 0.000000e+00 : f32
    %2 = vector.broadcast %cst : f32 to vector<1x28xf32>
    %3 = vector.extract_strided_slice %0 {offsets = [1, 0], sizes = [255, 28], strides = [1, 1]} : vector<256x28xf32> to vector<255x28xf32>
    %4 = tpu.concatenate %3, %2 in 0 : vector<255x28xf32>, vector<1x28xf32> -> vector<256x28xf32>
    %cst_2 = arith.constant 0.000000e+00 : f32
    %5 = vector.broadcast %cst_2 : f32 to vector<1x28xf32>
    %6 = vector.extract_strided_slice %1 {offsets = [1, 0], sizes = [255, 28], strides = [1, 1]} : vector<256x28xf32> to vector<255x28xf32>
    %7 = tpu.concatenate %6, %5 in 0 : vector<255x28xf32>, vector<1x28xf32> -> vector<256x28xf32>
    %cst_3 = arith.constant 0.000000e+00 : f32
    %8 = vector.broadcast %cst_3 : f32 to vector<2x28xf32>
    %9 = vector.extract_strided_slice %0 {offsets = [2, 0], sizes = [254, 28], strides = [1, 1]} : vector<256x28xf32> to vector<254x28xf32>
    %10 = tpu.concatenate %9, %8 in 0 : vector<254x28xf32>, vector<2x28xf32> -> vector<256x28xf32>
    %cst_4 = arith.constant 0.000000e+00 : f32
    %11 = vector.broadcast %cst_4 : f32 to vector<2x28xf32>
    %12 = vector.extract_strided_slice %1 {offsets = [2, 0], sizes = [254, 28], strides = [1, 1]} : vector<256x28xf32> to vector<254x28xf32>
    %13 = tpu.concatenate %12, %11 in 0 : vector<254x28xf32>, vector<2x28xf32> -> vector<256x28xf32>
    %14 = tpu.concatenate %0, %1, %4, %7, %10 in 1 : vector<256x28xf32>, vector<256x28xf32>, vector<256x28xf32>, vector<256x28xf32>, vector<256x28xf32> -> vector<256x140xf32>
    %15 = tpu.concatenate %1, %4, %7, %10, %13 in 1 : vector<256x28xf32>, vector<256x28xf32>, vector<256x28xf32>, vector<256x28xf32>, vector<256x28xf32> -> vector<256x140xf32>
    %c0_5 = arith.constant 0 : index
    %c0_6 = arith.constant 0 : index
    %16 = vector.load %arg2[%c0_5, %c0_6] : memref<140x256xf32, #tpu.memory_space<vmem>>, vector<140x256xf32>
    %cst_7 = arith.constant dense<0.000000e+00> : vector<256x256xf32>
    %17 = tpu.matmul %14, %16, %cst_7 {dimension_numbers = #tpu.dot_dimension_numbers<[1], [0], [0], [1], [0, 0, 1, 1], [], []>} : vector<256x140xf32>, vector<140x256xf32>, vector<256x256xf32> -> vector<256x256xf32>
    %c0_8 = arith.constant 0 : index
    %c0_9 = arith.constant 0 : index
    %18 = vector.load %arg2[%c0_8, %c0_9] : memref<140x256xf32, #tpu.memory_space<vmem>>, vector<140x256xf32>
    %cst_10 = arith.constant dense<0.000000e+00> : vector<256x256xf32>
    %19 = tpu.matmul %15, %18, %cst_10 {dimension_numbers = #tpu.dot_dimension_numbers<[1], [0], [0], [1], [0, 0, 1, 1], [], []>} : vector<256x140xf32>, vector<140x256xf32>, vector<256x256xf32> -> vector<256x256xf32>
    %20 = arith.maximumf %17, %19 : vector<256x256xf32>
    %21 = vector.extract_strided_slice %20 {offsets = [0, 0], sizes = [256, 128], strides = [1, 1]} : vector<256x256xf32> to vector<256x128xf32>
    %22 = vector.extract_strided_slice %20 {offsets = [0, 128], sizes = [256, 128], strides = [1, 1]} : vector<256x256xf32> to vector<256x128xf32>
    %23 = arith.maximumf %21, %22 : vector<256x128xf32>
    %c0_11 = arith.constant 0 : index
    %c0_12 = arith.constant 0 : index
    %24 = vector.load %arg3[%c0_11, %c0_12] : memref<1x128xf32, #tpu.memory_space<vmem>>, vector<1x128xf32>
    %25 = vector.broadcast %24 : vector<1x128xf32> to vector<256x128xf32>
    %26 = arith.addf %23, %25 : vector<256x128xf32>
    %cst_13 = arith.constant 0.000000e+00 : f32
    %27 = vector.broadcast %cst_13 : f32 to vector<256x128xf32>
    %28 = arith.maximumf %26, %27 : vector<256x128xf32>
    %c0_14 = arith.constant 0 : index
    %c0_15 = arith.constant 0 : index
    %29 = vector.load %arg13[%c0_14, %c0_15] : memref<256x128xf32, #tpu.memory_space<vmem>>, vector<256x128xf32>
    tpu.vector_store %arg13[%c0_14, %c0_15], %28 {strides = array<i32>} : memref<256x128xf32, #tpu.memory_space<vmem>>, vector<256x128xf32>,
    %c0_16 = arith.constant 0 : index
    %c0_17 = arith.constant 0 : index
    %30 = tpu.strided_load %arg13[%c0_16, %c0_17] {strides = array<i32: 2, 1>} : memref<256x128xf32, #tpu.memory_space<vmem>>, vector<128x128xf32>
    %c1_18 = arith.constant 1 : index
    %c0_19 = arith.constant 0 : index
    %31 = tpu.strided_load %arg13[%c1_18, %c0_19] {strides = array<i32: 2, 1>} : memref<256x128xf32, #tpu.memory_space<vmem>>, vector<128x128xf32>
    %cst_20 = arith.constant 0.000000e+00 : f32
    %32 = vector.broadcast %cst_20 : f32 to vector<1x128xf32>
    %33 = vector.extract_strided_slice %30 {offsets = [1, 0], sizes = [127, 128], strides = [1, 1]} : vector<128x128xf32> to vector<127x128xf32>
    %34 = tpu.concatenate %33, %32 in 0 : vector<127x128xf32>, vector<1x128xf32> -> vector<128x128xf32>
    %cst_21 = arith.constant 0.000000e+00 : f32
    %35 = vector.broadcast %cst_21 : f32 to vector<1x128xf32>
    %36 = vector.extract_strided_slice %31 {offsets = [1, 0], sizes = [127, 128], strides = [1, 1]} : vector<128x128xf32> to vector<127x128xf32>
    %37 = tpu.concatenate %36, %35 in 0 : vector<127x128xf32>, vector<1x128xf32> -> vector<128x128xf32>
    %cst_22 = arith.constant 0.000000e+00 : f32
    %38 = vector.broadcast %cst_22 : f32 to vector<2x128xf32>
    %39 = vector.extract_strided_slice %30 {offsets = [2, 0], sizes = [126, 128], strides = [1, 1]} : vector<128x128xf32> to vector<126x128xf32>
    %40 = tpu.concatenate %39, %38 in 0 : vector<126x128xf32>, vector<2x128xf32> -> vector<128x128xf32>
    %cst_23 = arith.constant 0.000000e+00 : f32
    %41 = vector.broadcast %cst_23 : f32 to vector<2x128xf32>
    %42 = vector.extract_strided_slice %31 {offsets = [2, 0], sizes = [126, 128], strides = [1, 1]} : vector<128x128xf32> to vector<126x128xf32>
    %43 = tpu.concatenate %42, %41 in 0 : vector<126x128xf32>, vector<2x128xf32> -> vector<128x128xf32>
    %44 = tpu.concatenate %30, %31, %34, %37, %40 in 1 : vector<128x128xf32>, vector<128x128xf32>, vector<128x128xf32>, vector<128x128xf32>, vector<128x128xf32> -> vector<128x640xf32>
    %45 = tpu.concatenate %31, %34, %37, %40, %43 in 1 : vector<128x128xf32>, vector<128x128xf32>, vector<128x128xf32>, vector<128x128xf32>, vector<128x128xf32> -> vector<128x640xf32>
    %c0_24 = arith.constant 0 : index
    %c0_25 = arith.constant 0 : index
    %46 = vector.load %arg4[%c0_24, %c0_25] : memref<640x128xf32, #tpu.memory_space<vmem>>, vector<640x128xf32>
    %cst_26 = arith.constant dense<0.000000e+00> : vector<128x128xf32>
    %47 = tpu.matmul %44, %46, %cst_26 {dimension_numbers = #tpu.dot_dimension_numbers<[1], [0], [0], [1], [0, 0, 1, 1], [], []>} : vector<128x640xf32>, vector<640x128xf32>, vector<128x128xf32> -> vector<128x128xf32>
    %c0_27 = arith.constant 0 : index
    %c0_28 = arith.constant 0 : index
    %48 = vector.load %arg4[%c0_27, %c0_28] : memref<640x128xf32, #tpu.memory_space<vmem>>, vector<640x128xf32>
    %cst_29 = arith.constant dense<0.000000e+00> : vector<128x128xf32>
    %49 = tpu.matmul %45, %48, %cst_29 {dimension_numbers = #tpu.dot_dimension_numbers<[1], [0], [0], [1], [0, 0, 1, 1], [], []>} : vector<128x640xf32>, vector<640x128xf32>, vector<128x128xf32> -> vector<128x128xf32>
    %50 = arith.maximumf %47, %49 : vector<128x128xf32>
    %51 = vector.extract_strided_slice %50 {offsets = [0, 0], sizes = [128, 64], strides = [1, 1]} : vector<128x128xf32> to vector<128x64xf32>
    %52 = vector.extract_strided_slice %50 {offsets = [0, 64], sizes = [128, 64], strides = [1, 1]} : vector<128x128xf32> to vector<128x64xf32>
    %53 = arith.maximumf %51, %52 : vector<128x64xf32>
    %c0_30 = arith.constant 0 : index
    %c0_31 = arith.constant 0 : index
    %54 = vector.load %arg5[%c0_30, %c0_31] : memref<1x64xf32, #tpu.memory_space<vmem>>, vector<1x64xf32>
    %55 = vector.broadcast %54 : vector<1x64xf32> to vector<128x64xf32>
    %56 = arith.addf %53, %55 : vector<128x64xf32>
    %cst_32 = arith.constant 0.000000e+00 : f32
    %57 = vector.broadcast %cst_32 : f32 to vector<128x64xf32>
    %58 = arith.maximumf %56, %57 : vector<128x64xf32>
    %c0_33 = arith.constant 0 : index
    %c0_34 = arith.constant 0 : index
    %59 = vector.load %arg14[%c0_33, %c0_34] : memref<128x64xf32, #tpu.memory_space<vmem>>, vector<128x64xf32>
    tpu.vector_store %arg14[%c0_33, %c0_34], %58 {strides = array<i32>} : memref<128x64xf32, #tpu.memory_space<vmem>>, vector<128x64xf32>,
    %c0_35 = arith.constant 0 : index
    %c0_36 = arith.constant 0 : index
    %60 = tpu.strided_load %arg14[%c0_35, %c0_36] {strides = array<i32: 16, 1>} : memref<128x64xf32, #tpu.memory_space<vmem>>, vector<8x64xf32>
    %c1_37 = arith.constant 1 : index
    %c0_38 = arith.constant 0 : index
    %61 = tpu.strided_load %arg14[%c1_37, %c0_38] {strides = array<i32: 16, 1>} : memref<128x64xf32, #tpu.memory_space<vmem>>, vector<8x64xf32>
    %c2 = arith.constant 2 : index
    %c0_39 = arith.constant 0 : index
    %62 = tpu.strided_load %arg14[%c2, %c0_39] {strides = array<i32: 16, 1>} : memref<128x64xf32, #tpu.memory_space<vmem>>, vector<8x64xf32>
    %c3 = arith.constant 3 : index
    %c0_40 = arith.constant 0 : index
    %63 = tpu.strided_load %arg14[%c3, %c0_40] {strides = array<i32: 16, 1>} : memref<128x64xf32, #tpu.memory_space<vmem>>, vector<8x64xf32>
    %c4 = arith.constant 4 : index
    %c0_41 = arith.constant 0 : index
    %64 = tpu.strided_load %arg14[%c4, %c0_41] {strides = array<i32: 16, 1>} : memref<128x64xf32, #tpu.memory_space<vmem>>, vector<8x64xf32>
    %c5 = arith.constant 5 : index
    %c0_42 = arith.constant 0 : index
    %65 = tpu.strided_load %arg14[%c5, %c0_42] {strides = array<i32: 16, 1>} : memref<128x64xf32, #tpu.memory_space<vmem>>, vector<8x64xf32>
    %c6 = arith.constant 6 : index
    %c0_43 = arith.constant 0 : index
    %66 = tpu.strided_load %arg14[%c6, %c0_43] {strides = array<i32: 16, 1>} : memref<128x64xf32, #tpu.memory_space<vmem>>, vector<8x64xf32>
    %c7 = arith.constant 7 : index
    %c0_44 = arith.constant 0 : index
    %67 = tpu.strided_load %arg14[%c7, %c0_44] {strides = array<i32: 16, 1>} : memref<128x64xf32, #tpu.memory_space<vmem>>, vector<8x64xf32>
    %c8 = arith.constant 8 : index
    %c0_45 = arith.constant 0 : index
    %68 = tpu.strided_load %arg14[%c8, %c0_45] {strides = array<i32: 16, 1>} : memref<128x64xf32, #tpu.memory_space<vmem>>, vector<8x64xf32>
    %c9 = arith.constant 9 : index
    %c0_46 = arith.constant 0 : index
    %69 = tpu.strided_load %arg14[%c9, %c0_46] {strides = array<i32: 16, 1>} : memref<128x64xf32, #tpu.memory_space<vmem>>, vector<8x64xf32>
    %c10 = arith.constant 10 : index
    %c0_47 = arith.constant 0 : index
    %70 = tpu.strided_load %arg14[%c10, %c0_47] {strides = array<i32: 16, 1>} : memref<128x64xf32, #tpu.memory_space<vmem>>, vector<8x64xf32>
    %71 = tpu.concatenate %60, %61, %62, %63, %64, %65, %66, %67, %68, %69, %70 in 1 : vector<8x64xf32>, vector<8x64xf32>, vector<8x64xf32>, vector<8x64xf32>, vector<8x64xf32>, vector<8x64xf32>, vector<8x64xf32>, vector<8x64xf32>, vector<8x64xf32>, vector<8x64xf32>, vector<8x64xf32> -> vector<8x704xf32>
    %c0_48 = arith.constant 0 : index
    %c0_49 = arith.constant 0 : index
    %72 = vector.load %arg6[%c0_48, %c0_49] : memref<704x120xf32, #tpu.memory_space<vmem>>, vector<704x120xf32>
    %cst_50 = arith.constant dense<0.000000e+00> : vector<8x120xf32>
    %73 = tpu.matmul %71, %72, %cst_50 {dimension_numbers = #tpu.dot_dimension_numbers<[1], [0], [0], [1], [0, 0, 1, 1], [], []>} : vector<8x704xf32>, vector<704x120xf32>, vector<8x120xf32> -> vector<8x120xf32>
    %c0_51 = arith.constant 0 : index
    %c0_52 = arith.constant 0 : index
    %74 = vector.load %arg7[%c0_51, %c0_52] : memref<1x120xf32, #tpu.memory_space<vmem>>, vector<1x120xf32>
    %75 = vector.broadcast %74 : vector<1x120xf32> to vector<8x120xf32>
    %76 = arith.addf %73, %75 : vector<8x120xf32>
    %cst_53 = arith.constant 0.000000e+00 : f32
    %77 = vector.broadcast %cst_53 : f32 to vector<8x120xf32>
    %78 = arith.maximumf %76, %77 : vector<8x120xf32>
    %c0_54 = arith.constant 0 : index
    %c0_55 = arith.constant 0 : index
    %79 = vector.load %arg8[%c0_54, %c0_55] : memref<120x84xf32, #tpu.memory_space<vmem>>, vector<120x84xf32>
    %cst_56 = arith.constant dense<0.000000e+00> : vector<8x84xf32>
    %80 = tpu.matmul %78, %79, %cst_56 {dimension_numbers = #tpu.dot_dimension_numbers<[1], [0], [0], [1], [0, 0, 1, 1], [], []>} : vector<8x120xf32>, vector<120x84xf32>, vector<8x84xf32> -> vector<8x84xf32>
    %c0_57 = arith.constant 0 : index
    %c0_58 = arith.constant 0 : index
    %81 = vector.load %arg9[%c0_57, %c0_58] : memref<1x84xf32, #tpu.memory_space<vmem>>, vector<1x84xf32>
    %82 = vector.broadcast %81 : vector<1x84xf32> to vector<8x84xf32>
    %83 = arith.addf %80, %82 : vector<8x84xf32>
    %cst_59 = arith.constant 0.000000e+00 : f32
    %84 = vector.broadcast %cst_59 : f32 to vector<8x84xf32>
    %85 = arith.maximumf %83, %84 : vector<8x84xf32>
    %c0_60 = arith.constant 0 : index
    %c0_61 = arith.constant 0 : index
    %86 = vector.load %arg10[%c0_60, %c0_61] : memref<84x19xf32, #tpu.memory_space<vmem>>, vector<84x19xf32>
    %cst_62 = arith.constant dense<0.000000e+00> : vector<8x19xf32>
    %87 = tpu.matmul %85, %86, %cst_62 {dimension_numbers = #tpu.dot_dimension_numbers<[1], [0], [0], [1], [0, 0, 1, 1], [], []>} : vector<8x84xf32>, vector<84x19xf32>, vector<8x19xf32> -> vector<8x19xf32>
    %c0_63 = arith.constant 0 : index
    %c0_64 = arith.constant 0 : index
    %88 = vector.load %arg11[%c0_63, %c0_64] : memref<1x19xf32, #tpu.memory_space<vmem>>, vector<1x19xf32>
    %89 = vector.broadcast %88 : vector<1x19xf32> to vector<8x19xf32>
    %90 = arith.addf %87, %89 : vector<8x19xf32>
    %cst_65 = arith.constant dense<0xFF800000> : vector<8xf32>
    %91 = vector.multi_reduction <maximumf>, %90, %cst_65 [1] : vector<8x19xf32> to vector<8xf32>
    %92 = vector.shape_cast %91 : vector<8xf32> to vector<8x1xf32>
    %93 = vector.broadcast %92 : vector<8x1xf32> to vector<8x19xf32>
    %94 = arith.subf %90, %93 : vector<8x19xf32>
    %95 = math.exp %94 : vector<8x19xf32>
    %cst_66 = arith.constant dense<0.000000e+00> : vector<8xf32>
    %96 = vector.multi_reduction <add>, %95, %cst_66 [1] : vector<8x19xf32> to vector<8xf32>
    %97 = vector.shape_cast %96 : vector<8xf32> to vector<8x1xf32>
    %98 = math.log %97 : vector<8x1xf32>
    %99 = vector.broadcast %98 : vector<8x1xf32> to vector<8x19xf32>
    %100 = arith.subf %94, %99 : vector<8x19xf32>
    %c0_67 = arith.constant 0 : index
    %c0_68 = arith.constant 0 : index
    %101 = vector.load %arg12[%c0_67, %c0_68] : memref<8x19xf32, #tpu.memory_space<vmem>>, vector<8x19xf32>
    tpu.vector_store %arg12[%c0_67, %c0_68], %100 {strides = array<i32>} : memref<8x19xf32, #tpu.memory_space<vmem>>, vector<8x19xf32>,
    return
  }
  func.func @transform_0(%arg0: i32) -> (i32, i32) {
    %c0_i32 = arith.constant 0 : i32
    %c0_i32_0 = arith.constant 0 : i32
    return %arg0, %c0_i32 : i32, i32
  }
  func.func @transform_1(%arg0: i32) -> (i32, i32) {
    %c0_i32 = arith.constant 0 : i32
    %c0_i32_0 = arith.constant 0 : i32
    %c0_i32_1 = arith.constant 0 : i32
    return %c0_i32, %c0_i32_0 : i32, i32
  }
  func.func @transform_2(%arg0: i32) -> (i32, i32) {
    %c0_i32 = arith.constant 0 : i32
    %c0_i32_0 = arith.constant 0 : i32
    %c0_i32_1 = arith.constant 0 : i32
    return %c0_i32, %c0_i32_0 : i32, i32
  }
  func.func @transform_3(%arg0: i32) -> (i32, i32) {
    %c0_i32 = arith.constant 0 : i32
    %c0_i32_0 = arith.constant 0 : i32
    %c0_i32_1 = arith.constant 0 : i32
    return %c0_i32, %c0_i32_0 : i32, i32
  }
  func.func @transform_4(%arg0: i32) -> (i32, i32) {
    %c0_i32 = arith.constant 0 : i32
    %c0_i32_0 = arith.constant 0 : i32
    %c0_i32_1 = arith.constant 0 : i32
    return %c0_i32, %c0_i32_0 : i32, i32
  }
  func.func @transform_5(%arg0: i32) -> (i32, i32) {
    %c0_i32 = arith.constant 0 : i32
    %c0_i32_0 = arith.constant 0 : i32
    %c0_i32_1 = arith.constant 0 : i32
    return %c0_i32, %c0_i32_0 : i32, i32
  }
  func.func @transform_6(%arg0: i32) -> (i32, i32) {
    %c0_i32 = arith.constant 0 : i32
    %c0_i32_0 = arith.constant 0 : i32
    %c0_i32_1 = arith.constant 0 : i32
    return %c0_i32, %c0_i32_0 : i32, i32
  }
  func.func @transform_7(%arg0: i32) -> (i32, i32) {
    %c0_i32 = arith.constant 0 : i32
    %c0_i32_0 = arith.constant 0 : i32
    %c0_i32_1 = arith.constant 0 : i32
    return %c0_i32, %c0_i32_0 : i32, i32
  }
  func.func @transform_8(%arg0: i32) -> (i32, i32) {
    %c0_i32 = arith.constant 0 : i32
    %c0_i32_0 = arith.constant 0 : i32
    %c0_i32_1 = arith.constant 0 : i32
    return %c0_i32, %c0_i32_0 : i32, i32
  }
  func.func @transform_9(%arg0: i32) -> (i32, i32) {
    %c0_i32 = arith.constant 0 : i32
    %c0_i32_0 = arith.constant 0 : i32
    %c0_i32_1 = arith.constant 0 : i32
    return %c0_i32, %c0_i32_0 : i32, i32
  }
  func.func @transform_10(%arg0: i32) -> (i32, i32) {
    %c0_i32 = arith.constant 0 : i32
    %c0_i32_0 = arith.constant 0 : i32
    %c0_i32_1 = arith.constant 0 : i32
    return %c0_i32, %c0_i32_0 : i32, i32
  }
  func.func @transform_11(%arg0: i32) -> (i32, i32) {
    %c0_i32 = arith.constant 0 : i32
    %c0_i32_0 = arith.constant 0 : i32
    return %arg0, %c0_i32 : i32, i32
  }
}

</mosaic_0001>

<bundles_post_ra>
// kernel: net_forward.1
= control target key start
LH: loop header
LB: loop body
LE: loop exit
PB: predicated region body
PF: predicated region fallthrough
CT: control target
= control target key end

     0   :  { %s9562_s0 = inlined_call_operand.vmem [shape: f32[1024,28], index: 0, kind: input, shape index: {}]   ;;  %s9563_s1 = inlined_call_operand.vmem [shape: f32[140,256], index: 1, kind: input, shape index: {}]   ;;  %s9564_s2 = inlined_call_operand.vmem [shape: f32[1,128], index: 2, kind: input, shape index: {}]   ;;  %s9565_s3 = inlined_call_operand.vmem [shape: f32[640,128], index: 3, kind: input, shape index: {}]   ;;  %s9566_s4 = inlined_call_operand.vmem [shape: f32[1,64], index: 4, kind: input, shape index: {}]   ;;  %s9567_s5 = inlined_call_operand.vmem [shape: f32[704,120], index: 5, kind: input, shape index: {}]   ;;  %s9568_s6 = inlined_call_operand.vmem [shape: f32[1,120], index: 6, kind: input, shape index: {}]   ;;  %s9569_s7 = inlined_call_operand.vmem [shape: f32[120,84], index: 7, kind: input, shape index: {}]   ;;  %s9570_s8 = inlined_call_operand.vmem [shape: f32[1,84], index: 8, kind: input, shape index: {}]   ;;  %s9571_s9 = inlined_call_operand.vmem [shape: f32[84,19], index: 9, kind: input, shape index: {}]   ;;  %s9572_s10 = inlined_call_operand.vmem [shape: f32[1,19], index: 10, kind: input, shape index: {}]   ;;  %s9573_s11 = inlined_call_operand.hbm [shape: f32[16,19], index: 11, kind: output, shape index: {}]  }
   0x1   :  { %9627 = sst [smem:[#allocation38_spill]] %s9562_s0 }
   0x2   :  { %9628 = sst [smem:[#allocation39_spill]] %s9563_s1 }
   0x3   :  { %16 = vsyncpa [#allocation5], 0 }
   0x4   :  { %18 = vsyncpa [#allocation5 + $0x1], 0  ;;  %s6439_s17 = smov 0   ;;  %s6441_s18 = smov 0  }
   0x5   :  { %s6443_s19 = smov 0   ;;  %s6445_s20 = smov 0  }
   0x6 LB: > { %s6460_s21 = sadd.s32 4294967295, %s6369_s20   ;;  %s4845_s22 = sadd.s32 4294967294, %s6369_s20   ;;  %s6369_s20 = sphi %s6445_s20, %s9726_s20   ;;  %s6365_s19 = sphi %s6443_s19, %s9725_s19   ;;  %s6361_s18 = sphi %s6441_s18, %s9724_s18   ;;  %s6357_s17 = sphi %s6439_s17, %s9723_s17  }
   0x7   : > { %s6464_s23 = sadd.s32 1, %s6369_s20   ;;  %s267_s24 = sadd.s32 1, %s6365_s19 }
   0x8   : > { %s264_s25 = ssub.s32 %s6369_s20, %s6464_s23  ;;  %p277_p0 = scmp.ne.s32.totalorder %s6365_s19, %s6361_s18 }
   0x9   : > { %p265_p1 = scmp.eq.s32.totalorder %s264_s25, 0  ;;  %p278_p2 = scmp.eq.s32.totalorder %s6460_s21, 1 }
   0xa   : > { %p283_p3 = scmp.ne.s32.totalorder %s6361_s18, %s6357_s17  ;;  %p284_p4 = scmp.eq.s32.totalorder %s4845_s22, 1 }
   0xb   : > { %s6475_s26 = scalar_select %p265_p1, %s6365_s19, %s267_s24  }
   0xc   : > { %p6477_p5 = por %p278_p2, %p277_p0  ;;  %p6481_p6 = por %p284_p4, %p283_p3 }
   0xd   : > { %9629 = sst [smem:[#allocation7_spill]] %s6475_s26  ;;  %p4848_p7 = scmp.ge.s32.totalorder %s6369_s20, 1 }
   0xe   : > { %p341_p8 = scmp.lt.s32.totalorder %s6369_s20, 3 }
  0x10   : > { %p342_p9 = pnand %p4848_p7, %p341_p8 }
  0x12   : > { %345 = sbr.rel (%p342_p9) target bundleno = 2213 (0x8a5), region = 64 }
  0x17   : > { %s4850_s29 = sshll.u32 %s6460_s21, 6  ;;  %s9632_s1 = sld [smem:[#allocation39_spill]]  ;;  %vm546_vm0 = vcmask 1046528   ;;  %vm709_vm1 = vcmask 1045504   ;;  %vm1973_vm2 = vcmask 1043456   ;;  %vm1908_vm3 = vcmask 97280  }
  0x18   : > { %p382_p10 = scmp.lt.s32.totalorder %s4850_s29, 127  ;;  %s9633_s0 = sld [smem:[#allocation38_spill]]  ;;  %vm1227_vm4 = vcmask 228352   ;;  %vm1260_vm5 = vcmask 457728   ;;  %vm1293_vm6 = vcmask 687104   ;;  %vm1326_vm7 = vcmask 916480  }
  0x19   : > { %s9574_s15 = smov 84   ;;  %s9580_s22 = smov 28   ;;  %vm4129_vm8 = vcmask 523264   ;;  %vm6377_vm9 = vmmov 0   ;;  %vm4589_vm10 = vcmask 982016   ;;  %vm4758_vm11 = vcmask 154624  }
  0x1a   : > { %s9728_s29 = smov (!%p382_p10, %s4850_s29), 127  ;;  %s9578_s12 = smov 56  }
  0x1b   : > { %s4851_s16 = sshll.u32 %s9728_s29, 3  ;;  %s9576_s29 = smov 112  }
  0x1c   : > { %s9637_s30 = smov 56   ;;  %s6378_s13 = smov [#allocation4]  }
  0x1d   : > { %v1903_v0 = vld [vmem:[%s9632_s1 + $0xf8] sm:$0xff]  ;;  %v1902_v1 = vld [vmem:[%s9632_s1 + $0xf0] sm:$0xff]  ;;  %v1901_v2 = vld [vmem:[%s9632_s1 + $0xe8] sm:$0xff] }
  0x1e   : > { %1980 = vmatprep.subr.mxu0 %v1903_v0  ;;  %2301 = vmatprep.subr.mxu1 %v1903_v0  ;;  %v1900_v3 = vld [vmem:[%s9632_s1 + $0xe0] sm:$0xff]  ;;  %v1899_v4 = vld [vmem:[%s9632_s1 + $0xd8] sm:$0xff]  ;;  %v1898_v5 = vld [vmem:[%s9632_s1 + $0xd0] sm:$0xff]  ;;  %s6515_s26 = scalar_lea.vmem %s9633_s0, %s4851_s16  ;;  %s9636_s16 = smov 28  }
  0x1f   : > { %1981 = vmatpush1.msra.mxu0 %v1902_v1  ;;  %2302 = vmatpush1.msra.mxu1 %v1902_v1  ;;  %v1897_v6 = vld [vmem:[%s9632_s1 + $0xc8] sm:$0xff]  ;;  %v1896_v7 = vld [vmem:[%s9632_s1 + $0xc0] sm:$0xff]  ;;  %v1895_v8 = vld [vmem:[%s9632_s1 + $0xb8] sm:$0xff]  ;;  %s378_s0 = sand.u32 1, %s6361_s18  }
  0x20   : > { %1982 = vmatprep.subr.mxu0 %v1901_v2  ;;  %2303 = vmatprep.subr.mxu1 %v1901_v2  ;;  %v1894_v9 = vld [vmem:[%s9632_s1 + $0xb0] sm:$0xff]  ;;  %v1893_v10 = vld [vmem:[%s9632_s1 + $0xa8] sm:$0xff]  ;;  %v1892_v22 = vld [vmem:[%s9632_s1 + $0xa0] sm:$0xff]  ;;  %s4773_s25 = scalar_lea.sflag [#allocation5], %s378_s0 }
  0x21   : > { %1983 = vmatpush1.msra.mxu0 %v1900_v3  ;;  %2304 = vmatpush1.msra.mxu1 %v1900_v3  ;;  %v6527_v11 = vld [vmem:[%s6515_s26] ss:$2 sm:$0xff]  ;;  %v6530_v12 = vld [vmem:[%s6515_s26 + $0x10] ss:$2 sm:$0xff]  ;;  %v6533_v13 = vld [vmem:[%s6515_s26 + $0x1] ss:$2 sm:$0xff] }
  0x22   : > { %1984 = vmatprep.subr.mxu0 %v1899_v4  ;;  %2305 = vmatprep.subr.mxu1 %v1899_v4  ;;  %v6536_v14 = vld [vmem:[%s6515_s26 + $0x11] ss:$2 sm:$0xff]  ;;  %v644_v15 = vrot.slane %v6533_v13, 1  ;;  %v710_v16 = vrot.slane %v6527_v11, 2  ;;  %v711_v17 = vrot.slane %v6530_v12, 2  ;;  %v547_v18 = vrot.slane %v6527_v11, 1 }
  0x23   : > { %1985 = vmatpush1.msra.mxu0 %v1898_v5  ;;  %2306 = vmatpush1.msra.mxu1 %v1898_v5  ;;  %v645_v19 = vrot.slane %v6536_v14, 1  ;;  %v548_v20 = vrot.slane %v6530_v12, 1  ;;  %v6545_v21 = vld [vmem:[%s6515_s26 + $0x20] ss:$2 sm:$0xff]  ;;  %v1891_v24 = vld [vmem:[%s9632_s1 + $0x98] sm:$0xff]  ;;  %v1890_v31 = vld [vmem:[%s9632_s1 + $0x90] sm:$0xff] }
  0x24   : > { %1986 = vmatprep.subr.mxu0 %v1897_v6  ;;  %2307 = vmatprep.subr.mxu1 %v1897_v6  ;;  %v712_v23 = vsel %vm709_vm1, %v710_v16, %v711_v17  ;;  %v550_v27 = vrot.slane %v6545_v21, 1  ;;  %v6559_v30 = vld [vmem:[%s6515_s26 + $0x21] ss:$2 sm:$0xff]  ;;  %v775_v34 = vrot.slane %v6533_v13, 2  ;;  %v776_v36 = vrot.slane %v6536_v14, 2  ;;  %v1887_v40 = vld [vmem:[%s9632_s1 + $0x78] sm:$0xff] }
  0x25   : > { %1987 = vmatpush1.msra.mxu0 %v1896_v7  ;;  %2308 = vmatpush1.msra.mxu1 %v1896_v7  ;;  %v646_v25 = vsel %vm546_vm0, %v644_v15, %v645_v19  ;;  %v549_v26 = vsel %vm546_vm0, %v547_v18, %v548_v20  ;;  %v1889_v32 = vld [vmem:[%s9632_s1 + $0x88] sm:$0xff]  ;;  %v647_v37 = vrot.slane %v6559_v30, 1  ;;  %v713_v38 = vrot.slane %v6545_v21, 2  ;;  %v1888_v39 = vld [vmem:[%s9632_s1 + $0x80] sm:$0xff]  ;;  %v1886_v42 = vld [vmem:[%s9632_s1 + $0x70] sm:$0xff] }
  0x26   : > { %1988 = vmatprep.subr.mxu0 %v1895_v8  ;;  %2309 = vmatprep.subr.mxu1 %v1895_v8  ;;  %v5711_v28 = vpack.i.bf16 %v712_v23, %v646_v25  ;;  %v5701_v29 = vpack.i.bf16 %v549_v26, %v6533_v13  ;;  %v5706_v33 = vpack.i.bf16 %v646_v25, %v549_v26  ;;  %v6594_v46 = vld [vmem:[%s6515_s26 + $0x30] ss:$2 sm:$0xff]  ;;  %v6597_v47 = vld [vmem:[%s6515_s26 + $0x31] ss:$2 sm:$0xff]  ;;  %v1885_v48 = vld [vmem:[%s9632_s1 + $0x68] sm:$0xff]  ;;  %v778_v53 = vrot.slane %v6559_v30, 2 }
  0x27   : > { %1989 = vmatpush1.msra.mxu0 %v1894_v9  ;;  %2310 = vmatpush1.msra.mxu1 %v1894_v9  ;;  %v551_v35 = vsel %vm546_vm0, %v548_v20, %v550_v27  ;;  %v777_v43 = vsel %vm709_vm1, %v775_v34, %v776_v36  ;;  %v648_v44 = vsel %vm546_vm0, %v645_v19, %v647_v37  ;;  %v1884_v49 = vld [vmem:[%s9632_s1 + $0x60] sm:$0xff]  ;;  %v1883_v52 = vld [vmem:[%s9632_s1 + $0x58] sm:$0xff]  ;;  %v552_v54 = vrot.slane %v6594_v46, 1  ;;  %v1882_v56 = vld [vmem:[%s9632_s1 + $0x50] sm:$0xff] }
  0x28   : > { %1990 = vmatprep.subr.mxu0 %v1893_v10  ;;  %2311 = vmatprep.subr.mxu1 %v1893_v10  ;;  %v5716_v41 = vpack.i.bf16 %v551_v35, %v6536_v14  ;;  %v714_v45 = vsel %vm709_vm1, %v711_v17, %v713_v38  ;;  %v5721_v51 = vpack.i.bf16 %v648_v44, %v551_v35  ;;  %v649_v55 = vrot.slane %v6597_v47, 1  ;;  %v1881_v57 = vld [vmem:[%s9632_s1 + $0x48] sm:$0xff]  ;;  %v1880_v58 = vld [vmem:[%s9632_s1 + $0x40] sm:$0xff]  ;;  %v1879_v0 = vld [vmem:[%s9632_s1 + $0x38] sm:$0xff] }
  0x29   : > { %1991 = vmatpush1.msra.mxu0 %v1892_v22  ;;  %2312 = vmatpush1.msra.mxu1 %v1892_v22  ;;  %v5726_v50 = vpack.i.bf16 %v714_v45, %v648_v44  ;;  %v779_v59 = vsel %vm709_vm1, %v776_v36, %v778_v53  ;;  %v553_v60 = vsel %vm546_vm0, %v550_v27, %v552_v54  ;;  %v715_v62 = vrot.slane %v6594_v46, 2  ;;  %v6631_v63 = vld [vmem:[%s6515_s26 + $0x40] ss:$2 sm:$0xff]  ;;  %v1878_v1 = vld [vmem:[%s9632_s1 + $0x30] sm:$0xff]  ;;  %v6647_v6 = vld [vmem:[%s6515_s26 + $0x41] ss:$2 sm:$0xff] }
  0x2a   : > { %1992 = vmatprep.subr.mxu0 %v1891_v24  ;;  %5712 = vrot.lane.b32.xlu1 %v5711_v28, %s9574_s15  ;;  %v650_v61 = vsel %vm546_vm0, %v647_v37, %v649_v55  ;;  %v5731_v3 = vpack.i.bf16 %v553_v60, %v6559_v30  ;;  %v554_v5 = vrot.slane %v6631_v63, 1  ;;  %v1877_v7 = vld [vmem:[%s9632_s1 + $0x28] sm:$0xff]  ;;  %v1876_v8 = vld [vmem:[%s9632_s1 + $0x20] sm:$0xff]  ;;  %v1875_v10 = vld [vmem:[%s9632_s1 + $0x18] sm:$0xff]  ;;  %v780_v16 = vrot.slane %v6597_v47, 2 }
  0x2b   : > { %5702 = vrot.lane.b32.xlu0 %v5701_v29, %s9580_s22  ;;  %2313 = vmatprep.subr.mxu1 %v1891_v24  ;;  %v5736_v2 = vpack.i.bf16 %v650_v61, %v553_v60  ;;  %v716_v4 = vsel %vm709_vm1, %v713_v38, %v715_v62  ;;  %v651_v17 = vrot.slane %v6647_v6, 1  ;;  %v717_v18 = vrot.slane %v6631_v63, 2  ;;  %v1874_v19 = vld [vmem:[%s9632_s1 + $0x10] sm:$0xff]  ;;  %v1873_v20 = vld [vmem:[%s9632_s1 + $0x8] sm:$0xff]  ;;  %v1907_v29 = vld [vmem:[%s9632_s1 + $0x118] sm:$0xf] }
  0x2c   : > { %1993 = vmatpush1.msra.mxu0 %v1890_v31  ;;  %2314 = vmatpush1.msra.mxu1 %v1890_v31  ;;  %v5741_v9 = vpack.i.bf16 %v716_v4, %v650_v61  ;;  %v555_v15 = vsel %vm546_vm0, %v552_v54, %v554_v5  ;;  %v781_v24 = vsel %vm709_vm1, %v778_v53, %v780_v16  ;;  %v6680_v27 = vld [vmem:[%s6515_s26 + $0x50] ss:$2 sm:$0xff]  ;;  %v6683_v28 = vld [vmem:[%s6515_s26 + $0x51] ss:$2 sm:$0xff]  ;;  %v1905_v34 = vld [vmem:[%s9632_s1 + $0x108] sm:$0xff]  ;;  %v782_v35 = vrot.slane %v6647_v6, 2 }
  0x2d   : > { %1994 = vmatprep.subr.mxu0 %v1889_v32  ;;  %2315 = vmatprep.subr.mxu1 %v1889_v32  ;;  %v5746_v22 = vpack.i.bf16 %v555_v15, %v6597_v47  ;;  %v652_v25 = vsel %vm546_vm0, %v649_v55, %v651_v17  ;;  %v718_v26 = vsel %vm709_vm1, %v715_v62, %v717_v18  ;;  %v1906_v31 = vld [vmem:[%s9632_s1 + $0x110] sm:$0xf]  ;;  %v556_v36 = vrot.slane %v6680_v27, 1  ;;  %v1904_v38 = vld [vmem:[%s9632_s1 + $0x100] sm:$0xff] }
  0x2e   : > { %1131 = vrot.lane.b32.xlu1 %v712_v23, %s9576_s29  ;;  %1995 = vmatpush1.msra.mxu0 %v1888_v39  ;;  %v1872_v23 = vld [vmem:[%s9632_s1] sm:$0xff]  ;;  %v5756_v32 = vpack.i.bf16 %v718_v26, %v652_v25  ;;  %v653_v37 = vrot.slane %v6683_v28, 1  ;;  %v784_v53 = vrot.slane %v6683_v28, 2  ;;  %v6736_v60 = vld [vmem:[%s6515_s26 + $0x70] ss:$2 sm:$0xff]  ;;  %s6375_s1 = smov 64  }
  0x2f   : > { %5707 = vrot.lane.b32.xlu0 %v5706_v33, %s9578_s12  ;;  %2316 = vmatpush1.msra.mxu1 %v1888_v39  ;;  %v5751_v33 = vpack.i.bf16 %v652_v25, %v555_v15  ;;  %v783_v39 = vsel %vm709_vm1, %v780_v16, %v782_v35  ;;  %v6739_v61 = vld [vmem:[%s6515_s26 + $0x71] ss:$2 sm:$0xff] }
  0x30   : > { %1996 = vmatprep.subr.mxu0 %v1887_v40  ;;  %2317 = vmatprep.subr.mxu1 %v1887_v40  ;;  %v557_v40 = vsel %vm546_vm0, %v554_v5, %v556_v36 }
  0x31   : > { %1997 = vmatpush1.msra.mxu0 %v1886_v42  ;;  %2318 = vmatpush1.msra.mxu1 %v1886_v42  ;;  %v719_v42 = vrot.slane %v6680_v27, 2 }
  0x32   : > { %5717 = vrot.lane.b32.xlu1 %v5716_v41, %s9580_s22  ;;  %1998 = vmatprep.subr.mxu0 %v1885_v48  ;;  %v654_v41 = vsel %vm546_vm0, %v651_v17, %v653_v37 }
  0x33   : > { %1648 = vrot.lane.b32.xlu0 %v777_v43, %s9576_s29  ;;  %2319 = vmatprep.subr.mxu1 %v1885_v48  ;;  %v6713_v43 = vld [vmem:[%s6515_s26 + $0x60] ss:$2 sm:$0xff]  ;;  %v5766_v44 = vpack.i.bf16 %v654_v41, %v557_v40  ;;  %v720_v48 = vsel %vm709_vm1, %v717_v18, %v719_v42  ;;  %v6761_v18 = vld [vmem:[%s6515_s26 + $0x81] ss:$2 sm:$0xff] }
  0x34   : > { %1999 = vmatpush1.msra.mxu0 %v1884_v49  ;;  %2320 = vmatpush1.msra.mxu1 %v1884_v49  ;;  %v558_v49 = vrot.slane %v6713_v43, 1  ;;  %v721_v55 = vrot.slane %v6713_v43, 2 }
  0x35   : > { %2000 = vmatprep.subr.mxu0 %v1883_v52  ;;  %2321 = vmatprep.subr.mxu1 %v1883_v52 }
  0x36   : > { %5727 = vrot.lane.b32.xlu1 %v5726_v50, %s9574_s15  ;;  %2001 = vmatpush1.msra.mxu0 %v1882_v56  ;;  %v6721_v50 = vld [vmem:[%s6515_s26 + $0x61] ss:$2 sm:$0xff]  ;;  %v559_v52 = vsel %vm546_vm0, %v556_v36, %v558_v49  ;;  %v790_v36 = vrot.slane %v6761_v18, 2 }
  0x37   : > { %5722 = vrot.lane.b32.xlu0 %v5721_v51, %s9578_s12  ;;  %2322 = vmatpush1.msra.mxu1 %v1882_v56  ;;  %v5771_v51 = vpack.i.bf16 %v720_v48, %v654_v41  ;;  %v655_v54 = vrot.slane %v6721_v50, 1  ;;  %v5776_v56 = vpack.i.bf16 %v559_v52, %v6683_v28 }
  0x38   : > { %2002 = vmatprep.subr.mxu0 %v1881_v57  ;;  %2323 = vmatprep.subr.mxu1 %v1881_v57  ;;  %v785_v57 = vsel %vm709_vm1, %v782_v35, %v784_v53 }
  0x39   : > { %2003 = vmatpush1.msra.mxu0 %v1880_v58  ;;  %2324 = vmatpush1.msra.mxu1 %v1880_v58  ;;  %v656_v58 = vsel %vm546_vm0, %v653_v37, %v655_v54 }
  0x3a   : > { %1650 = vrot.lane.b32.xlu1 %v779_v59, %s9576_s29  ;;  %2004 = vmatprep.subr.mxu0 %v1879_v0  ;;  %v722_v59 = vsel %vm709_vm1, %v719_v42, %v721_v55 }
  0x3b   : > { %1133 = vrot.lane.b32.xlu0 %v714_v45, %s9576_s29  ;;  %2325 = vmatprep.subr.mxu1 %v1879_v0  ;;  %v5761_v45 = vpack.i.bf16 %v557_v40, %v6647_v6  ;;  %v5786_v62 = vpack.i.bf16 %v722_v59, %v656_v58  ;;  %v5781_v0 = vpack.i.bf16 %v656_v58, %v559_v52  ;;  %v6801_v52 = vld [vmem:[%s6515_s26 + $0xa1] ss:$2 sm:$0xff] }
  0x3c   : > { %2005 = vmatpush1.msra.mxu0 %v1878_v1  ;;  %2326 = vmatpush1.msra.mxu1 %v1878_v1  ;;  %v786_v1 = vrot.slane %v6721_v50, 2 }
  0x3d   : > { %2006 = vmatprep.subr.mxu0 %v1877_v7  ;;  %2327 = vmatprep.subr.mxu1 %v1877_v7 }
  0x3e   : > { %5737 = vrot.lane.b32.xlu1 %v5736_v2, %s9578_s12  ;;  %2007 = vmatpush1.msra.mxu0 %v1876_v8  ;;  %v560_v2 = vrot.slane %v6736_v60, 1 }
  0x3f   : > { %5732 = vrot.lane.b32.xlu0 %v5731_v3, %s9580_s22  ;;  %2328 = vmatpush1.msra.mxu1 %v1876_v8  ;;  %v657_v3 = vrot.slane %v6739_v61, 1  ;;  %v723_v8 = vrot.slane %v6736_v60, 2 }
  0x40   : > { %2008 = vmatprep.subr.mxu0 %v1875_v10  ;;  %2329 = vmatprep.subr.mxu1 %v1875_v10  ;;  %v561_v5 = vsel %vm546_vm0, %v558_v49, %v560_v2 }
  0x41   : > { %2009 = vmatpush1.msra.mxu0 %v1874_v19  ;;  %2330 = vmatpush1.msra.mxu1 %v1874_v19  ;;  %v658_v7 = vsel %vm546_vm0, %v655_v54, %v657_v3  ;;  %v5791_v15 = vpack.i.bf16 %v561_v5, %v6721_v50  ;;  %v724_v16 = vsel %vm709_vm1, %v721_v55, %v723_v8 }
  0x42   : > { %1135 = vrot.lane.b32.xlu1 %v716_v4, %s9576_s29  ;;  %2010 = vmatprep.subr.mxu0 %v1873_v20  ;;  %v787_v4 = vsel %vm709_vm1, %v784_v53, %v786_v1  ;;  %v5796_v10 = vpack.i.bf16 %v658_v7, %v561_v5  ;;  %v5801_v19 = vpack.i.bf16 %v724_v16, %v658_v7  ;;  %v794_v5 = vrot.slane %v6801_v52, 2 }
  0x43   : > { %5742 = vrot.lane.b32.xlu0 %v5741_v9, %s9574_s15  ;;  %2331 = vmatprep.subr.mxu1 %v1873_v20  ;;  %v6753_v9 = vld [vmem:[%s6515_s26 + $0x80] ss:$2 sm:$0xff] }
  0x44   : > { %2011 = vmatpush1.msra.mxu0 %v1872_v23  ;;  %2332 = vmatpush1.msra.mxu1 %v1872_v23  ;;  %v562_v17 = vrot.slane %v6753_v9, 1  ;;  %v659_v23 = vrot.slane %v6761_v18, 1 }
  0x45   : > { %4915 = vmatprep.subr.msk.mxu0 %vm1973_vm2, %v1907_v29  ;;  %4949 = vmatprep.subr.msk.mxu1 %vm1973_vm2, %v1907_v29 }
  0x46   : > { %5747 = vrot.lane.b32.xlu1 %v5746_v22, %s9580_s22  ;;  %4916 = vmatpush2.msk.msra.mxu0 %vm1973_vm2, %v1906_v31  ;;  %v563_v20 = vsel %vm546_vm0, %v560_v2, %v562_v17  ;;  %v788_v22 = vrot.slane %v6739_v61, 2  ;;  %v660_v29 = vsel %vm546_vm0, %v657_v3, %v659_v23  ;;  %v4894_v2 = vld [vmem:[%s6515_s26 + $0xb1] ss:$2 sm:$0xff] }
  0x47   : > { %1652 = vrot.lane.b32.xlu0 %v781_v24, %s9576_s29  ;;  %4950 = vmatpush2.msk.msra.mxu1 %vm1973_vm2, %v1906_v31  ;;  %v725_v24 = vrot.slane %v6753_v9, 2  ;;  %v5806_v25 = vpack.i.bf16 %v563_v20, %v6739_v61  ;;  %v5811_v35 = vpack.i.bf16 %v660_v29, %v563_v20 }
  0x48   : > { %2042 = vmatprep.subr.mxu0 %v1905_v34  ;;  %2363 = vmatprep.subr.mxu1 %v1905_v34 }
  0x49   : > { %2043 = vmatpush2.msra.mxu0 %v1904_v38  ;;  %2364 = vmatpush2.msra.mxu1 %v1904_v38  ;;  %v726_v31 = vsel %vm709_vm1, %v723_v8, %v725_v24  ;;  %v665_v8 = vrot.slane %v4894_v2, 1 }
  0x4a   : > { %5757 = vrot.lane.b32.xlu1 %v5756_v32, %s9574_s15  ;;  %v6776_v32 = vld [vmem:[%s6515_s26 + $0x90] ss:$2 sm:$0xff]  ;;  %v5816_v34 = vpack.i.bf16 %v726_v31, %v660_v29 }
  0x4b   : > { %5752 = vrot.lane.b32.xlu0 %v5751_v33, %s9578_s12  ;;  %v6779_v33 = vld [vmem:[%s6515_s26 + $0x91] ss:$2 sm:$0xff]  ;;  %v564_v37 = vrot.slane %v6776_v32, 1  ;;  %v727_v42 = vrot.slane %v6776_v32, 2 }
  0x4c   : > { %v661_v38 = vrot.slane %v6779_v33, 1  ;;  %v792_v55 = vrot.slane %v6779_v33, 2 }
  0x4d   : > { %v565_v40 = vsel %vm546_vm0, %v562_v17, %v564_v37  ;;  %v728_v49 = vsel %vm709_vm1, %v725_v24, %v727_v42 }
  0x4e   : > { %1654 = vrot.lane.b32.xlu1 %v783_v39, %s9576_s29  ;;  %v791_v39 = vsel %vm709_vm1, %v788_v22, %v790_v36  ;;  %v662_v41 = vsel %vm546_vm0, %v659_v23, %v661_v38 }
  0x4f   : > { %1137 = vrot.lane.b32.xlu0 %v718_v26, %s9576_s29  ;;  %v789_v26 = vsel %vm709_vm1, %v786_v1, %v788_v22  ;;  %v5831_v53 = vpack.i.bf16 %v728_v49, %v662_v41  ;;  %v4862_v1 = vld [vmem:[%s6515_s26 + $0xb0] ss:$2 sm:$0xff] }
  0x50   : > { %v568_v7 = vrot.slane %v4862_v1, 1  ;;  %v731_v17 = vrot.slane %v4862_v1, 2 }
  0x52   : > { %5767 = vrot.lane.b32.xlu1 %v5766_v44, %s9578_s12  ;;  %v6793_v44 = vld [vmem:[%s6515_s26 + $0xa0] ss:$2 sm:$0xff] }
  0x53   : > { %5762 = vrot.lane.b32.xlu0 %v5761_v45, %s9580_s22  ;;  %v5826_v45 = vpack.i.bf16 %v662_v41, %v565_v40  ;;  %v6846_v41 = vld [vmem:[%s6515_s26 + $0xd1] ss:$2 sm:$0xff] }
  0x56   : > { %1139 = vrot.lane.b32.xlu1 %v720_v48, %s9576_s29  ;;  %v5821_v48 = vpack.i.bf16 %v565_v40, %v6761_v18  ;;  %v6843_v40 = vld [vmem:[%s6515_s26 + $0xd0] ss:$2 sm:$0xff] }
  0x57   : > { %5772 = vrot.lane.b32.xlu0 %v5771_v51, %s9574_s15  ;;  %v566_v51 = vrot.slane %v6793_v44, 1 }
  0x59   : > { %v567_v54 = vsel %vm546_vm0, %v564_v37, %v566_v51 }
  0x5a   : > { %5777 = vrot.lane.b32.xlu1 %v5776_v56, %s9580_s22  ;;  %v663_v56 = vrot.slane %v6801_v52, 1  ;;  %v5836_v58 = vpack.i.bf16 %v567_v54, %v6779_v33 }
  0x5b   : > { %1656 = vrot.lane.b32.xlu0 %v785_v57, %s9576_s29  ;;  %v729_v57 = vrot.slane %v6793_v44, 2 }
  0x5d   : > { %v732_v23 = vsel %vm709_vm1, %v729_v57, %v731_v17 }
  0x5e   : > { %5787 = vrot.lane.b32.xlu1 %v5786_v62, %s9574_s15  ;;  %v664_v62 = vsel %vm546_vm0, %v661_v38, %v663_v56 }
  0x5f   : > { %5782 = vrot.lane.b32.xlu0 %v5781_v0, %s9578_s12  ;;  %v730_v0 = vsel %vm709_vm1, %v727_v42, %v729_v57 }
  0x60   : > { %v5846_v3 = vpack.i.bf16 %v730_v0, %v664_v62 }
  0x62   : > { %1658 = vrot.lane.b32.xlu1 %v787_v4, %s9576_s29  ;;  %v5841_v4 = vpack.i.bf16 %v664_v62, %v567_v54 }
  0x63   : > { %1141 = vrot.lane.b32.xlu0 %v722_v59, %s9576_s29  ;;  %v793_v59 = vsel %vm709_vm1, %v790_v36, %v792_v55 }
  0x66   : > { %5797 = vrot.lane.b32.xlu1 %v5796_v10, %s9578_s12  ;;  %v795_v10 = vsel %vm709_vm1, %v792_v55, %v794_v5 }
  0x67   : > { %5792 = vrot.lane.b32.xlu0 %v5791_v15, %s9580_s22  ;;  %v569_v15 = vsel %vm546_vm0, %v566_v51, %v568_v7  ;;  %v669_v51 = vrot.slane %v6846_v41, 1 }
  0x68   : > { %v5851_v22 = vpack.i.bf16 %v569_v15, %v6801_v52 }
  0x6a   : > { %1143 = vrot.lane.b32.xlu1 %v724_v16, %s9576_s29  ;;  %v666_v16 = vsel %vm546_vm0, %v663_v56, %v665_v8 }
  0x6b   : > { %5802 = vrot.lane.b32.xlu0 %v5801_v19, %s9574_s15  ;;  %v4863_v19 = vld [vmem:[%s6515_s26 + $0xc0] ss:$2 sm:$0xff]  ;;  %v5856_v20 = vpack.i.bf16 %v666_v16, %v569_v15 }
  0x6c   : > { %v570_v24 = vrot.slane %v4863_v19, 1 }
  0x6e   : > { %5807 = vrot.lane.b32.xlu1 %v5806_v25, %s9580_s22  ;;  %v6831_v25 = vld [vmem:[%s6515_s26 + $0xc1] ss:$2 sm:$0xff]  ;;  %v571_v29 = vsel %vm546_vm0, %v568_v7, %v570_v24 }
  0x6f   : > { %1660 = vrot.lane.b32.xlu0 %v789_v26, %s9576_s29  ;;  %v5861_v26 = vpack.i.bf16 %v732_v23, %v666_v16  ;;  %v5866_v36 = vpack.i.bf16 %v571_v29, %v4894_v2 }
  0x72   : > { %5817 = vrot.lane.b32.xlu1 %v5816_v34, %s9574_s15  ;;  %v667_v34 = vrot.slane %v6831_v25, 1 }
  0x73   : > { %5812 = vrot.lane.b32.xlu0 %v5811_v35, %s9578_s12  ;;  %v733_v35 = vrot.slane %v4863_v19, 2 }
  0x74   : > { %v668_v38 = vsel %vm546_vm0, %v665_v8, %v667_v34  ;;  %v670_v56 = vsel %vm546_vm0, %v667_v34, %v669_v51 }
  0x76   : > { %1662 = vrot.lane.b32.xlu1 %v791_v39, %s9576_s29  ;;  %v734_v39 = vsel %vm709_vm1, %v731_v17, %v733_v35  ;;  %v800_v17 = vrot.slane %v6846_v41, 2 }
  0x77   : > { %1145 = vrot.lane.b32.xlu0 %v726_v31, %s9576_s29  ;;  %v796_v31 = vrot.slane %v4894_v2, 2  ;;  %v5876_v42 = vpack.i.bf16 %v734_v39, %v668_v38 }
  0x79   : > { %v797_v37 = vsel %vm709_vm1, %v794_v5, %v796_v31 }
  0x7a   : > { %5827 = vrot.lane.b32.xlu1 %v5826_v45, %s9578_s12  ;;  %v5871_v45 = vpack.i.bf16 %v668_v38, %v571_v29 }
  0x7b   : > { %5822 = vrot.lane.b32.xlu0 %v5821_v48, %s9580_s22  ;;  %v798_v48 = vrot.slane %v6831_v25, 2 }
  0x7d   : > { %v799_v54 = vsel %vm709_vm1, %v796_v31, %v798_v48 }
  0x7e   : > { %1147 = vrot.lane.b32.xlu1 %v728_v49, %s9576_s29  ;;  %v572_v49 = vrot.slane %v6843_v40, 1 }
  0x7f   : > { %5832 = vrot.lane.b32.xlu0 %v5831_v53, %s9574_s15  ;;  %v735_v53 = vrot.slane %v6843_v40, 2 }
  0x80   : > { %v573_v55 = vsel %vm546_vm0, %v570_v24, %v572_v49 }
  0x81   : > { %v736_v62 = vsel %vm709_vm1, %v733_v35, %v735_v53  ;;  %v5886_v2 = vpack.i.bf16 %v670_v56, %v573_v55 }
  0x82   : > { %5837 = vrot.lane.b32.xlu1 %v5836_v58, %s9580_s22 }
  0x83   : > { %1664 = vrot.lane.b32.xlu0 %v793_v59, %s9576_s29  ;;  %v6860_v59 = vld [vmem:[%s6515_s26 + $0xe0] ss:$2 sm:$0xff] }
  0x84   : > { %v574_v5 = vrot.slane %v6860_v59, 1  ;;  %v737_v31 = vrot.slane %v6860_v59, 2 }
  0x86   : > { %5847 = vrot.lane.b32.xlu1 %v5846_v3, %s9574_s15  ;;  %v5881_v3 = vpack.i.bf16 %v573_v55, %v6831_v25  ;;  %v575_v29 = vsel %vm546_vm0, %v572_v49, %v574_v5  ;;  %v738_v49 = vsel %vm709_vm1, %v735_v53, %v737_v31 }
  0x87   : > { %5842 = vrot.lane.b32.xlu0 %v5841_v4, %s9578_s12  ;;  %v6867_v4 = vld [vmem:[%s6515_s26 + $0xe1] ss:$2 sm:$0xff] }
  0x88   : > { %v671_v19 = vrot.slane %v6867_v4, 1 }
  0x8a   : > { %1666 = vrot.lane.b32.xlu1 %v795_v10, %s9576_s29  ;;  %v5891_v10 = vpack.i.bf16 %v736_v62, %v670_v56  ;;  %v672_v38 = vsel %vm546_vm0, %v669_v51, %v671_v19  ;;  %v6899_v51 = vld [vmem:[%s6515_s26 + $0xf0] ss:$2 sm:$0xff] }
  0x8b   : > { %1149 = vrot.lane.b32.xlu0 %v730_v0, %s9576_s29  ;;  %v5901_v56 = vpack.i.bf16 %v672_v38, %v575_v29  ;;  %v5906_v53 = vpack.i.bf16 %v738_v49, %v672_v38 }
  0x8e   : > { %5857 = vrot.lane.b32.xlu1 %v5856_v20, %s9578_s12 }
  0x8f   : > { %5852 = vrot.lane.b32.xlu0 %v5851_v22, %s9580_s22 }
  0x92   : > { %1151 = vrot.lane.b32.xlu1 %v732_v23, %s9576_s29 }
  0x93   : > { %5862 = vrot.lane.b32.xlu0 %v5861_v26, %s9574_s15 }
  0x96   : > { %5867 = vrot.lane.b32.xlu1 %v5866_v36, %s9580_s22 }
  0x97   : > { %1668 = vrot.lane.b32.xlu0 %v797_v37, %s9576_s29 }
  0x9a   : > { %5877 = vrot.lane.b32.xlu1 %v5876_v42, %s9574_s15  ;;  %v5896_v42 = vpack.i.bf16 %v575_v29, %v6846_v41 }
  0x9b   : > { %5872 = vrot.lane.b32.xlu0 %v5871_v45, %s9578_s12  ;;  %v801_v45 = vsel %vm709_vm1, %v798_v48, %v800_v17 }
  0x9c   : > { %v5713_v57 = vpop.permute.xlu1 %5712 }
  0x9d   : > { %v5703_v58 = vpop.permute.xlu0 %5702  ;;  %v5715_v20 = vunpack.i.h.bf16 %v5713_v57  ;;  %v5714_v22 = vunpack.i.l.bf16 %v5713_v57  ;;  %v6902_v57 = vld [vmem:[%s6515_s26 + $0xf1] ss:$2 sm:$0xff] }
  0x9e   : > { %v5705_v0 = vunpack.i.h.bf16 %v5703_v58  ;;  %v5704_v1 = vunpack.i.l.bf16 %v5703_v58  ;;  %1670 = vrot.lane.b32.xlu1 %v799_v54, %s9576_s29 }
  0x9f   : > { %1153 = vrot.lane.b32.xlu0 %v734_v39, %s9576_s29 }
  0xa0   : > { %v1132_v7 = vpop.permute.xlu1 %1131  ;;  %v1744_v23 = vsel %vm1227_vm4, %v6533_v13, %v5705_v0  ;;  %v1228_v24 = vsel %vm1227_vm4, %v6527_v11, %v5704_v1 }
  0xa1   : > { %v5708_v8 = vpop.permute.xlu0 %5707  ;;  %4917 = vmatprep.mubr.msk.f32.mxu0 %vm1908_vm3, %v1132_v7 }
  0xa2   : > { %v5710_v15 = vunpack.i.h.bf16 %v5708_v8  ;;  %v5709_v16 = vunpack.i.l.bf16 %v5708_v8  ;;  %5887 = vrot.lane.b32.xlu1 %v5886_v2, %s9578_s12  ;;  %v802_v2 = vrot.slane %v6867_v4, 2  ;;  %v576_v8 = vrot.slane %v6899_v51, 1 }
  0xa3   : > { %5882 = vrot.lane.b32.xlu0 %v5881_v3, %s9580_s22 }
  0xa4   : > { %v1261_v25 = vsel %vm1260_vm5, %v1228_v24, %v5709_v16  ;;  %v1776_v26 = vsel %vm1260_vm5, %v1744_v23, %v5710_v15  ;;  %v5718_v34 = vpop.permute.xlu1 %5717  ;;  %v803_v23 = vsel %vm709_vm1, %v800_v17, %v802_v2  ;;  %v577_v24 = vsel %vm546_vm0, %v574_v5, %v576_v8  ;;  %v6938_v5 = vld [vmem:[%s6515_s26 + $0x101] ss:$2 sm:$0xff] }
  0xa5   : > { %v1649_v35 = vpop.permute.xlu0 %1648  ;;  %v1294_v13 = vsel %vm1293_vm6, %v1261_v25, %v5714_v22  ;;  %v1808_v11 = vsel %vm1293_vm6, %v1776_v26, %v5715_v20  ;;  %v5720_v39 = vunpack.i.h.bf16 %v5718_v34  ;;  %v5719_v40 = vunpack.i.l.bf16 %v5718_v34 }
  0xa6   : > { %4951 = vmatprep.mubr.msk.f32.mxu1 %vm1908_vm3, %v1649_v35  ;;  %v1327_v36 = vsel %vm1326_vm7, %v1294_v13, %v1132_v7  ;;  %v1840_v37 = vsel %vm1326_vm7, %v1808_v11, %v1649_v35  ;;  %1155 = vrot.lane.b32.xlu1 %v736_v62, %s9576_s29  ;;  %v739_v26 = vrot.slane %v6899_v51, 2  ;;  %v6932_v35 = vld [vmem:[%s6515_s26 + $0x100] ss:$2 sm:$0xff]  ;;  %v5911_v38 = vpack.i.bf16 %v577_v24, %v6867_v4 }
  0xa7   : > { %5892 = vrot.lane.b32.xlu0 %v5891_v10, %s9574_s15  ;;  %2045 = vmatmul.mubr.f32.vlgmr.msra.gmra.mxu0 %v1327_v36  ;;  %v1745_v41 = vsel %vm1227_vm4, %v6536_v14, %v5720_v39  ;;  %v1229_v48 = vsel %vm1227_vm4, %v6530_v12, %v5719_v40  ;;  %v673_v10 = vrot.slane %v6902_v57, 1  ;;  %v741_v51 = vrot.slane %v6932_v35, 2 }
  0xa8   : > { %2366 = vmatmul.mubr.f32.vlgmr.msra.gmra.mxu1 %v1840_v37  ;;  %v5728_v54 = vpop.permute.xlu1 %5727  ;;  %v740_v40 = vsel %vm709_vm1, %v737_v31, %v739_v26 }
  0xa9   : > { %v5723_v55 = vpop.permute.xlu0 %5722  ;;  %v5730_v58 = vunpack.i.h.bf16 %v5728_v54  ;;  %v5729_v62 = vunpack.i.l.bf16 %v5728_v54  ;;  %v674_v25 = vsel %vm546_vm0, %v671_v19, %v673_v10 }
  0xaa   : > { %v5725_v0 = vunpack.i.h.bf16 %v5723_v55  ;;  %v5724_v1 = vunpack.i.l.bf16 %v5723_v55  ;;  %5897 = vrot.lane.b32.xlu1 %v5896_v42, %s9580_s22  ;;  %v5916_v17 = vpack.i.bf16 %v674_v25, %v577_v24  ;;  %v578_v42 = vrot.slane %v6932_v35, 1 }
  0xab   : > { %1672 = vrot.lane.b32.xlu0 %v801_v45, %s9576_s29 }
  0xac   : > { %v1262_v3 = vsel %vm1260_vm5, %v1229_v48, %v5724_v1  ;;  %v1777_v7 = vsel %vm1260_vm5, %v1745_v41, %v5725_v0  ;;  %v1651_v15 = vpop.permute.xlu1 %1650  ;;  %v804_v0 = vrot.slane %v6902_v57, 2 }
  0xad   : > { %v1134_v14 = vpop.permute.xlu0 %1133  ;;  %v1295_v16 = vsel %vm1293_vm6, %v1262_v3, %v5729_v62  ;;  %v1809_v12 = vsel %vm1293_vm6, %v1777_v7, %v5730_v58  ;;  %4952 = vmatprep.mubr.msk.f32.mxu1 %vm1908_vm3, %v1651_v15  ;;  %v579_v62 = vsel %vm546_vm0, %v576_v8, %v578_v42  ;;  %v742_v7 = vsel %vm709_vm1, %v739_v26, %v741_v51 }
  0xae   : > { %4918 = vmatprep.mubr.msk.f32.mxu0 %vm1908_vm3, %v1134_v14  ;;  %v1328_v20 = vsel %vm1326_vm7, %v1295_v16, %v1134_v14  ;;  %v1841_v22 = vsel %vm1326_vm7, %v1809_v12, %v1651_v15  ;;  %5907 = vrot.lane.b32.xlu1 %v5906_v53, %s9574_s15  ;;  %v5926_v14 = vpack.i.bf16 %v579_v62, %v6902_v57 }
  0xaf   : > { %5902 = vrot.lane.b32.xlu0 %v5901_v56, %s9578_s12  ;;  %2051 = vmatmul.mubr.f32.gmra.mxu0 %v1328_v20  ;;  %v675_v56 = vrot.slane %v6938_v5, 1  ;;  %v805_v16 = vsel %vm709_vm1, %v802_v2, %v804_v0  ;;  %v806_v2 = vrot.slane %v6938_v5, 2 }
  0xb0   : > { %2372 = vmatmul.mubr.f32.gmra.mxu1 %v1841_v22  ;;  %v5738_v29 = vpop.permute.xlu1 %5737  ;;  %v6975_v22 = vld [vmem:[%s6515_s26 + $0x110] ss:$2 sm:$0xff] }
  0xb1   : > { %v5733_v34 = vpop.permute.xlu0 %5732  ;;  %v5740_v36 = vunpack.i.h.bf16 %v5738_v29  ;;  %v5739_v37 = vunpack.i.l.bf16 %v5738_v29  ;;  %v676_v3 = vsel %vm546_vm0, %v673_v10, %v675_v56 }
  0xb2   : > { %v5735_v13 = vunpack.i.h.bf16 %v5733_v34  ;;  %v5734_v11 = vunpack.i.l.bf16 %v5733_v34  ;;  %1674 = vrot.lane.b32.xlu1 %v803_v23, %s9576_s29  ;;  %v5936_v10 = vpack.i.bf16 %v742_v7, %v676_v3  ;;  %v6978_v23 = vld [vmem:[%s6515_s26 + $0x111] ss:$2 sm:$0xff]  ;;  %v5931_v4 = vpack.i.bf16 %v676_v3, %v579_v62 }
  0xb3   : > { %1157 = vrot.lane.b32.xlu0 %v738_v49, %s9576_s29 }
  0xb4   : > { %v1746_v19 = vsel %vm1227_vm4, %v6559_v30, %v5735_v13  ;;  %v1230_v39 = vsel %vm1227_vm4, %v6545_v21, %v5734_v11  ;;  %v1136_v45 = vpop.permute.xlu1 %1135  ;;  %v5921_v30 = vpack.i.bf16 %v740_v40, %v674_v25 }
  0xb5   : > { %v5743_v54 = vpop.permute.xlu0 %5742  ;;  %4919 = vmatprep.mubr.msk.f32.mxu0 %vm1908_vm3, %v1136_v45  ;;  %v1263_v21 = vsel %vm1260_vm5, %v1230_v39, %v5739_v37  ;;  %v1778_v59 = vsel %vm1260_vm5, %v1746_v19, %v5740_v36  ;;  %v580_v36 = vrot.slane %v6975_v22, 1  ;;  %v677_v37 = vrot.slane %v6978_v23, 1 }
  0xb6   : > { %v5745_v49 = vunpack.i.h.bf16 %v5743_v54  ;;  %v5744_v55 = vunpack.i.l.bf16 %v5743_v54  ;;  %5917 = vrot.lane.b32.xlu1 %v5916_v17, %s9578_s12 }
  0xb7   : > { %5912 = vrot.lane.b32.xlu0 %v5911_v38, %s9580_s22  ;;  %v678_v54 = vsel %vm546_vm0, %v675_v56, %v677_v37 }
  0xb8   : > { %v1296_v31 = vsel %vm1293_vm6, %v1263_v21, %v5744_v55  ;;  %v1810_v58 = vsel %vm1293_vm6, %v1778_v59, %v5745_v49  ;;  %v5748_v1 = vpop.permute.xlu1 %5747  ;;  %v743_v49 = vrot.slane %v6975_v22, 2 }
  0xb9   : > { %v1653_v41 = vpop.permute.xlu0 %1652  ;;  %v1329_v48 = vsel %vm1326_vm7, %v1296_v31, %v1136_v45  ;;  %v5750_v8 = vunpack.i.h.bf16 %v5748_v1  ;;  %v5749_v15 = vunpack.i.l.bf16 %v5748_v1  ;;  %v581_v45 = vsel %vm546_vm0, %v578_v42, %v580_v36  ;;  %v7014_v42 = vld [vmem:[%s6515_s26 + $0x121] ss:$2 sm:$0xff] }
  0xba   : > { %2057 = vmatmul.mubr.f32.gmra.mxu0 %v1329_v48  ;;  %4953 = vmatprep.mubr.msk.f32.mxu1 %vm1908_vm3, %v1653_v41  ;;  %v1842_v53 = vsel %vm1326_vm7, %v1810_v58, %v1653_v41  ;;  %v5941_v1 = vpack.i.bf16 %v581_v45, %v6938_v5  ;;  %v744_v48 = vsel %vm709_vm1, %v741_v51, %v743_v49  ;;  %v808_v51 = vrot.slane %v6978_v23, 2 }
  0xbb   : > { %1159 = vrot.lane.b32.xlu1 %v740_v40, %s9576_s29  ;;  %5922 = vrot.lane.b32.xlu0 %v5921_v30, %s9574_s15  ;;  %v1747_v34 = vsel %vm1227_vm4, %v6597_v47, %v5750_v8  ;;  %v1231_v57 = vsel %vm1227_vm4, %v6594_v46, %v5749_v15  ;;  %v807_v40 = vsel %vm709_vm1, %v804_v0, %v806_v2  ;;  %v7008_v30 = vld [vmem:[%s6515_s26 + $0x120] ss:$2 sm:$0xff] }
  0xbc   : > { %2378 = vmatmul.mubr.f32.gmra.mxu1 %v1842_v53  ;;  %v5758_v12 = vpop.permute.xlu1 %5757  ;;  %v5946_v0 = vpack.i.bf16 %v678_v54, %v581_v45  ;;  %v582_v53 = vrot.slane %v7008_v30, 1  ;;  %v810_v45 = vrot.slane %v7014_v42, 2 }
  0xbd   : > { %v5753_v20 = vpop.permute.xlu0 %5752  ;;  %v5760_v24 = vunpack.i.h.bf16 %v5758_v12  ;;  %v5759_v25 = vunpack.i.l.bf16 %v5758_v12 }
  0xbe   : > { %v5755_v26 = vunpack.i.h.bf16 %v5753_v20  ;;  %v5754_v29 = vunpack.i.l.bf16 %v5753_v20  ;;  %v583_v20 = vsel %vm546_vm0, %v580_v36, %v582_v53 }
  0xbf   : > { %5927 = vrot.lane.b32.xlu1 %v5926_v14, %s9580_s22  ;;  %1676 = vrot.lane.b32.xlu0 %v805_v16, %s9576_s29  ;;  %v679_v14 = vrot.slane %v7014_v42, 1 }
  0xc0   : > { %v1264_v13 = vsel %vm1260_vm5, %v1231_v57, %v5754_v29  ;;  %v1779_v11 = vsel %vm1260_vm5, %v1747_v34, %v5755_v26  ;;  %v1655_v17 = vpop.permute.xlu1 %1654 }
  0xc1   : > { %v1138_v47 = vpop.permute.xlu0 %1137  ;;  %v1297_v38 = vsel %vm1293_vm6, %v1264_v13, %v5759_v25  ;;  %v1811_v46 = vsel %vm1293_vm6, %v1779_v11, %v5760_v24  ;;  %4954 = vmatprep.mubr.msk.f32.mxu1 %vm1908_vm3, %v1655_v17  ;;  %v680_v29 = vsel %vm546_vm0, %v677_v37, %v679_v14  ;;  %v809_v13 = vsel %vm709_vm1, %v806_v2, %v808_v51 }
  0xc2   : > { %4920 = vmatprep.mubr.msk.f32.mxu0 %vm1908_vm3, %v1138_v47  ;;  %v1330_v19 = vsel %vm1326_vm7, %v1297_v38, %v1138_v47  ;;  %v1843_v39 = vsel %vm1326_vm7, %v1811_v46, %v1655_v17  ;;  %v5961_v37 = vpack.i.bf16 %v680_v29, %v583_v20  ;;  %v7051_v47 = vld [vmem:[%s6515_s26 + $0x130] ss:$2 sm:$0xff]  ;;  %v7054_v38 = vld [vmem:[%s6515_s26 + $0x131] ss:$2 sm:$0xff] }
  0xc3   : > { %5937 = vrot.lane.b32.xlu1 %v5936_v10, %s9574_s15  ;;  %5932 = vrot.lane.b32.xlu0 %v5931_v4, %s9578_s12  ;;  %v745_v10 = vrot.slane %v7008_v30, 2  ;;  %v5956_v4 = vpack.i.bf16 %v583_v20, %v6978_v23 }
  0xc4   : > { %2063 = vmatmul.mubr.f32.gmra.mxu0 %v1330_v19  ;;  %2384 = vmatmul.mubr.f32.gmra.mxu1 %v1843_v39  ;;  %v5768_v55 = vpop.permute.xlu1 %5767 }
  0xc5   : > { %v5763_v21 = vpop.permute.xlu0 %5762  ;;  %v5770_v58 = vunpack.i.h.bf16 %v5768_v55  ;;  %v5769_v62 = vunpack.i.l.bf16 %v5768_v55  ;;  %v746_v11 = vsel %vm709_vm1, %v743_v49, %v745_v10  ;;  %v584_v55 = vrot.slane %v7051_v47, 1 }
  0xc6   : > { %v5765_v59 = vunpack.i.h.bf16 %v5763_v21  ;;  %v5764_v31 = vunpack.i.l.bf16 %v5763_v21  ;;  %v681_v21 = vrot.slane %v7054_v38, 1 }
  0xc7   : > { %1678 = vrot.lane.b32.xlu1 %v807_v40, %s9576_s29  ;;  %1161 = vrot.lane.b32.xlu0 %v742_v7, %s9576_s29  ;;  %v5966_v40 = vpack.i.bf16 %v746_v11, %v680_v29 }
  0xc8   : > { %v1748_v56 = vsel %vm1227_vm4, %v6647_v6, %v5765_v59  ;;  %v1232_v41 = vsel %vm1227_vm4, %v6631_v63, %v5764_v31  ;;  %v1140_v3 = vpop.permute.xlu1 %1139  ;;  %v5951_v6 = vpack.i.bf16 %v744_v48, %v678_v54 }
  0xc9   : > { %v5773_v8 = vpop.permute.xlu0 %5772  ;;  %4921 = vmatprep.mubr.msk.f32.mxu0 %vm1908_vm3, %v1140_v3  ;;  %v1265_v63 = vsel %vm1260_vm5, %v1232_v41, %v5769_v62  ;;  %v1780_v35 = vsel %vm1260_vm5, %v1748_v56, %v5770_v58  ;;  %v682_v56 = vsel %vm546_vm0, %v679_v14, %v681_v21  ;;  %v747_v41 = vrot.slane %v7051_v47, 2 }
  0xca   : > { %v5775_v7 = vunpack.i.h.bf16 %v5773_v8  ;;  %v5774_v15 = vunpack.i.l.bf16 %v5773_v8  ;;  %v7084_v8 = vld [vmem:[%s6515_s26 + $0x140] ss:$2 sm:$0xff] }
  0xcb   : > { %5947 = vrot.lane.b32.xlu1 %v5946_v0, %s9578_s12  ;;  %5942 = vrot.lane.b32.xlu0 %v5941_v1, %s9580_s22  ;;  %v811_v0 = vsel %vm709_vm1, %v808_v51, %v810_v45  ;;  %v585_v1 = vsel %vm546_vm0, %v582_v53, %v584_v55  ;;  %v7090_v53 = vld [vmem:[%s6515_s26 + $0x141] ss:$2 sm:$0xff]  ;;  %v586_v20 = vrot.slane %v7084_v8, 1 }
  0xcc   : > { %v1298_v16 = vsel %vm1293_vm6, %v1265_v63, %v5774_v15  ;;  %v1812_v12 = vsel %vm1293_vm6, %v1780_v35, %v5775_v7  ;;  %v5778_v22 = vpop.permute.xlu1 %5777  ;;  %v5976_v35 = vpack.i.bf16 %v682_v56, %v585_v1  ;;  %v5971_v51 = vpack.i.bf16 %v585_v1, %v7014_v42 }
  0xcd   : > { %v1657_v24 = vpop.permute.xlu0 %1656  ;;  %v1331_v25 = vsel %vm1326_vm7, %v1298_v16, %v1140_v3  ;;  %v5780_v34 = vunpack.i.h.bf16 %v5778_v22  ;;  %v5779_v57 = vunpack.i.l.bf16 %v5778_v22  ;;  %v683_v29 = vrot.slane %v7090_v53, 1 }
  0xce   : > { %2069 = vmatmul.mubr.f32.gmra.mxu0 %v1331_v25  ;;  %4955 = vmatprep.mubr.msk.f32.mxu1 %vm1908_vm3, %v1657_v24  ;;  %v1844_v26 = vsel %vm1326_vm7, %v1812_v12, %v1657_v24  ;;  %v748_v12 = vsel %vm709_vm1, %v745_v10, %v747_v41 }
  0xcf   : > { %1163 = vrot.lane.b32.xlu1 %v744_v48, %s9576_s29  ;;  %5952 = vrot.lane.b32.xlu0 %v5951_v6, %s9574_s15  ;;  %v1749_v5 = vsel %vm1227_vm4, %v6683_v28, %v5780_v34  ;;  %v1233_v2 = vsel %vm1227_vm4, %v6680_v27, %v5779_v57  ;;  %v749_v34 = vrot.slane %v7084_v8, 2  ;;  %v684_v47 = vsel %vm546_vm0, %v681_v21, %v683_v29 }
  0xd0   : > { %2390 = vmatmul.mubr.f32.gmra.mxu1 %v1844_v26  ;;  %v5788_v36 = vpop.permute.xlu1 %5787 }
  0xd1   : > { %v5783_v17 = vpop.permute.xlu0 %5782  ;;  %v5790_v46 = vunpack.i.h.bf16 %v5788_v36  ;;  %v5789_v19 = vunpack.i.l.bf16 %v5788_v36 }
  0xd2   : > { %v5785_v39 = vunpack.i.h.bf16 %v5783_v17  ;;  %v5784_v23 = vunpack.i.l.bf16 %v5783_v17 }
  0xd3   : > { %5957 = vrot.lane.b32.xlu1 %v5956_v4, %s9580_s22  ;;  %1680 = vrot.lane.b32.xlu0 %v809_v13, %s9576_s29  ;;  %v587_v4 = vsel %vm546_vm0, %v584_v55, %v586_v20  ;;  %v812_v13 = vrot.slane %v7054_v38, 2  ;;  %v7130_v55 = vld [vmem:[%s6515_s26 + $0x151] ss:$2 sm:$0xff] }
  0xd4   : > { %v1266_v54 = vsel %vm1260_vm5, %v1233_v2, %v5784_v23  ;;  %v1781_v49 = vsel %vm1260_vm5, %v1749_v5, %v5785_v39  ;;  %v1659_v59 = vpop.permute.xlu1 %1658  ;;  %v5986_v23 = vpack.i.bf16 %v587_v4, %v7054_v38  ;;  %v5991_v42 = vpack.i.bf16 %v684_v47, %v587_v4 }
  0xd5   : > { %v1142_v28 = vpop.permute.xlu0 %1141  ;;  %v1299_v31 = vsel %vm1293_vm6, %v1266_v54, %v5789_v19  ;;  %v1813_v27 = vsel %vm1293_vm6, %v1781_v49, %v5790_v46  ;;  %4956 = vmatprep.mubr.msk.f32.mxu1 %vm1908_vm3, %v1659_v59  ;;  %v750_v46 = vsel %vm709_vm1, %v747_v41, %v749_v34  ;;  %v813_v5 = vsel %vm709_vm1, %v810_v45, %v812_v13  ;;  %v7127_v49 = vld [vmem:[%s6515_s26 + $0x150] ss:$2 sm:$0xff] }
  0xd6   : > { %4922 = vmatprep.mubr.msk.f32.mxu0 %vm1908_vm3, %v1142_v28  ;;  %v1332_v58 = vsel %vm1326_vm7, %v1299_v31, %v1142_v28  ;;  %v1845_v62 = vsel %vm1326_vm7, %v1813_v27, %v1659_v59  ;;  %v5996_v54 = vpack.i.bf16 %v750_v46, %v684_v47  ;;  %v814_v45 = vrot.slane %v7090_v53, 2 }
  0xd7   : > { %5967 = vrot.lane.b32.xlu1 %v5966_v40, %s9574_s15  ;;  %5962 = vrot.lane.b32.xlu0 %v5961_v37, %s9578_s12  ;;  %v685_v1 = vrot.slane %v7130_v55, 1  ;;  %v816_v47 = vrot.slane %v7130_v55, 2 }
  0xd8   : > { %2075 = vmatmul.mubr.f32.gmra.mxu0 %v1332_v58  ;;  %2396 = vmatmul.mubr.f32.gmra.mxu1 %v1845_v62  ;;  %v5798_v48 = vpop.permute.xlu1 %5797 }
  0xd9   : > { %v5793_v3 = vpop.permute.xlu0 %5792  ;;  %v5800_v63 = vunpack.i.h.bf16 %v5798_v48  ;;  %v5799_v6 = vunpack.i.l.bf16 %v5798_v48 }
  0xda   : > { %v5795_v7 = vunpack.i.h.bf16 %v5793_v3  ;;  %v5794_v15 = vunpack.i.l.bf16 %v5793_v3 }
  0xdb   : > { %1682 = vrot.lane.b32.xlu1 %v811_v0, %s9576_s29  ;;  %1165 = vrot.lane.b32.xlu0 %v746_v11, %s9576_s29  ;;  %v588_v0 = vrot.slane %v7127_v49, 1 }
  0xdc   : > { %v1750_v14 = vsel %vm1227_vm4, %v6721_v50, %v5795_v7  ;;  %v1234_v16 = vsel %vm1227_vm4, %v6713_v43, %v5794_v15  ;;  %v1144_v22 = vpop.permute.xlu1 %1143  ;;  %v5981_v50 = vpack.i.bf16 %v748_v12, %v682_v56  ;;  %v815_v7 = vsel %vm709_vm1, %v812_v13, %v814_v45 }
  0xdd   : > { %v5803_v24 = vpop.permute.xlu0 %5802  ;;  %4923 = vmatprep.mubr.msk.f32.mxu0 %vm1908_vm3, %v1144_v22  ;;  %v1267_v43 = vsel %vm1260_vm5, %v1234_v16, %v5799_v6  ;;  %v1782_v30 = vsel %vm1260_vm5, %v1750_v14, %v5800_v63  ;;  %v589_v15 = vsel %vm546_vm0, %v586_v20, %v588_v0  ;;  %v686_v63 = vsel %vm546_vm0, %v683_v29, %v685_v1  ;;  %v7160_v14 = vld [vmem:[%s6515_s26 + $0x160] ss:$2 sm:$0xff]  ;;  %v7166_v20 = vld [vmem:[%s6515_s26 + $0x161] ss:$2 sm:$0xff] }
  0xde   : > { %v5805_v25 = vunpack.i.h.bf16 %v5803_v24  ;;  %v5804_v26 = vunpack.i.l.bf16 %v5803_v24  ;;  %v751_v6 = vrot.slane %v7127_v49, 2 }
  0xdf   : > { %5977 = vrot.lane.b32.xlu1 %v5976_v35, %s9578_s12  ;;  %5972 = vrot.lane.b32.xlu0 %v5971_v51, %s9580_s22 }
  0xe0   : > { %v1300_v10 = vsel %vm1293_vm6, %v1267_v43, %v5804_v26  ;;  %v1814_v57 = vsel %vm1293_vm6, %v1782_v30, %v5805_v25  ;;  %v5808_v11 = vpop.permute.xlu1 %5807  ;;  %v6006_v25 = vpack.i.bf16 %v686_v63, %v589_v15  ;;  %v6001_v26 = vpack.i.bf16 %v589_v15, %v7090_v53 }
  0xe1   : > { %v1661_v36 = vpop.permute.xlu0 %1660  ;;  %v1333_v17 = vsel %vm1326_vm7, %v1300_v10, %v1144_v22  ;;  %v5810_v19 = vunpack.i.h.bf16 %v5808_v11  ;;  %v5809_v39 = vunpack.i.l.bf16 %v5808_v11  ;;  %v590_v30 = vrot.slane %v7160_v14, 1 }
  0xe2   : > { %2081 = vmatmul.mubr.f32.gmra.mxu0 %v1333_v17  ;;  %4957 = vmatprep.mubr.msk.f32.mxu1 %vm1908_vm3, %v1661_v36  ;;  %v1846_v37 = vsel %vm1326_vm7, %v1814_v57, %v1661_v36  ;;  %v687_v11 = vrot.slane %v7166_v20, 1  ;;  %v753_v36 = vrot.slane %v7160_v14, 2 }
  0xe3   : > { %1167 = vrot.lane.b32.xlu1 %v748_v12, %s9576_s29  ;;  %5982 = vrot.lane.b32.xlu0 %v5981_v50, %s9574_s15  ;;  %v1751_v27 = vsel %vm1227_vm4, %v6739_v61, %v5810_v19  ;;  %v1235_v38 = vsel %vm1227_vm4, %v6736_v60, %v5809_v39  ;;  %v752_v50 = vsel %vm709_vm1, %v749_v34, %v751_v6 }
  0xe4   : > { %2402 = vmatmul.mubr.f32.gmra.mxu1 %v1846_v37  ;;  %v5818_v2 = vpop.permute.xlu1 %5817  ;;  %v591_v37 = vsel %vm546_vm0, %v588_v0, %v590_v30 }
  0xe5   : > { %v5813_v40 = vpop.permute.xlu0 %5812  ;;  %v5820_v21 = vunpack.i.h.bf16 %v5818_v2  ;;  %v5819_v59 = vunpack.i.l.bf16 %v5818_v2  ;;  %v754_v2 = vsel %vm709_vm1, %v751_v6, %v753_v36  ;;  %v6016_v49 = vpack.i.bf16 %v591_v37, %v7130_v55 }
  0xe6   : > { %v5815_v28 = vunpack.i.h.bf16 %v5813_v40  ;;  %v5814_v31 = vunpack.i.l.bf16 %v5813_v40 }
  0xe7   : > { %5987 = vrot.lane.b32.xlu1 %v5986_v23, %s9580_s22  ;;  %1684 = vrot.lane.b32.xlu0 %v813_v5, %s9576_s29  ;;  %v688_v5 = vsel %vm546_vm0, %v685_v1, %v687_v11 }
  0xe8   : > { %v1268_v58 = vsel %vm1260_vm5, %v1235_v38, %v5814_v31  ;;  %v1783_v62 = vsel %vm1260_vm5, %v1751_v27, %v5815_v28  ;;  %v1663_v56 = vpop.permute.xlu1 %1662  ;;  %v6026_v31 = vpack.i.bf16 %v754_v2, %v688_v5  ;;  %v7203_v27 = vld [vmem:[%s6515_s26 + $0x170] ss:$2 sm:$0xff]  ;;  %v7206_v38 = vld [vmem:[%s6515_s26 + $0x171] ss:$2 sm:$0xff]  ;;  %v6021_v53 = vpack.i.bf16 %v688_v5, %v591_v37 }
  0xe9   : > { %v1146_v61 = vpop.permute.xlu0 %1145  ;;  %v1301_v41 = vsel %vm1293_vm6, %v1268_v58, %v5819_v59  ;;  %v1815_v60 = vsel %vm1293_vm6, %v1783_v62, %v5820_v21  ;;  %4958 = vmatprep.mubr.msk.f32.mxu1 %vm1908_vm3, %v1663_v56  ;;  %v817_v21 = vsel %vm709_vm1, %v814_v45, %v816_v47  ;;  %v818_v45 = vrot.slane %v7166_v20, 2 }
  0xea   : > { %4924 = vmatprep.mubr.msk.f32.mxu0 %vm1908_vm3, %v1146_v61  ;;  %v1334_v48 = vsel %vm1326_vm7, %v1301_v41, %v1146_v61  ;;  %v1847_v3 = vsel %vm1326_vm7, %v1815_v60, %v1663_v56  ;;  %v592_v41 = vrot.slane %v7203_v27, 1  ;;  %v689_v60 = vrot.slane %v7206_v38, 1 }
  0xeb   : > { %5997 = vrot.lane.b32.xlu1 %v5996_v54, %s9574_s15  ;;  %5992 = vrot.lane.b32.xlu0 %v5991_v42, %s9578_s12 }
  0xec   : > { %2087 = vmatmul.mubr.f32.gmra.mxu0 %v1334_v48  ;;  %2408 = vmatmul.mubr.f32.gmra.mxu1 %v1847_v3  ;;  %v5828_v35 = vpop.permute.xlu1 %5827  ;;  %v593_v6 = vsel %vm546_vm0, %v590_v30, %v592_v41  ;;  %v7242_v30 = vld [vmem:[%s6515_s26 + $0x181] ss:$2 sm:$0xff] }
  0xed   : > { %v5823_v51 = vpop.permute.xlu0 %5822  ;;  %v5830_v22 = vunpack.i.h.bf16 %v5828_v35  ;;  %v5829_v24 = vunpack.i.l.bf16 %v5828_v35  ;;  %v690_v35 = vsel %vm546_vm0, %v687_v11, %v689_v60 }
  0xee   : > { %v5825_v16 = vunpack.i.h.bf16 %v5823_v51  ;;  %v5824_v12 = vunpack.i.l.bf16 %v5823_v51  ;;  %v755_v51 = vrot.slane %v7203_v27, 2 }
  0xef   : > { %1686 = vrot.lane.b32.xlu1 %v815_v7, %s9576_s29  ;;  %1169 = vrot.lane.b32.xlu0 %v750_v46, %s9576_s29 }
  0xf0   : > { %v1752_v29 = vsel %vm1227_vm4, %v6761_v18, %v5825_v16  ;;  %v1236_v43 = vsel %vm1227_vm4, %v6753_v9, %v5824_v12  ;;  %v1148_v10 = vpop.permute.xlu1 %1147  ;;  %v6011_v18 = vpack.i.bf16 %v752_v50, %v686_v63  ;;  %v819_v63 = vsel %vm709_vm1, %v816_v47, %v818_v45 }
  0xf1   : > { %v5833_v57 = vpop.permute.xlu0 %5832  ;;  %4925 = vmatprep.mubr.msk.f32.mxu0 %vm1908_vm3, %v1148_v10  ;;  %v1269_v9 = vsel %vm1260_vm5, %v1236_v43, %v5829_v24  ;;  %v1784_v8 = vsel %vm1260_vm5, %v1752_v29, %v5830_v22  ;;  %v7236_v22 = vld [vmem:[%s6515_s26 + $0x180] ss:$2 sm:$0xff]  ;;  %v6036_v43 = vpack.i.bf16 %v690_v35, %v593_v6 }
  0xf2   : > { %v5835_v4 = vunpack.i.h.bf16 %v5833_v57  ;;  %v5834_v13 = vunpack.i.l.bf16 %v5833_v57 }
  0xf3   : > { %6007 = vrot.lane.b32.xlu1 %v6006_v25, %s9578_s12  ;;  %6002 = vrot.lane.b32.xlu0 %v6001_v26, %s9580_s22 }
  0xf4   : > { %v1302_v34 = vsel %vm1293_vm6, %v1269_v9, %v5834_v13  ;;  %v1816_v17 = vsel %vm1293_vm6, %v1784_v8, %v5835_v4  ;;  %v5838_v46 = vpop.permute.xlu1 %5837  ;;  %v756_v4 = vsel %vm709_vm1, %v753_v36, %v755_v51  ;;  %v594_v13 = vrot.slane %v7236_v22, 1 }
  0xf5   : > { %v1665_v19 = vpop.permute.xlu0 %1664  ;;  %v1335_v39 = vsel %vm1326_vm7, %v1302_v34, %v1148_v10  ;;  %v5840_v40 = vunpack.i.h.bf16 %v5838_v46  ;;  %v5839_v54 = vunpack.i.l.bf16 %v5838_v46  ;;  %v691_v34 = vrot.slane %v7242_v30, 1 }
  0xf6   : > { %2093 = vmatmul.mubr.f32.gmra.mxu0 %v1335_v39  ;;  %4959 = vmatprep.mubr.msk.f32.mxu1 %vm1908_vm3, %v1665_v19  ;;  %v1848_v23 = vsel %vm1326_vm7, %v1816_v17, %v1665_v19  ;;  %v757_v17 = vrot.slane %v7236_v22, 2  ;;  %v595_v47 = vsel %vm546_vm0, %v592_v41, %v594_v13  ;;  %v820_v46 = vrot.slane %v7206_v38, 2 }
  0xf7   : > { %1171 = vrot.lane.b32.xlu1 %v752_v50, %s9576_s29  ;;  %6012 = vrot.lane.b32.xlu0 %v6011_v18, %s9574_s15  ;;  %v1753_v1 = vsel %vm1227_vm4, %v6779_v33, %v5840_v40  ;;  %v1237_v55 = vsel %vm1227_vm4, %v6776_v32, %v5839_v54  ;;  %v6031_v50 = vpack.i.bf16 %v593_v6, %v7166_v20 }
  0xf8   : > { %2414 = vmatmul.mubr.f32.gmra.mxu1 %v1848_v23  ;;  %v5848_v59 = vpop.permute.xlu1 %5847  ;;  %v758_v40 = vsel %vm709_vm1, %v755_v51, %v757_v17 }
  0xf9   : > { %v5843_v28 = vpop.permute.xlu0 %5842  ;;  %v5850_v42 = vunpack.i.h.bf16 %v5848_v59  ;;  %v5849_v58 = vunpack.i.l.bf16 %v5848_v59  ;;  %v821_v59 = vsel %vm709_vm1, %v818_v45, %v820_v46  ;;  %v822_v45 = vrot.slane %v7242_v30, 2 }
  0xfa   : > { %v5845_v62 = vunpack.i.h.bf16 %v5843_v28  ;;  %v5844_v0 = vunpack.i.l.bf16 %v5843_v28 }
  0xfb   : > { %6017 = vrot.lane.b32.xlu1 %v6016_v49, %s9580_s22  ;;  %1688 = vrot.lane.b32.xlu0 %v817_v21, %s9576_s29  ;;  %v6046_v21 = vpack.i.bf16 %v595_v47, %v7206_v38  ;;  %v6196_v38 = vld [vmem:[%s6515_s26 + $0xb0] ss:$2 sm:$0xff] }
  0xfc   : > { %v1270_v56 = vsel %vm1260_vm5, %v1237_v55, %v5844_v0  ;;  %v1785_v61 = vsel %vm1260_vm5, %v1753_v1, %v5845_v62  ;;  %v1667_v48 = vpop.permute.xlu1 %1666 }
  0xfd   : > { %v1150_v33 = vpop.permute.xlu0 %1149  ;;  %v1303_v3 = vsel %vm1293_vm6, %v1270_v56, %v5849_v58  ;;  %v1817_v32 = vsel %vm1293_vm6, %v1785_v61, %v5850_v42  ;;  %4960 = vmatprep.mubr.msk.f32.mxu1 %vm1908_vm3, %v1667_v48  ;;  %v7279_v42 = vld [vmem:[%s6515_s26 + $0x190] ss:$2 sm:$0xff]  ;;  %v7282_v58 = vld [vmem:[%s6515_s26 + $0x191] ss:$2 sm:$0xff] }
  0xfe   : > { %4926 = vmatprep.mubr.msk.f32.mxu0 %vm1908_vm3, %v1150_v33  ;;  %v1336_v7 = vsel %vm1326_vm7, %v1303_v3, %v1150_v33  ;;  %v1849_v15 = vsel %vm1326_vm7, %v1817_v32, %v1667_v48  ;;  %v596_v48 = vrot.slane %v7279_v42, 1  ;;  %v693_v33 = vrot.slane %v7282_v58, 1 }
  0xff   : > { %6027 = vrot.lane.b32.xlu1 %v6026_v31, %s9574_s15  ;;  %6022 = vrot.lane.b32.xlu0 %v6021_v53, %s9578_s12  ;;  %v6195_v53 = vld [vmem:[%s6515_s26 + $0xb1] ss:$2 sm:$0xff] }
 0x100   : > { %2099 = vmatmul.mubr.f32.gmra.mxu0 %v1336_v7  ;;  %2420 = vmatmul.mubr.f32.gmra.mxu1 %v1849_v15  ;;  %v5858_v16 = vpop.permute.xlu1 %5857  ;;  %v597_v51 = vsel %vm546_vm0, %v594_v13, %v596_v48  ;;  %v7318_v13 = vld [vmem:[%s6515_s26 + $0x1a1] ss:$2 sm:$0xff] }
 0x101   : > { %v5853_v12 = vpop.permute.xlu0 %5852  ;;  %v5860_v26 = vunpack.i.h.bf16 %v5858_v16  ;;  %v5859_v29 = vunpack.i.l.bf16 %v5858_v16  ;;  %v694_v16 = vsel %vm546_vm0, %v691_v34, %v693_v33 }
 0x102   : > { %v5855_v24 = vunpack.i.h.bf16 %v5853_v12  ;;  %v5854_v25 = vunpack.i.l.bf16 %v5853_v12  ;;  %v759_v12 = vrot.slane %v7279_v42, 2 }
 0x103   : > { %1690 = vrot.lane.b32.xlu1 %v819_v63, %s9576_s29  ;;  %1173 = vrot.lane.b32.xlu0 %v754_v2, %s9576_s29  ;;  %v692_v2 = vsel %vm546_vm0, %v689_v60, %v691_v34 }
 0x104   : > { %v1754_v10 = vsel %vm1227_vm4, %v6801_v52, %v5855_v24  ;;  %v1238_v57 = vsel %vm1227_vm4, %v6793_v44, %v5854_v25  ;;  %v1152_v11 = vpop.permute.xlu1 %1151  ;;  %v6041_v52 = vpack.i.bf16 %v756_v4, %v690_v35  ;;  %v6056_v27 = vpack.i.bf16 %v758_v40, %v692_v2 }
 0x105   : > { %v5863_v9 = vpop.permute.xlu0 %5862  ;;  %4927 = vmatprep.mubr.msk.f32.mxu0 %vm1908_vm3, %v1152_v11  ;;  %v1271_v44 = vsel %vm1260_vm5, %v1238_v57, %v5859_v29  ;;  %v1786_v14 = vsel %vm1260_vm5, %v1754_v10, %v5860_v26  ;;  %v6051_v20 = vpack.i.bf16 %v692_v2, %v595_v47  ;;  %v823_v35 = vsel %vm709_vm1, %v820_v46, %v822_v45  ;;  %v7312_v26 = vld [vmem:[%s6515_s26 + $0x1a0] ss:$2 sm:$0xff] }
 0x106   : > { %v5865_v18 = vunpack.i.h.bf16 %v5863_v9  ;;  %v5864_v8 = vunpack.i.l.bf16 %v5863_v9  ;;  %v6066_v57 = vpack.i.bf16 %v694_v16, %v597_v51  ;;  %v760_v34 = vsel %vm709_vm1, %v757_v17, %v759_v12 }
 0x107   : > { %6037 = vrot.lane.b32.xlu1 %v6036_v43, %s9578_s12  ;;  %6032 = vrot.lane.b32.xlu0 %v6031_v50, %s9580_s22  ;;  %v695_v47 = vrot.slane %v7318_v13, 1  ;;  %v761_v46 = vrot.slane %v7312_v26, 2  ;;  %v824_v2 = vrot.slane %v7282_v58, 2 }
 0x108   : > { %v1304_v36 = vsel %vm1293_vm6, %v1271_v44, %v5864_v8  ;;  %v1818_v37 = vsel %vm1293_vm6, %v1786_v14, %v5865_v18  ;;  %v5868_v19 = vpop.permute.xlu1 %5867  ;;  %v6198_v18 = vld [vmem:[%s6515_s26 + $0xc0] ss:$2 sm:$0xff]  ;;  %v598_v44 = vrot.slane %v7312_v26, 1 }
 0x109   : > { %v1669_v39 = vpop.permute.xlu0 %1668  ;;  %v1337_v23 = vsel %vm1326_vm7, %v1304_v36, %v1152_v11  ;;  %v5870_v54 = vunpack.i.h.bf16 %v5868_v19  ;;  %v5869_v49 = vunpack.i.l.bf16 %v5868_v19  ;;  %v6197_v11 = vld [vmem:[%s6515_s26 + $0xc1] ss:$2 sm:$0xff]  ;;  %v6071_v19 = vpack.i.bf16 %v760_v34, %v694_v16 }
 0x10a   : > { %2105 = vmatmul.mubr.f32.gmra.mxu0 %v1337_v23  ;;  %4961 = vmatprep.mubr.msk.f32.mxu1 %vm1908_vm3, %v1669_v39  ;;  %v1850_v5 = vsel %vm1326_vm7, %v1818_v37, %v1669_v39 }
 0x10b   : > { %1175 = vrot.lane.b32.xlu1 %v756_v4, %s9576_s29  ;;  %6042 = vrot.lane.b32.xlu0 %v6041_v52, %s9574_s15  ;;  %v1755_v56 = vsel %vm1227_vm4, %v6195_v53, %v5870_v54  ;;  %v1239_v61 = vsel %vm1227_vm4, %v6196_v38, %v5869_v49  ;;  %v6061_v4 = vpack.i.bf16 %v597_v51, %v7242_v30  ;;  %v7355_v53 = vld [vmem:[%s6515_s26 + $0x1b0] ss:$2 sm:$0xff] }
 0x10c   : > { %2426 = vmatmul.mubr.f32.gmra.mxu1 %v1850_v5  ;;  %v5878_v28 = vpop.permute.xlu1 %5877  ;;  %v599_v5 = vsel %vm546_vm0, %v596_v48, %v598_v44 }
 0x10d   : > { %v5873_v31 = vpop.permute.xlu0 %5872  ;;  %v5880_v62 = vunpack.i.h.bf16 %v5878_v28  ;;  %v5879_v0 = vunpack.i.l.bf16 %v5878_v28  ;;  %v762_v28 = vsel %vm709_vm1, %v759_v12, %v761_v46  ;;  %v6076_v42 = vpack.i.bf16 %v599_v5, %v7282_v58  ;;  %v6200_v58 = vld [vmem:[%s6515_s26 + $0xd0] ss:$2 sm:$0xff] }
 0x10e   : > { %v5875_v1 = vunpack.i.h.bf16 %v5873_v31  ;;  %v5874_v55 = vunpack.i.l.bf16 %v5873_v31 }
 0x10f   : > { %6047 = vrot.lane.b32.xlu1 %v6046_v21, %s9580_s22  ;;  %1692 = vrot.lane.b32.xlu0 %v821_v59, %s9576_s29  ;;  %v696_v59 = vsel %vm546_vm0, %v693_v33, %v695_v47 }
 0x110   : > { %v1272_v41 = vsel %vm1260_vm5, %v1239_v61, %v5874_v55  ;;  %v1787_v60 = vsel %vm1260_vm5, %v1755_v56, %v5875_v1  ;;  %v1671_v3 = vpop.permute.xlu1 %1670  ;;  %v6086_v55 = vpack.i.bf16 %v762_v28, %v696_v59  ;;  %v7358_v56 = vld [vmem:[%s6515_s26 + $0x1b1] ss:$2 sm:$0xff]  ;;  %v6081_v30 = vpack.i.bf16 %v696_v59, %v599_v5 }
 0x111   : > { %v1154_v32 = vpop.permute.xlu0 %1153  ;;  %v1305_v7 = vsel %vm1293_vm6, %v1272_v41, %v5879_v0  ;;  %v1819_v15 = vsel %vm1293_vm6, %v1787_v60, %v5880_v62  ;;  %4962 = vmatprep.mubr.msk.f32.mxu1 %vm1908_vm3, %v1671_v3  ;;  %v825_v62 = vsel %vm709_vm1, %v822_v45, %v824_v2  ;;  %v6199_v60 = vld [vmem:[%s6515_s26 + $0xd1] ss:$2 sm:$0xff]  ;;  %v826_v45 = vrot.slane %v7318_v13, 2 }
 0x112   : > { %4928 = vmatprep.mubr.msk.f32.mxu0 %vm1908_vm3, %v1154_v32  ;;  %v1338_v63 = vsel %vm1326_vm7, %v1305_v7, %v1154_v32  ;;  %v1851_v6 = vsel %vm1326_vm7, %v1819_v15, %v1671_v3  ;;  %v600_v7 = vrot.slane %v7355_v53, 1  ;;  %v697_v15 = vrot.slane %v7358_v56, 1 }
 0x113   : > { %6057 = vrot.lane.b32.xlu1 %v6056_v27, %s9574_s15  ;;  %6052 = vrot.lane.b32.xlu0 %v6051_v20, %s9578_s12  ;;  %v828_v59 = vrot.slane %v7358_v56, 2 }
 0x114   : > { %2111 = vmatmul.mubr.f32.gmra.mxu0 %v1338_v63  ;;  %2432 = vmatmul.mubr.f32.gmra.mxu1 %v1851_v6  ;;  %v5888_v24 = vpop.permute.xlu1 %5887 }
 0x115   : > { %v5883_v25 = vpop.permute.xlu0 %5882  ;;  %v5890_v50 = vunpack.i.h.bf16 %v5888_v24  ;;  %v5889_v10 = vunpack.i.l.bf16 %v5888_v24  ;;  %v827_v24 = vsel %vm709_vm1, %v824_v2, %v826_v45 }
 0x116   : > { %v5885_v29 = vunpack.i.h.bf16 %v5883_v25  ;;  %v5884_v43 = vunpack.i.l.bf16 %v5883_v25  ;;  %v601_v25 = vsel %vm546_vm0, %v598_v44, %v600_v7  ;;  %v7394_v44 = vld [vmem:[%s6515_s26 + $0x1c1] ss:$2 sm:$0xff] }
 0x117   : > { %1694 = vrot.lane.b32.xlu1 %v823_v35, %s9576_s29  ;;  %1177 = vrot.lane.b32.xlu0 %v758_v40, %s9576_s29  ;;  %v699_v5 = vrot.slane %v7394_v44, 1 }
 0x118   : > { %v1756_v9 = vsel %vm1227_vm4, %v6197_v11, %v5885_v29  ;;  %v1240_v8 = vsel %vm1227_vm4, %v6198_v18, %v5884_v43  ;;  %v1156_v52 = vpop.permute.xlu1 %1155  ;;  %v698_v29 = vsel %vm546_vm0, %v695_v47, %v697_v15  ;;  %v763_v43 = vrot.slane %v7355_v53, 2 }
 0x119   : > { %v5893_v14 = vpop.permute.xlu0 %5892  ;;  %4929 = vmatprep.mubr.msk.f32.mxu0 %vm1908_vm3, %v1156_v52  ;;  %v1273_v22 = vsel %vm1260_vm5, %v1240_v8, %v5889_v10  ;;  %v1788_v17 = vsel %vm1260_vm5, %v1756_v9, %v5890_v50  ;;  %v6096_v8 = vpack.i.bf16 %v698_v29, %v601_v25 }
 0x11a   : > { %v5895_v36 = vunpack.i.h.bf16 %v5893_v14  ;;  %v5894_v37 = vunpack.i.l.bf16 %v5893_v14  ;;  %v764_v47 = vsel %vm709_vm1, %v761_v46, %v763_v43 }
 0x11b   : > { %6067 = vrot.lane.b32.xlu1 %v6066_v57, %s9578_s12  ;;  %6062 = vrot.lane.b32.xlu0 %v6061_v4, %s9580_s22  ;;  %v7388_v57 = vld [vmem:[%s6515_s26 + $0x1c0] ss:$2 sm:$0xff] }
 0x11c   : > { %v1306_v39 = vsel %vm1293_vm6, %v1273_v22, %v5894_v37  ;;  %v1820_v23 = vsel %vm1293_vm6, %v1788_v17, %v5895_v36  ;;  %v5898_v40 = vpop.permute.xlu1 %5897  ;;  %v6202_v36 = vld [vmem:[%s6515_s26 + $0xe0] ss:$2 sm:$0xff]  ;;  %v602_v22 = vrot.slane %v7388_v57, 1  ;;  %v765_v2 = vrot.slane %v7388_v57, 2  ;;  %v3074_v57 = vld [vmem:[%s9565_s3 + $0xf0] sm:$0xff] }
 0x11d   : > { %v1673_v54 = vpop.permute.xlu0 %1672  ;;  %v1339_v49 = vsel %vm1326_vm7, %v1306_v39, %v1156_v52  ;;  %v5900_v31 = vunpack.i.h.bf16 %v5898_v40  ;;  %v5899_v27 = vunpack.i.l.bf16 %v5898_v40  ;;  %v6201_v52 = vld [vmem:[%s6515_s26 + $0xe1] ss:$2 sm:$0xff]  ;;  %v6101_v40 = vpack.i.bf16 %v764_v47, %v698_v29 }
 0x11e   : > { %2117 = vmatmul.mubr.f32.gmra.mxu0 %v1339_v49  ;;  %4963 = vmatprep.mubr.msk.f32.mxu1 %vm1908_vm3, %v1673_v54  ;;  %v1852_v21 = vsel %vm1326_vm7, %v1820_v23, %v1673_v54 }
 0x11f   : > { %1179 = vrot.lane.b32.xlu1 %v760_v34, %s9576_s29  ;;  %6072 = vrot.lane.b32.xlu0 %v6071_v19, %s9574_s15  ;;  %v1757_v48 = vsel %vm1227_vm4, %v6199_v60, %v5900_v31  ;;  %v1241_v33 = vsel %vm1227_vm4, %v6200_v58, %v5899_v27  ;;  %v6091_v34 = vpack.i.bf16 %v601_v25, %v7318_v13  ;;  %v7431_v60 = vld [vmem:[%s6515_s26 + $0x1d0] ss:$2 sm:$0xff] }
 0x120   : > { %2438 = vmatmul.mubr.f32.gmra.mxu1 %v1852_v21  ;;  %v5908_v0 = vpop.permute.xlu1 %5907  ;;  %v603_v21 = vsel %vm546_vm0, %v600_v7, %v602_v22 }
 0x121   : > { %v5903_v1 = vpop.permute.xlu0 %5902  ;;  %v5910_v38 = vunpack.i.h.bf16 %v5908_v0  ;;  %v5909_v61 = vunpack.i.l.bf16 %v5908_v0  ;;  %v766_v0 = vsel %vm709_vm1, %v763_v43, %v765_v2  ;;  %v6106_v53 = vpack.i.bf16 %v603_v21, %v7358_v56  ;;  %v6204_v56 = vld [vmem:[%s6515_s26 + $0xf0] ss:$2 sm:$0xff] }
 0x122   : > { %v5905_v20 = vunpack.i.h.bf16 %v5903_v1  ;;  %v5904_v41 = vunpack.i.l.bf16 %v5903_v1 }
 0x123   : > { %6077 = vrot.lane.b32.xlu1 %v6076_v42, %s9580_s22  ;;  %1696 = vrot.lane.b32.xlu0 %v825_v62, %s9576_s29  ;;  %v700_v62 = vsel %vm546_vm0, %v697_v15, %v699_v5 }
 0x124   : > { %v1274_v3 = vsel %vm1260_vm5, %v1241_v33, %v5904_v41  ;;  %v1789_v32 = vsel %vm1260_vm5, %v1757_v48, %v5905_v20  ;;  %v1675_v63 = vpop.permute.xlu1 %1674  ;;  %v6116_v41 = vpack.i.bf16 %v766_v0, %v700_v62  ;;  %v7434_v48 = vld [vmem:[%s6515_s26 + $0x1d1] ss:$2 sm:$0xff]  ;;  %v6111_v13 = vpack.i.bf16 %v700_v62, %v603_v21 }
 0x125   : > { %v1158_v6 = vpop.permute.xlu0 %1157  ;;  %v1307_v35 = vsel %vm1293_vm6, %v1274_v3, %v5909_v61  ;;  %v1821_v51 = vsel %vm1293_vm6, %v1789_v32, %v5910_v38  ;;  %4964 = vmatprep.mubr.msk.f32.mxu1 %vm1908_vm3, %v1675_v63  ;;  %v829_v38 = vsel %vm709_vm1, %v826_v45, %v828_v59  ;;  %v6203_v32 = vld [vmem:[%s6515_s26 + $0xf1] ss:$2 sm:$0xff]  ;;  %v830_v45 = vrot.slane %v7394_v44, 2 }
 0x126   : > { %4930 = vmatprep.mubr.msk.f32.mxu0 %vm1908_vm3, %v1158_v6  ;;  %v1340_v16 = vsel %vm1326_vm7, %v1307_v35, %v1158_v6  ;;  %v1853_v12 = vsel %vm1326_vm7, %v1821_v51, %v1675_v63  ;;  %v604_v35 = vrot.slane %v7431_v60, 1  ;;  %v701_v51 = vrot.slane %v7434_v48, 1  ;;  %v3058_v62 = vld [vmem:[%s9565_s3 + $0x70] sm:$0xff] }
 0x127   : > { %6087 = vrot.lane.b32.xlu1 %v6086_v55, %s9574_s15  ;;  %6082 = vrot.lane.b32.xlu0 %v6081_v30, %s9578_s12 }
 0x128   : > { %2123 = vmatmul.mubr.f32.gmra.mxu0 %v1340_v16  ;;  %2444 = vmatmul.mubr.f32.gmra.mxu1 %v1853_v12  ;;  %v5918_v50 = vpop.permute.xlu1 %5917 }
 0x129   : > { %v5913_v10 = vpop.permute.xlu0 %5912  ;;  %v5920_v9 = vunpack.i.h.bf16 %v5918_v50  ;;  %v5919_v18 = vunpack.i.l.bf16 %v5918_v50  ;;  %v831_v50 = vsel %vm709_vm1, %v828_v59, %v830_v45 }
 0x12a   : > { %v5915_v4 = vunpack.i.h.bf16 %v5913_v10  ;;  %v5914_v11 = vunpack.i.l.bf16 %v5913_v10  ;;  %v605_v10 = vsel %vm546_vm0, %v602_v22, %v604_v35 }
 0x12b   : > { %1698 = vrot.lane.b32.xlu1 %v827_v24, %s9576_s29  ;;  %1181 = vrot.lane.b32.xlu0 %v762_v28, %s9576_s29  ;;  %v6121_v22 = vpack.i.bf16 %v605_v10, %v7394_v44  ;;  %v3088_v44 = vld [vmem:[%s9565_s3 + $0x160] sm:$0xff] }
 0x12c   : > { %v1758_v14 = vsel %vm1227_vm4, %v6201_v52, %v5915_v4  ;;  %v1242_v37 = vsel %vm1227_vm4, %v6202_v36, %v5914_v11  ;;  %v7466_v4 = vsel %vm546_vm0, %v699_v5, %v701_v51  ;;  %v767_v11 = vrot.slane %v7431_v60, 2  ;;  %v6206_v5 = vld [vmem:[%s6515_s26 + $0x100] ss:$2 sm:$0xff] }
 0x12d   : > { %v1160_v19 = vpop.permute.xlu1 %1159  ;;  %v5923_v17 = vpop.permute.xlu0 %5922  ;;  %v1275_v26 = vsel %vm1260_vm5, %v1242_v37, %v5919_v18  ;;  %v1790_v46 = vsel %vm1260_vm5, %v1758_v14, %v5920_v9  ;;  %v7473_v14 = vld [vmem:[%s6515_s26 + $0x1e1] ss:$2 sm:$0xff] }
 0x12e   : > { %v5925_v39 = vunpack.i.h.bf16 %v5923_v17  ;;  %v5924_v23 = vunpack.i.l.bf16 %v5923_v17  ;;  %4931 = vmatprep.mubr.msk.f32.mxu0 %vm1908_vm3, %v1160_v19  ;;  %v3107_v17 = vld [vmem:[%s9565_s3 + $0x1f8] sm:$0xff] }
 0x12f   : > { %6097 = vrot.lane.b32.xlu1 %v6096_v8, %s9578_s12  ;;  %6092 = vrot.lane.b32.xlu0 %v6091_v34, %s9580_s22  ;;  %v7470_v8 = vld [vmem:[%s6515_s26 + $0x1e0] ss:$2 sm:$0xff] }
 0x130   : > { %v1308_v54 = vsel %vm1293_vm6, %v1275_v26, %v5924_v23  ;;  %v1822_v49 = vsel %vm1293_vm6, %v1790_v46, %v5925_v39  ;;  %v6205_v39 = vld [vmem:[%s6515_s26 + $0x101] ss:$2 sm:$0xff]  ;;  %v606_v46 = vrot.slane %v7470_v8, 1  ;;  %5083 = vmatprep.subr.mxu1 %v3107_v17  ;;  %v834_v17 = vrot.slane %v7473_v14, 2 }
 0x131   : > { %v5928_v28 = vpop.permute.xlu1 %5927  ;;  %v1677_v31 = vpop.permute.xlu0 %1676  ;;  %v1341_v27 = vsel %vm1326_vm7, %v1308_v54, %v1160_v19  ;;  %v7482_v19 = vld [vmem:[%s9565_s3 + $0xf8] sm:$0xff] }
 0x132   : > { %2129 = vmatmul.mubr.f32.gmra.mxu0 %v1341_v27  ;;  %4965 = vmatprep.mubr.msk.f32.mxu1 %vm1908_vm3, %v1677_v31  ;;  %v1854_v42 = vsel %vm1326_vm7, %v1822_v49, %v1677_v31  ;;  %v5930_v1 = vunpack.i.h.bf16 %v5928_v28  ;;  %v5929_v55 = vunpack.i.l.bf16 %v5928_v28  ;;  %v3059_v54 = vld [vmem:[%s9565_s3 + $0x78] sm:$0xff]  ;;  %v703_v27 = vrot.slane %v7473_v14, 1 }
 0x133   : > { %1183 = vrot.lane.b32.xlu1 %v764_v47, %s9576_s29  ;;  %6102 = vrot.lane.b32.xlu0 %v6101_v40, %s9574_s15  ;;  %v6126_v47 = vpack.i.bf16 %v7466_v4, %v605_v10  ;;  %v768_v40 = vsel %vm709_vm1, %v765_v2, %v767_v11  ;;  %v3091_v49 = vld [vmem:[%s9565_s3 + $0x178] sm:$0xff]  ;;  %v3106_v2 = vld [vmem:[%s9565_s3 + $0x1f0] sm:$0xff] }
 0x134   : > { %2450 = vmatmul.mubr.f32.gmra.mxu1 %v1854_v42  ;;  %v1759_v7 = vsel %vm1227_vm4, %v6203_v32, %v5930_v1  ;;  %v1243_v15 = vsel %vm1227_vm4, %v6204_v56, %v5929_v55  ;;  %5003 = vmatprep.subr.mxu0 %v7482_v19  ;;  %v769_v42 = vrot.slane %v7470_v8, 2  ;;  %v6131_v55 = vpack.i.bf16 %v768_v40, %v7466_v4  ;;  %v3105_v32 = vld [vmem:[%s9565_s3 + $0x1e8] sm:$0xff]  ;;  %v3056_v10 = vld [vmem:[%s9565_s3 + $0x60] sm:$0xff] }
 0x135   : > { %v5938_v61 = vpop.permute.xlu1 %5937  ;;  %v5933_v20 = vpop.permute.xlu0 %5932  ;;  %5004 = vmatpush3.msra.mxu0 %v3059_v54  ;;  %5084 = vmatpush3.msra.mxu1 %v3091_v49  ;;  %v3100_v8 = vld [vmem:[%s9565_s3 + $0x1c0] sm:$0xff] }
 0x136   : > { %v5940_v58 = vunpack.i.h.bf16 %v5938_v61  ;;  %v5939_v33 = vunpack.i.l.bf16 %v5938_v61  ;;  %v5935_v30 = vunpack.i.h.bf16 %v5933_v20  ;;  %v5934_v3 = vunpack.i.l.bf16 %v5933_v20  ;;  %5005 = vmatprep.subr.mxu0 %v3074_v57  ;;  %5085 = vmatprep.subr.mxu1 %v3106_v2  ;;  %v3055_v2 = vld [vmem:[%s9565_s3 + $0x58] sm:$0xff] }
 0x137   : > { %6107 = vrot.lane.b32.xlu1 %v6106_v53, %s9580_s22  ;;  %1700 = vrot.lane.b32.xlu0 %v829_v38, %s9576_s29  ;;  %v3073_v38 = vld [vmem:[%s9565_s3 + $0xe8] sm:$0xff]  ;;  %v7549_v56 = vsel %vm709_vm1, %v767_v11, %v769_v42 }
 0x138   : > { %v1276_v63 = vsel %vm1260_vm5, %v1243_v15, %v5934_v3  ;;  %v1791_v6 = vsel %vm1260_vm5, %v1759_v7, %v5935_v30  ;;  %5006 = vmatpush3.msra.mxu0 %v3058_v62  ;;  %v704_v7 = vsel %vm546_vm0, %v701_v51, %v703_v27  ;;  %v3057_v15 = vld [vmem:[%s9565_s3 + $0x68] sm:$0xff]  ;;  %v3072_v51 = vld [vmem:[%s9565_s3 + $0xe0] sm:$0xff]  ;;  %v3102_v62 = vld [vmem:[%s9565_s3 + $0x1d0] sm:$0xff] }
 0x139   : > { %v1679_v16 = vpop.permute.xlu1 %1678  ;;  %v1162_v12 = vpop.permute.xlu0 %1161  ;;  %v1309_v24 = vsel %vm1293_vm6, %v1276_v63, %v5939_v33  ;;  %v1823_v25 = vsel %vm1293_vm6, %v1791_v6, %v5940_v58  ;;  %v832_v58 = vrot.slane %v7434_v48, 2  ;;  %5007 = vmatprep.subr.mxu0 %v3073_v38 }
 0x13a   : > { %4932 = vmatprep.mubr.msk.f32.mxu0 %vm1908_vm3, %v1162_v12  ;;  %4966 = vmatprep.mubr.msk.f32.mxu1 %vm1908_vm3, %v1679_v16  ;;  %v1342_v29 = vsel %vm1326_vm7, %v1309_v24, %v1162_v12  ;;  %v1855_v43 = vsel %vm1326_vm7, %v1823_v25, %v1679_v16  ;;  %v3104_v16 = vld [vmem:[%s9565_s3 + $0x1e0] sm:$0xff]  ;;  %v7573_v24 = vld [vmem:[%s6515_s26 + $0x1f0] ss:$2 sm:$0xff] }
 0x13b   : > { %6117 = vrot.lane.b32.xlu1 %v6116_v41, %s9574_s15  ;;  %6112 = vrot.lane.b32.xlu0 %v6111_v13, %s9578_s12  ;;  %v7532_v41 = vsel %vm546_vm0, %v604_v35, %v606_v46  ;;  %v3089_v13 = vld [vmem:[%s9565_s3 + $0x168] sm:$0xff]  ;;  %s9634_s15 = smov 112   ;;  %v833_v12 = vsel %vm709_vm1, %v830_v45, %v832_v58 }
 0x13c   : > { %2135 = vmatmul.mubr.f32.gmra.mxu0 %v1342_v29  ;;  %2456 = vmatmul.mubr.f32.gmra.mxu1 %v1855_v43  ;;  %v6136_v35 = vpack.i.bf16 %v7532_v41, %v7434_v48  ;;  %v6146_v43 = vpack.i.bf16 %v7549_v56, %v704_v7  ;;  %v3054_v48 = vld [vmem:[%s9565_s3 + $0x50] sm:$0xff] }
 0x13d   : > { %v5948_v9 = vpop.permute.xlu1 %5947  ;;  %v5943_v18 = vpop.permute.xlu0 %5942  ;;  %5008 = vmatpush3.msra.mxu0 %v3057_v15 }
 0x13e   : > { %v5945_v34 = vunpack.i.h.bf16 %v5943_v18  ;;  %v5944_v52 = vunpack.i.l.bf16 %v5943_v18  ;;  %v5950_v36 = vunpack.i.h.bf16 %v5948_v9  ;;  %v5949_v37 = vunpack.i.l.bf16 %v5948_v9  ;;  %5009 = vmatprep.subr.mxu0 %v3072_v51  ;;  %v3071_v18 = vld [vmem:[%s9565_s3 + $0xd8] sm:$0xff]  ;;  %v3085_v51 = vld [vmem:[%s9565_s3 + $0x148] sm:$0xff] }
 0x13f   : > { %1702 = vrot.lane.b32.xlu1 %v831_v50, %s9576_s29  ;;  %1185 = vrot.lane.b32.xlu0 %v766_v0, %s9576_s29  ;;  %v3090_v0 = vld [vmem:[%s9565_s3 + $0x170] sm:$0xff]  ;;  %s9635_s29 = smov 84  }
 0x140   : > { %v1760_v23 = vsel %vm1227_vm4, %v6205_v39, %v5945_v34  ;;  %v1244_v26 = vsel %vm1227_vm4, %v6206_v5, %v5944_v52  ;;  %5086 = vmatpush3.msra.mxu1 %v3090_v0  ;;  %v7577_v50 = vld [vmem:[%s6515_s26 + $0x1f1] ss:$2 sm:$0xff]  ;;  %v608_v5 = vrot.slane %v7573_v24, 1  ;;  %5010 = vmatpush3.msra.mxu0 %v3056_v10  ;;  %v835_v0 = vsel %vm709_vm1, %v832_v58, %v834_v17  ;;  %v3101_v58 = vld [vmem:[%s9565_s3 + $0x1c8] sm:$0xff] }
 0x141   : > { %v1164_v21 = vpop.permute.xlu1 %1163  ;;  %v5953_v59 = vpop.permute.xlu0 %5952  ;;  %v1277_v1 = vsel %vm1260_vm5, %v1244_v26, %v5949_v37  ;;  %v1792_v53 = vsel %vm1260_vm5, %v1760_v23, %v5950_v36  ;;  %5087 = vmatprep.subr.mxu1 %v3105_v32  ;;  %v3103_v34 = vld [vmem:[%s9565_s3 + $0x1d8] sm:$0xff]  ;;  %v705_v26 = vrot.slane %v7577_v50, 1  ;;  %5011 = vmatprep.subr.mxu0 %v3071_v18 }
 0x142   : > { %v5955_v28 = vunpack.i.h.bf16 %v5953_v59  ;;  %v5954_v31 = vunpack.i.l.bf16 %v5953_v59  ;;  %4933 = vmatprep.mubr.msk.f32.mxu0 %vm1908_vm3, %v1164_v21  ;;  %5088 = vmatpush3.msra.mxu1 %v3089_v13  ;;  %v6207_v52 = vld [vmem:[%s6515_s26 + $0x111] ss:$2 sm:$0xff]  ;;  %v6208_v37 = vld [vmem:[%s6515_s26 + $0x110] ss:$2 sm:$0xff]  ;;  %v6210_v13 = vld [vmem:[%s6515_s26 + $0x120] ss:$2 sm:$0xff] }
 0x143   : > { %6127 = vrot.lane.b32.xlu1 %v6126_v47, %s9578_s12  ;;  %6122 = vrot.lane.b32.xlu0 %v6121_v22, %s9580_s22  ;;  %v6141_v22 = vpack.i.bf16 %v704_v7, %v7532_v41  ;;  %v6209_v7 = vld [vmem:[%s6515_s26 + $0x121] ss:$2 sm:$0xff]  ;;  %s4849_s22 = sshll.u32 %s378_s0, 3 }
 0x144   : > { %v1310_v61 = vsel %vm1293_vm6, %v1277_v1, %v5954_v31  ;;  %v1824_v20 = vsel %vm1293_vm6, %v1792_v53, %v5955_v28  ;;  %5089 = vmatprep.subr.mxu1 %v3104_v16  ;;  %v3087_v28 = vld [vmem:[%s9565_s3 + $0x158] sm:$0xff]  ;;  %v3070_v31 = vld [vmem:[%s9565_s3 + $0xd0] sm:$0xff]  ;;  %v609_v1 = vsel %vm546_vm0, %v606_v46, %v608_v5  ;;  %v771_v53 = vrot.slane %v7573_v24, 2  ;;  %5012 = vmatpush3.msra.mxu0 %v3055_v2  ;;  %v3068_v16 = vld [vmem:[%s9565_s3 + $0xc0] sm:$0xff] }
 0x145   : > { %v5958_v33 = vpop.permute.xlu1 %5957  ;;  %v1681_v30 = vpop.permute.xlu0 %1680  ;;  %v1343_v3 = vsel %vm1326_vm7, %v1310_v61, %v1164_v21  ;;  %5090 = vmatpush3.msra.mxu1 %v3088_v44  ;;  %v3086_v46 = vld [vmem:[%s9565_s3 + $0x150] sm:$0xff]  ;;  %5013 = vmatprep.subr.mxu0 %v3070_v31  ;;  %v6151_v32 = vpack.i.bf16 %v609_v1, %v7473_v14 }
 0x146   : > { %2141 = vmatmul.mubr.f32.gmra.mxu0 %v1343_v3  ;;  %4967 = vmatprep.mubr.msk.f32.mxu1 %vm1908_vm3, %v1681_v30  ;;  %v1856_v60 = vsel %vm1326_vm7, %v1824_v20, %v1681_v30  ;;  %v5960_v63 = vunpack.i.h.bf16 %v5958_v33  ;;  %v5959_v6 = vunpack.i.l.bf16 %v5958_v33  ;;  %v3050_v2 = vld [vmem:[%s9565_s3 + $0x30] sm:$0xff] }
 0x147   : > { %1187 = vrot.lane.b32.xlu1 %v768_v40, %s9634_s15  ;;  %6132 = vrot.lane.b32.xlu0 %v6131_v55, %s9635_s29  ;;  %v7638_v55 = vsel %vm546_vm0, %v703_v27, %v705_v26  ;;  %v3069_v27 = vld [vmem:[%s9565_s3 + $0xc8] sm:$0xff] }
 0x148   : > { %2462 = vmatmul.mubr.f32.gmra.mxu1 %v1856_v60  ;;  %v1761_v36 = vsel %vm1227_vm4, %v6207_v52, %v5960_v63  ;;  %v1245_v47 = vsel %vm1227_vm4, %v6208_v37, %v5959_v6  ;;  %5091 = vmatprep.subr.mxu1 %v3103_v34  ;;  %v6156_v3 = vpack.i.bf16 %v7638_v55, %v609_v1  ;;  %v3053_v60 = vld [vmem:[%s9565_s3 + $0x48] sm:$0xff]  ;;  %v3067_v52 = vld [vmem:[%s9565_s3 + $0xb8] sm:$0xff]  ;;  %v7704_v37 = vsel %vm709_vm1, %v771_v53, 0.0 }
 0x149   : > { %v5968_v25 = vpop.permute.xlu1 %5967  ;;  %v5963_v29 = vpop.permute.xlu0 %5962  ;;  %5092 = vmatpush3.msra.mxu1 %v3087_v28  ;;  %v772_v6 = vsel %vm709_vm1, %v769_v42, %v771_v53  ;;  %5014 = vmatpush3.msra.mxu0 %v3054_v48  ;;  %v3052_v42 = vld [vmem:[%s9565_s3 + $0x40] sm:$0xff]  ;;  %v6211_v1 = vld [vmem:[%s6515_s26 + $0x131] ss:$2 sm:$0xff]  ;;  %v6212_v53 = vld [vmem:[%s6515_s26 + $0x130] ss:$2 sm:$0xff] }
 0x14a   : > { %v5970_v45 = vunpack.i.h.bf16 %v5968_v25  ;;  %v5969_v4 = vunpack.i.l.bf16 %v5968_v25  ;;  %v5965_v11 = vunpack.i.h.bf16 %v5963_v29  ;;  %v5964_v9 = vunpack.i.l.bf16 %v5963_v29  ;;  %5093 = vmatprep.subr.mxu1 %v3102_v62  ;;  %5015 = vmatprep.subr.mxu0 %v3069_v27  ;;  %v3098_v62 = vld [vmem:[%s9565_s3 + $0x1b0] sm:$0xff] }
 0x14b   : > { %6137 = vrot.lane.b32.xlu1 %v6136_v35, %s9636_s16  ;;  %1704 = vrot.lane.b32.xlu0 %v833_v12, %s9634_s15 }
 0x14c   : > { %v1278_v39 = vsel %vm1260_vm5, %v1245_v47, %v5964_v9  ;;  %v1793_v23 = vsel %vm1260_vm5, %v1761_v36, %v5965_v11  ;;  %5094 = vmatpush3.msra.mxu1 %v3086_v46  ;;  %5016 = vmatpush3.msra.mxu0 %v3053_v60  ;;  %v836_v11 = vrot.slane %v7577_v50, 2  ;;  %v708_v36 = vsel %vm546_vm0, %v705_v26, 0.0  ;;  %v3084_v47 = vld [vmem:[%s9565_s3 + $0x140] sm:$0xff]  ;;  %v3099_v26 = vld [vmem:[%s9565_s3 + $0x1b8] sm:$0xff]  ;;  %v3097_v60 = vld [vmem:[%s9565_s3 + $0x1a8] sm:$0xff] }
 0x14d   : > { %v1683_v40 = vpop.permute.xlu1 %1682  ;;  %v1166_v54 = vpop.permute.xlu0 %1165  ;;  %v1311_v49 = vsel %vm1293_vm6, %v1278_v39, %v5969_v4  ;;  %v1825_v21 = vsel %vm1293_vm6, %v1793_v23, %v5970_v45  ;;  %5095 = vmatprep.subr.mxu1 %v3101_v58  ;;  %v7691_v4 = vsel %vm546_vm0, %v608_v5, 0.0  ;;  %5017 = vmatprep.subr.mxu0 %v3068_v16  ;;  %v3063_v16 = vld [vmem:[%s9565_s3 + $0x98] sm:$0xff] }
 0x14e   : > { %4934 = vmatprep.mubr.msk.f32.mxu0 %vm1908_vm3, %v1166_v54  ;;  %4968 = vmatprep.mubr.msk.f32.mxu1 %vm1908_vm3, %v1683_v40  ;;  %v1344_v59 = vsel %vm1326_vm7, %v1311_v49, %v1166_v54  ;;  %v1857_v57 = vsel %vm1326_vm7, %v1825_v21, %v1683_v40  ;;  %v6166_v5 = vpack.i.bf16 %v7691_v4, %v7577_v50  ;;  %v3066_v40 = vld [vmem:[%s9565_s3 + $0xb0] sm:$0xff]  ;;  %v3096_v50 = vld [vmem:[%s9565_s3 + $0x1a0] sm:$0xff] }
 0x14f   : > { %6147 = vrot.lane.b32.xlu1 %v6146_v43, %s9635_s29  ;;  %6142 = vrot.lane.b32.xlu0 %v6141_v22, %s9637_s30  ;;  %v6161_v43 = vpack.i.bf16 %v772_v6, %v7638_v55  ;;  %v3051_v22 = vld [vmem:[%s9565_s3 + $0x38] sm:$0xff]  ;;  %v837_v54 = vsel %vm709_vm1, %v834_v17, %v836_v11 }
 0x150   : > { %2147 = vmatmul.mubr.f32.gmra.mxu0 %v1344_v59  ;;  %2468 = vmatmul.mubr.f32.gmra.mxu1 %v1857_v57  ;;  %v6176_v59 = vpack.i.bf16 %v7704_v37, %v708_v36  ;;  %v3083_v57 = vld [vmem:[%s9565_s3 + $0x138] sm:$0xff] }
 0x151   : > { %v5978_v38 = vpop.permute.xlu1 %5977  ;;  %v5973_v61 = vpop.permute.xlu0 %5972  ;;  %5096 = vmatpush3.msra.mxu1 %v3085_v51  ;;  %5018 = vmatpush3.msra.mxu0 %v3052_v42  ;;  %v6213_v42 = vld [vmem:[%s6515_s26 + $0x141] ss:$2 sm:$0xff] }
 0x152   : > { %v5975_v20 = vunpack.i.h.bf16 %v5973_v61  ;;  %v5974_v41 = vunpack.i.l.bf16 %v5973_v61  ;;  %v5980_v33 = vunpack.i.h.bf16 %v5978_v38  ;;  %v5979_v30 = vunpack.i.l.bf16 %v5978_v38  ;;  %5097 = vmatprep.subr.mxu1 %v3100_v8  ;;  %5019 = vmatprep.subr.mxu0 %v3067_v52  ;;  %v3080_v8 = vld [vmem:[%s9565_s3 + $0x120] sm:$0xff]  ;;  %v3062_v52 = vld [vmem:[%s9565_s3 + $0x90] sm:$0xff] }
 0x153   : > { %1706 = vrot.lane.b32.xlu1 %v835_v0, %s9634_s15  ;;  %1189 = vrot.lane.b32.xlu0 %v7549_v56, %s9634_s15  ;;  %v3065_v0 = vld [vmem:[%s9565_s3 + $0xa8] sm:$0xff]  ;;  %v6171_v61 = vpack.i.bf16 %v708_v36, %v7691_v4  ;;  %v3095_v4 = vld [vmem:[%s9565_s3 + $0x198] sm:$0xff] }
 0x154   : > { %v1762_v15 = vsel %vm1227_vm4, %v6209_v7, %v5975_v20  ;;  %v1246_v63 = vsel %vm1227_vm4, %v6210_v13, %v5974_v41  ;;  %5098 = vmatpush3.msra.mxu1 %v3084_v47  ;;  %5020 = vmatpush3.msra.mxu0 %v3051_v22  ;;  %v3064_v7 = vld [vmem:[%s9565_s3 + $0xa0] sm:$0xff] }
 0x155   : > { %v1168_v56 = vpop.permute.xlu1 %1167  ;;  %v5983_v35 = vpop.permute.xlu0 %5982  ;;  %v1279_v29 = vsel %vm1260_vm5, %v1246_v63, %v5979_v30  ;;  %v1794_v10 = vsel %vm1260_vm5, %v1762_v15, %v5980_v33  ;;  %5099 = vmatprep.subr.mxu1 %v3099_v26  ;;  %5021 = vmatprep.subr.mxu0 %v3066_v40  ;;  %v839_v15 = vsel %vm709_vm1, %v836_v11, 0.0  ;;  %v3047_v11 = vld [vmem:[%s9565_s3 + $0x18] sm:$0xff] }
 0x156   : > { %v5985_v12 = vunpack.i.h.bf16 %v5983_v35  ;;  %v5984_v25 = vunpack.i.l.bf16 %v5983_v35  ;;  %4935 = vmatprep.mubr.msk.f32.mxu0 %vm1908_vm3, %v1168_v56  ;;  %5100 = vmatpush3.msra.mxu1 %v3083_v57 }
 0x157   : > { %6157 = vrot.lane.b32.xlu1 %v6156_v3, %s9637_s30  ;;  %6152 = vrot.lane.b32.xlu0 %v6151_v32, %s9636_s16  ;;  %v3082_v3 = vld [vmem:[%s9565_s3 + $0x130] sm:$0xff]  ;;  %v3049_v32 = vld [vmem:[%s9565_s3 + $0x28] sm:$0xff] }
 0x158   : > { %v1312_v44 = vsel %vm1293_vm6, %v1279_v29, %v5984_v25  ;;  %v1826_v45 = vsel %vm1293_vm6, %v1794_v10, %v5985_v12  ;;  %5022 = vmatpush3.msra.mxu0 %v3050_v2  ;;  %5101 = vmatprep.subr.mxu1 %v3098_v62 }
 0x159   : > { %v5988_v9 = vpop.permute.xlu1 %5987  ;;  %v1685_v18 = vpop.permute.xlu0 %1684  ;;  %v1345_v34 = vsel %vm1326_vm7, %v1312_v44, %v1168_v56  ;;  %5023 = vmatprep.subr.mxu0 %v3065_v0  ;;  %5102 = vmatpush3.msra.mxu1 %v3082_v3  ;;  %v3048_v56 = vld [vmem:[%s9565_s3 + $0x20] sm:$0xff]  ;;  %v3093_v0 = vld [vmem:[%s9565_s3 + $0x188] sm:$0xff] }
 0x15a   : > { %2153 = vmatmul.mubr.f32.gmra.mxu0 %v1345_v34  ;;  %4969 = vmatprep.mubr.msk.f32.mxu1 %vm1908_vm3, %v1685_v18  ;;  %v1858_v24 = vsel %vm1326_vm7, %v1826_v45, %v1685_v18  ;;  %v5990_v39 = vunpack.i.h.bf16 %v5988_v9  ;;  %v5989_v23 = vunpack.i.l.bf16 %v5988_v9  ;;  %v3079_v34 = vld [vmem:[%s9565_s3 + $0x118] sm:$0xff] }
 0x15b   : > { %1191 = vrot.lane.b32.xlu1 %v772_v6, %s9634_s15  ;;  %6162 = vrot.lane.b32.xlu0 %v6161_v43, %s9635_s29  ;;  %v3081_v6 = vld [vmem:[%s9565_s3 + $0x128] sm:$0xff] }
 0x15c   : > { %2474 = vmatmul.mubr.f32.gmra.mxu1 %v1858_v24  ;;  %v1763_v55 = vsel %vm1227_vm4, %v6211_v1, %v5990_v39  ;;  %v1247_v38 = vsel %vm1227_vm4, %v6212_v53, %v5989_v23  ;;  %5024 = vmatpush3.msra.mxu0 %v3049_v32  ;;  %v6214_v43 = vld [vmem:[%s6515_s26 + $0x140] ss:$2 sm:$0xff]  ;;  %v3094_v39 = vld [vmem:[%s9565_s3 + $0x190] sm:$0xff] }
 0x15d   : > { %v5998_v49 = vpop.permute.xlu1 %5997  ;;  %v5993_v21 = vpop.permute.xlu0 %5992  ;;  %5103 = vmatprep.subr.mxu1 %v3097_v60  ;;  %5025 = vmatprep.subr.mxu0 %v3064_v7  ;;  %v3046_v23 = vld [vmem:[%s9565_s3 + $0x10] sm:$0xff]  ;;  %v3060_v1 = vld [vmem:[%s9565_s3 + $0x80] sm:$0xff] }
 0x15e   : > { %v6000_v14 = vunpack.i.h.bf16 %v5998_v49  ;;  %v5999_v28 = vunpack.i.l.bf16 %v5998_v49  ;;  %v5995_v17 = vunpack.i.h.bf16 %v5993_v21  ;;  %v5994_v31 = vunpack.i.l.bf16 %v5993_v21  ;;  %5104 = vmatpush3.msra.mxu1 %v3081_v6  ;;  %5026 = vmatpush3.msra.mxu0 %v3048_v56  ;;  %v6216_v56 = vld [vmem:[%s6515_s26 + $0x150] ss:$2 sm:$0xff] }
 0x15f   : > { %6167 = vrot.lane.b32.xlu1 %v6166_v5, %s9636_s16  ;;  %1708 = vrot.lane.b32.xlu0 %v837_v54, %s9634_s15  ;;  %v7818_v54 = vld [vmem:[%s9564_s2] ss:$0 sm:$0xff] }
 0x160   : > { %v1280_v48 = vsel %vm1260_vm5, %v1247_v38, %v5994_v31  ;;  %v1795_v46 = vsel %vm1260_vm5, %v1763_v55, %v5995_v17  ;;  %5105 = vmatprep.subr.mxu1 %v3096_v50  ;;  %5027 = vmatprep.subr.mxu0 %v3063_v16  ;;  %v3078_v17 = vld [vmem:[%s9565_s3 + $0x110] sm:$0xff]  ;;  %v3045_v31 = vld [vmem:[%s9565_s3 + $0x8] sm:$0xff] }
 0x161   : > { %v1687_v20 = vpop.permute.xlu1 %1686  ;;  %v1170_v41 = vpop.permute.xlu0 %1169  ;;  %v1313_v27 = vsel %vm1293_vm6, %v1280_v48, %v5999_v28  ;;  %v1827_v58 = vsel %vm1293_vm6, %v1795_v46, %v6000_v14  ;;  %5106 = vmatpush3.msra.mxu1 %v3080_v8  ;;  %5028 = vmatpush3.msra.mxu0 %v3047_v11  ;;  %v3044_v48 = vld [vmem:[%s9565_s3] sm:$0xff] }
 0x162   : > { %4936 = vmatprep.mubr.msk.f32.mxu0 %vm1908_vm3, %v1170_v41  ;;  %4970 = vmatprep.mubr.msk.f32.mxu1 %vm1908_vm3, %v1687_v20  ;;  %v1346_v33 = vsel %vm1326_vm7, %v1313_v27, %v1170_v41  ;;  %v1859_v30 = vsel %vm1326_vm7, %v1827_v58, %v1687_v20  ;;  %v3092_v41 = vld [vmem:[%s9565_s3 + $0x180] sm:$0xff] }
 0x163   : > { %6177 = vrot.lane.b32.xlu1 %v6176_v59, %s9635_s29  ;;  %6172 = vrot.lane.b32.xlu0 %v6171_v61, %s9637_s30  ;;  %v3061_v59 = vld [vmem:[%s9565_s3 + $0x88] sm:$0xff]  ;;  %s5000_s29 = sshll.u32 %s6460_s21, 7  ;;  %s380_s30 = scalar_lea.vmem [#allocation4], %s4849_s22 }
 0x164   : > { %2159 = vmatmul.mubr.f32.gmra.mxu0 %v1346_v33  ;;  %2480 = vmatmul.mubr.f32.gmra.mxu1 %v1859_v30  ;;  %v3077_v61 = vld [vmem:[%s9565_s3 + $0x108] sm:$0xff]  ;;  %v3076_v30 = vld [vmem:[%s9565_s3 + $0x100] sm:$0xff]  ;;  %s4784_s24 = scalar_lea.hbm %s9573_s11, %s5000_s29 }
 0x165   : > { %v6008_v13 = vpop.permute.xlu1 %6007  ;;  %v6003_v63 = vpop.permute.xlu0 %6002  ;;  %5107 = vmatprep.subr.mxu1 %v3095_v4  ;;  %5029 = vmatprep.subr.mxu0 %v3062_v52 }
 0x166   : > { %v6005_v35 = vunpack.i.h.bf16 %v6003_v63  ;;  %v6004_v51 = vunpack.i.l.bf16 %v6003_v63  ;;  %v6010_v12 = vunpack.i.h.bf16 %v6008_v13  ;;  %v6009_v25 = vunpack.i.l.bf16 %v6008_v13  ;;  %5108 = vmatpush3.msra.mxu1 %v3079_v34  ;;  %5030 = vmatpush3.msra.mxu0 %v3046_v23  ;;  %v6215_v63 = vld [vmem:[%s6515_s26 + $0x151] ss:$2 sm:$0xff] }
 0x167   : > { %1710 = vrot.lane.b32.xlu1 %v839_v15, %s9634_s15  ;;  %1193 = vrot.lane.b32.xlu0 %v7704_v37, %s9634_s15  ;;  %v2046_v44 = vpop.f32.mrf.mxu0  ;;  %s4786_s15 = sshll.u32 %s380_s30, 4  ;;  %s4787_s15 = int_to_ptr.vmem [resolvable:$true] %s4786_s15 }
 0x168   : > { %v1764_v29 = vsel %vm1227_vm4, %v6213_v42, %v6005_v35  ;;  %v1248_v10 = vsel %vm1227_vm4, %v6214_v43, %v6004_v51  ;;  %v2367_v45 = vpop.f32.mrf.mxu1  ;;  %5109 = vmatprep.subr.mxu1 %v3094_v39  ;;  %5031 = vmatprep.subr.mxu0 %v3061_v59 }
 0x169   : > { %v1172_v9 = vpop.permute.xlu1 %1171  ;;  %v6013_v18 = vpop.permute.xlu0 %6012  ;;  %v2558_v24 = vmax.f32 %v2046_v44, %v2367_v45  ;;  %v1281_v26 = vsel %vm1260_vm5, %v1248_v10, %v6009_v25  ;;  %v1796_v40 = vsel %vm1260_vm5, %v1764_v29, %v6010_v12  ;;  %5110 = vmatpush3.msra.mxu1 %v3078_v17  ;;  %5032 = vmatpush3.msra.mxu0 %v3045_v31 }
 0x16a   : > { %v6015_v36 = vunpack.i.h.bf16 %v6013_v18  ;;  %v6014_v37 = vunpack.i.l.bf16 %v6013_v18  ;;  %v2048_v47 = vpop.f32.mrf.mxu0  ;;  %v2369_v22 = vpop.f32.mrf.mxu1  ;;  %4937 = vmatprep.mubr.msk.f32.mxu0 %vm1908_vm3, %v1172_v9  ;;  %5111 = vmatprep.subr.mxu1 %v3093_v0 }
 0x16b   : > { %v2559_v5 = vmax.f32 %v2048_v47, %v2369_v22  ;;  %5033 = vmatprep.subr.mxu0 %v3060_v1  ;;  %5112 = vmatpush3.msra.mxu1 %v3077_v61  ;;  %v6218_v47 = vld [vmem:[%s6515_s26 + $0x160] ss:$2 sm:$0xff] }
 0x16c   : > { %v1314_v49 = vsel %vm1293_vm6, %v1281_v26, %v6014_v37  ;;  %v1828_v21 = vsel %vm1293_vm6, %v1796_v40, %v6015_v36  ;;  %5034 = vmatpush3.msra.mxu0 %v3044_v48  ;;  %5113 = vmatprep.subr.mxu1 %v3092_v41  ;;  %v6217_v36 = vld [vmem:[%s6515_s26 + $0x161] ss:$2 sm:$0xff] }
 0x16d   : > { %v2622_v57 = vmax.f32 %v2558_v24, %v2559_v5  ;;  %v6018_v2 = vpop.permute.xlu1 %6017  ;;  %v1689_v14 = vpop.permute.xlu0 %1688  ;;  %v1347_v28 = vsel %vm1326_vm7, %v1314_v49, %v1172_v9  ;;  %5114 = vmatpush3.msra.mxu1 %v3076_v30 }
 0x16e   : > { %2165 = vmatmul.mubr.f32.gmra.mxu0 %v1347_v28  ;;  %4971 = vmatprep.mubr.msk.f32.mxu1 %vm1908_vm3, %v1689_v14  ;;  %v1860_v62 = vsel %vm1326_vm7, %v1828_v21, %v1689_v14  ;;  %v6020_v53 = vunpack.i.h.bf16 %v6018_v2  ;;  %v6019_v38 = vunpack.i.l.bf16 %v6018_v2 }
 0x16f   : > { %v2661_v55 = vadd.f32 %v7818_v54, %v2622_v57  ;;  %2486 = vmatmul.mubr.f32.gmra.mxu1 %v1860_v62  ;;  %v2052_v46 = vpop.f32.mrf.mxu0  ;;  %5195 = vmatprep.subr.mxu1 %v7482_v19 }
 0x170   : > { %v2373_v20 = vpop.f32.mrf.mxu1  ;;  %v1765_v6 = vsel %vm1227_vm4, %v6215_v63, %v6020_v53  ;;  %v1249_v35 = vsel %vm1227_vm4, %v6216_v56, %v6019_v38 }
 0x171   : > { %v2693_v27 = vmax.f32 %v2661_v55, 0.0  ;;  %v6028_v58 = vpop.permute.xlu1 %6027  ;;  %v6023_v33 = vpop.permute.xlu0 %6022  ;;  %v2560_v51 = vmax.f32 %v2052_v46, %v2373_v20 }
 0x172   : > { %v6030_v3 = vunpack.i.h.bf16 %v6028_v58  ;;  %v6029_v32 = vunpack.i.l.bf16 %v6028_v58  ;;  %v6025_v60 = vunpack.i.h.bf16 %v6023_v33  ;;  %v6024_v7 = vunpack.i.l.bf16 %v6023_v33  ;;  %v2054_v15 = vpop.f32.mrf.mxu0  ;;  %v2375_v13 = vpop.f32.mrf.mxu1 }
 0x173   : > { %2725 = vst [vmem:[#allocation2] sm:$0xff] %v2693_v27  ;;  %v2561_v50 = vmax.f32 %v2054_v15, %v2375_v13  ;;  %v6220_v13 = vld [vmem:[%s6515_s26 + $0x170] ss:$2 sm:$0xff] }
 0x174   : > { %v1282_v16 = vsel %vm1260_vm5, %v1249_v35, %v6024_v7  ;;  %v1797_v12 = vsel %vm1260_vm5, %v1765_v6, %v6025_v60  ;;  %v6219_v7 = vld [vmem:[%s6515_s26 + $0x171] ss:$2 sm:$0xff] }
 0x175   : > { %v2623_v25 = vmax.f32 %v2560_v51, %v2561_v50  ;;  %v1691_v8 = vpop.permute.xlu1 %1690  ;;  %v1174_v42 = vpop.permute.xlu0 %1173  ;;  %v1315_v29 = vsel %vm1293_vm6, %v1282_v16, %v6029_v32  ;;  %v1829_v43 = vsel %vm1293_vm6, %v1797_v12, %v6030_v3 }
 0x176   : > { %4938 = vmatprep.mubr.msk.f32.mxu0 %vm1908_vm3, %v1174_v42  ;;  %4972 = vmatprep.mubr.msk.f32.mxu1 %vm1908_vm3, %v1691_v8  ;;  %v1348_v10 = vsel %vm1326_vm7, %v1315_v29, %v1174_v42  ;;  %v1861_v44 = vsel %vm1326_vm7, %v1829_v43, %v1691_v8 }
 0x177   : > { %v2662_v45 = vadd.f32 %v7818_v54, %v2623_v25  ;;  %2171 = vmatmul.mubr.f32.gmra.mxu0 %v1348_v10  ;;  %2492 = vmatmul.mubr.f32.gmra.mxu1 %v1861_v44 }
 0x179   : > { %v2694_v4 = vmax.f32 %v2662_v45, 0.0  ;;  %v6038_v11 = vpop.permute.xlu1 %6037  ;;  %v6033_v9 = vpop.permute.xlu0 %6032 }
 0x17a   : > { %v6035_v18 = vunpack.i.h.bf16 %v6033_v9  ;;  %v6034_v34 = vunpack.i.l.bf16 %v6033_v9  ;;  %v2058_v19 = vpop.f32.mrf.mxu0  ;;  %v6040_v52 = vunpack.i.h.bf16 %v6038_v11  ;;  %v6039_v24 = vunpack.i.l.bf16 %v6038_v11 }
 0x17b   : > { %2726 = vst [vmem:[#allocation2 + $0x8] sm:$0xff] %v2694_v4 }
 0x17c   : > { %v1766_v37 = vsel %vm1227_vm4, %v6217_v36, %v6035_v18  ;;  %v1250_v22 = vsel %vm1227_vm4, %v6218_v47, %v6034_v34  ;;  %v2379_v39 = vpop.f32.mrf.mxu1  ;;  %v2060_v23 = vpop.f32.mrf.mxu0 }
 0x17d   : > { %v1176_v5 = vpop.permute.xlu1 %1175  ;;  %v6043_v26 = vpop.permute.xlu0 %6042  ;;  %v2562_v59 = vmax.f32 %v2058_v19, %v2379_v39  ;;  %v1283_v2 = vsel %vm1260_vm5, %v1250_v22, %v6039_v24  ;;  %v1798_v14 = vsel %vm1260_vm5, %v1766_v37, %v6040_v52  ;;  %v6221_v19 = vld [vmem:[%s6515_s26 + $0x181] ss:$2 sm:$0xff]  ;;  %v6222_v24 = vld [vmem:[%s6515_s26 + $0x180] ss:$2 sm:$0xff] }
 0x17e   : > { %v6045_v40 = vunpack.i.h.bf16 %v6043_v26  ;;  %v6044_v49 = vunpack.i.l.bf16 %v6043_v26  ;;  %v2381_v21 = vpop.f32.mrf.mxu1  ;;  %4939 = vmatprep.mubr.msk.f32.mxu0 %vm1908_vm3, %v1176_v5 }
 0x17f   : > { %v2563_v57 = vmax.f32 %v2060_v23, %v2381_v21 }
 0x180   : > { %v1316_v28 = vsel %vm1293_vm6, %v1283_v2, %v6044_v49  ;;  %v1830_v17 = vsel %vm1293_vm6, %v1798_v14, %v6045_v40 }
 0x181   : > { %v2624_v31 = vmax.f32 %v2562_v59, %v2563_v57  ;;  %v6048_v62 = vpop.permute.xlu1 %6047  ;;  %v1693_v0 = vpop.permute.xlu0 %1692  ;;  %v1349_v1 = vsel %vm1326_vm7, %v1316_v28, %v1176_v5 }
 0x182   : > { %2177 = vmatmul.mubr.f32.gmra.mxu0 %v1349_v1  ;;  %4973 = vmatprep.mubr.msk.f32.mxu1 %vm1908_vm3, %v1693_v0  ;;  %v1862_v55 = vsel %vm1326_vm7, %v1830_v17, %v1693_v0  ;;  %v6050_v38 = vunpack.i.h.bf16 %v6048_v62  ;;  %v6049_v61 = vunpack.i.l.bf16 %v6048_v62 }
 0x183   : > { %v2663_v53 = vadd.f32 %v7818_v54, %v2624_v31  ;;  %2498 = vmatmul.mubr.f32.gmra.mxu1 %v1862_v55 }
 0x184   : > { %v2064_v48 = vpop.f32.mrf.mxu0  ;;  %v2385_v46 = vpop.f32.mrf.mxu1  ;;  %v1767_v15 = vsel %vm1227_vm4, %v6219_v7, %v6050_v38  ;;  %v1251_v63 = vsel %vm1227_vm4, %v6220_v13, %v6049_v61 }
 0x185   : > { %v2695_v20 = vmax.f32 %v2663_v53, 0.0  ;;  %v6058_v41 = vpop.permute.xlu1 %6057  ;;  %v6053_v27 = vpop.permute.xlu0 %6052  ;;  %v2564_v6 = vmax.f32 %v2064_v48, %v2385_v46 }
 0x186   : > { %v6060_v58 = vunpack.i.h.bf16 %v6058_v41  ;;  %v6059_v33 = vunpack.i.l.bf16 %v6058_v41  ;;  %v6055_v30 = vunpack.i.h.bf16 %v6053_v27  ;;  %v6054_v3 = vunpack.i.l.bf16 %v6053_v27  ;;  %v2066_v32 = vpop.f32.mrf.mxu0  ;;  %v2387_v60 = vpop.f32.mrf.mxu1 }
 0x187   : > { %2727 = vst [vmem:[#allocation2 + $0x10] sm:$0xff] %v2695_v20  ;;  %v2565_v56 = vmax.f32 %v2066_v32, %v2387_v60  ;;  %v6224_v60 = vld [vmem:[%s6515_s26 + $0x190] ss:$2 sm:$0xff] }
 0x188   : > { %v1284_v35 = vsel %vm1260_vm5, %v1251_v63, %v6054_v3  ;;  %v1799_v51 = vsel %vm1260_vm5, %v1767_v15, %v6055_v30  ;;  %v6223_v3 = vld [vmem:[%s6515_s26 + $0x191] ss:$2 sm:$0xff] }
 0x189   : > { %v2625_v50 = vmax.f32 %v2564_v6, %v2565_v56  ;;  %v1695_v16 = vpop.permute.xlu1 %1694  ;;  %v1178_v12 = vpop.permute.xlu0 %1177  ;;  %v1317_v25 = vsel %vm1293_vm6, %v1284_v35, %v6059_v33  ;;  %v1831_v8 = vsel %vm1293_vm6, %v1799_v51, %v6060_v58 }
 0x18a   : > { %4940 = vmatprep.mubr.msk.f32.mxu0 %vm1908_vm3, %v1178_v12  ;;  %4974 = vmatprep.mubr.msk.f32.mxu1 %vm1908_vm3, %v1695_v16  ;;  %v1350_v42 = vsel %vm1326_vm7, %v1317_v25, %v1178_v12  ;;  %v1863_v29 = vsel %vm1326_vm7, %v1831_v8, %v1695_v16 }
 0x18b   : > { %v2664_v43 = vadd.f32 %v7818_v54, %v2625_v50  ;;  %2183 = vmatmul.mubr.f32.gmra.mxu0 %v1350_v42  ;;  %2504 = vmatmul.mubr.f32.gmra.mxu1 %v1863_v29 }
 0x18d   : > { %v2696_v10 = vmax.f32 %v2664_v43, 0.0  ;;  %v6068_v44 = vpop.permute.xlu1 %6067  ;;  %v6063_v45 = vpop.permute.xlu0 %6062 }
 0x18e   : > { %v6065_v4 = vunpack.i.h.bf16 %v6063_v45  ;;  %v6064_v11 = vunpack.i.l.bf16 %v6063_v45  ;;  %v2070_v9 = vpop.f32.mrf.mxu0  ;;  %v6070_v18 = vunpack.i.h.bf16 %v6068_v44  ;;  %v6069_v34 = vunpack.i.l.bf16 %v6068_v44 }
 0x18f   : > { %2728 = vst [vmem:[#allocation2 + $0x18] sm:$0xff] %v2696_v10 }
 0x190   : > { %v1768_v52 = vsel %vm1227_vm4, %v6221_v19, %v6065_v4  ;;  %v1252_v36 = vsel %vm1227_vm4, %v6222_v24, %v6064_v11  ;;  %v2391_v37 = vpop.f32.mrf.mxu1  ;;  %v2072_v47 = vpop.f32.mrf.mxu0 }
 0x191   : > { %v1180_v22 = vpop.permute.xlu1 %1179  ;;  %v6073_v39 = vpop.permute.xlu0 %6072  ;;  %v2566_v40 = vmax.f32 %v2070_v9, %v2391_v37  ;;  %v1285_v21 = vsel %vm1260_vm5, %v1252_v36, %v6069_v34  ;;  %v1800_v59 = vsel %vm1260_vm5, %v1768_v52, %v6070_v18  ;;  %v6225_v9 = vld [vmem:[%s6515_s26 + $0x1a1] ss:$2 sm:$0xff]  ;;  %v6226_v34 = vld [vmem:[%s6515_s26 + $0x1a0] ss:$2 sm:$0xff] }
 0x192   : > { %v6075_v23 = vunpack.i.h.bf16 %v6073_v39  ;;  %v6074_v5 = vunpack.i.l.bf16 %v6073_v39  ;;  %v2393_v26 = vpop.f32.mrf.mxu1  ;;  %4941 = vmatprep.mubr.msk.f32.mxu0 %vm1908_vm3, %v1180_v22 }
 0x193   : > { %v2567_v49 = vmax.f32 %v2072_v47, %v2393_v26 }
 0x194   : > { %v1318_v57 = vsel %vm1293_vm6, %v1285_v21, %v6074_v5  ;;  %v1832_v2 = vsel %vm1293_vm6, %v1800_v59, %v6075_v23 }
 0x195   : > { %v2626_v14 = vmax.f32 %v2566_v40, %v2567_v49  ;;  %v6078_v28 = vpop.permute.xlu1 %6077  ;;  %v1697_v17 = vpop.permute.xlu0 %1696  ;;  %v1351_v31 = vsel %vm1326_vm7, %v1318_v57, %v1180_v22 }
 0x196   : > { %2189 = vmatmul.mubr.f32.gmra.mxu0 %v1351_v31  ;;  %4975 = vmatprep.mubr.msk.f32.mxu1 %vm1908_vm3, %v1697_v17  ;;  %v1864_v62 = vsel %vm1326_vm7, %v1832_v2, %v1697_v17  ;;  %v6080_v1 = vunpack.i.h.bf16 %v6078_v28  ;;  %v6079_v55 = vunpack.i.l.bf16 %v6078_v28 }
 0x197   : > { %v2665_v0 = vadd.f32 %v7818_v54, %v2626_v14  ;;  %2510 = vmatmul.mubr.f32.gmra.mxu1 %v1864_v62 }
 0x198   : > { %v2076_v53 = vpop.f32.mrf.mxu0  ;;  %v2397_v38 = vpop.f32.mrf.mxu1  ;;  %v1769_v32 = vsel %vm1227_vm4, %v6223_v3, %v6080_v1  ;;  %v1253_v7 = vsel %vm1227_vm4, %v6224_v60, %v6079_v55 }
 0x199   : > { %v2697_v61 = vmax.f32 %v2665_v0, 0.0  ;;  %v6088_v48 = vpop.permute.xlu1 %6087  ;;  %v6083_v46 = vpop.permute.xlu0 %6082  ;;  %v2568_v15 = vmax.f32 %v2076_v53, %v2397_v38 }
 0x19a   : > { %v6090_v20 = vunpack.i.h.bf16 %v6088_v48  ;;  %v6089_v41 = vunpack.i.l.bf16 %v6088_v48  ;;  %v6085_v27 = vunpack.i.h.bf16 %v6083_v46  ;;  %v6084_v58 = vunpack.i.l.bf16 %v6083_v46  ;;  %v2078_v33 = vpop.f32.mrf.mxu0  ;;  %v2399_v30 = vpop.f32.mrf.mxu1 }
 0x19b   : > { %2729 = vst [vmem:[#allocation2 + $0x20] sm:$0xff] %v2697_v61  ;;  %v2569_v13 = vmax.f32 %v2078_v33, %v2399_v30  ;;  %v6228_v30 = vld [vmem:[%s6515_s26 + $0x1b0] ss:$2 sm:$0xff] }
 0x19c   : > { %v1286_v63 = vsel %vm1260_vm5, %v1253_v7, %v6084_v58  ;;  %v1801_v6 = vsel %vm1260_vm5, %v1769_v32, %v6085_v27  ;;  %v6227_v58 = vld [vmem:[%s6515_s26 + $0x1b1] ss:$2 sm:$0xff] }
 0x19d   : > { %v2627_v56 = vmax.f32 %v2568_v15, %v2569_v13  ;;  %v1699_v35 = vpop.permute.xlu1 %1698  ;;  %v1182_v51 = vpop.permute.xlu0 %1181  ;;  %v1319_v50 = vsel %vm1293_vm6, %v1286_v63, %v6089_v41  ;;  %v1833_v16 = vsel %vm1293_vm6, %v1801_v6, %v6090_v20 }
 0x19e   : > { %4942 = vmatprep.mubr.msk.f32.mxu0 %vm1908_vm3, %v1182_v51  ;;  %4976 = vmatprep.mubr.msk.f32.mxu1 %vm1908_vm3, %v1699_v35  ;;  %v1352_v12 = vsel %vm1326_vm7, %v1319_v50, %v1182_v51  ;;  %v1865_v25 = vsel %vm1326_vm7, %v1833_v16, %v1699_v35 }
 0x19f   : > { %v2666_v8 = vadd.f32 %v7818_v54, %v2627_v56  ;;  %2195 = vmatmul.mubr.f32.gmra.mxu0 %v1352_v12  ;;  %2516 = vmatmul.mubr.f32.gmra.mxu1 %v1865_v25 }
 0x1a1   : > { %v2698_v42 = vmax.f32 %v2666_v8, 0.0  ;;  %v6098_v29 = vpop.permute.xlu1 %6097  ;;  %v6093_v43 = vpop.permute.xlu0 %6092 }
 0x1a2   : > { %v6095_v10 = vunpack.i.h.bf16 %v6093_v43  ;;  %v6094_v44 = vunpack.i.l.bf16 %v6093_v43  ;;  %v2082_v45 = vpop.f32.mrf.mxu0  ;;  %v6100_v4 = vunpack.i.h.bf16 %v6098_v29  ;;  %v6099_v11 = vunpack.i.l.bf16 %v6098_v29 }
 0x1a3   : > { %2730 = vst [vmem:[#allocation2 + $0x28] sm:$0xff] %v2698_v42 }
 0x1a4   : > { %v1770_v18 = vsel %vm1227_vm4, %v6225_v9, %v6095_v10  ;;  %v1254_v19 = vsel %vm1227_vm4, %v6226_v34, %v6094_v44  ;;  %v2403_v52 = vpop.f32.mrf.mxu1  ;;  %v2084_v24 = vpop.f32.mrf.mxu0 }
 0x1a5   : > { %v1184_v36 = vpop.permute.xlu1 %1183  ;;  %v6103_v37 = vpop.permute.xlu0 %6102  ;;  %v2570_v23 = vmax.f32 %v2082_v45, %v2403_v52  ;;  %v1287_v26 = vsel %vm1260_vm5, %v1254_v19, %v6099_v11  ;;  %v1802_v40 = vsel %vm1260_vm5, %v1770_v18, %v6100_v4  ;;  %v6229_v45 = vld [vmem:[%s6515_s26 + $0x1c1] ss:$2 sm:$0xff]  ;;  %v6230_v11 = vld [vmem:[%s6515_s26 + $0x1c0] ss:$2 sm:$0xff] }
 0x1a6   : > { %v6105_v47 = vunpack.i.h.bf16 %v6103_v37  ;;  %v6104_v22 = vunpack.i.l.bf16 %v6103_v37  ;;  %v2405_v39 = vpop.f32.mrf.mxu1  ;;  %4943 = vmatprep.mubr.msk.f32.mxu0 %vm1908_vm3, %v1184_v36 }
 0x1a7   : > { %v2571_v5 = vmax.f32 %v2084_v24, %v2405_v39 }
 0x1a8   : > { %v1320_v49 = vsel %vm1293_vm6, %v1287_v26, %v6104_v22  ;;  %v1834_v21 = vsel %vm1293_vm6, %v1802_v40, %v6105_v47 }
 0x1a9   : > { %v2628_v59 = vmax.f32 %v2570_v23, %v2571_v5  ;;  %v6108_v57 = vpop.permute.xlu1 %6107  ;;  %v1701_v2 = vpop.permute.xlu0 %1700  ;;  %v1353_v14 = vsel %vm1326_vm7, %v1320_v49, %v1184_v36 }
 0x1aa   : > { %2201 = vmatmul.mubr.f32.gmra.mxu0 %v1353_v14  ;;  %4977 = vmatprep.mubr.msk.f32.mxu1 %vm1908_vm3, %v1701_v2  ;;  %v1866_v28 = vsel %vm1326_vm7, %v1834_v21, %v1701_v2  ;;  %v6110_v31 = vunpack.i.h.bf16 %v6108_v57  ;;  %v6109_v62 = vunpack.i.l.bf16 %v6108_v57  ;;  %v7957_v14 = vld [vmem:[#allocation2 + $0x20] ss:$2 sm:$0xff] }
 0x1ab   : > { %v2667_v17 = vadd.f32 %v7818_v54, %v2628_v59  ;;  %2522 = vmatmul.mubr.f32.gmra.mxu1 %v1866_v28 }
 0x1ac   : > { %v2088_v0 = vpop.f32.mrf.mxu0  ;;  %v2409_v1 = vpop.f32.mrf.mxu1  ;;  %v1771_v33 = vsel %vm1227_vm4, %v6227_v58, %v6110_v31  ;;  %v1255_v3 = vsel %vm1227_vm4, %v6228_v30, %v6109_v62 }
 0x1ad   : > { %v2699_v55 = vmax.f32 %v2667_v17, 0.0  ;;  %v6118_v53 = vpop.permute.xlu1 %6117  ;;  %v6113_v38 = vpop.permute.xlu0 %6112  ;;  %v2572_v32 = vmax.f32 %v2088_v0, %v2409_v1 }
 0x1ae   : > { %v6120_v61 = vunpack.i.h.bf16 %v6118_v53  ;;  %v6119_v48 = vunpack.i.l.bf16 %v6118_v53  ;;  %v6115_v46 = vunpack.i.h.bf16 %v6113_v38  ;;  %v6114_v20 = vunpack.i.l.bf16 %v6113_v38  ;;  %v2090_v41 = vpop.f32.mrf.mxu0  ;;  %v2411_v27 = vpop.f32.mrf.mxu1  ;;  %v6231_v53 = vld [vmem:[%s6515_s26 + $0x1d1] ss:$2 sm:$0xff] }
 0x1af   : > { %2731 = vst [vmem:[#allocation2 + $0x30] sm:$0xff] %v2699_v55  ;;  %v2573_v60 = vmax.f32 %v2090_v41, %v2411_v27 }
 0x1b0   : > { %v1288_v7 = vsel %vm1260_vm5, %v1255_v3, %v6114_v20  ;;  %v1803_v15 = vsel %vm1260_vm5, %v1771_v33, %v6115_v46  ;;  %v9582_v46 = vrot.slane %v7957_v14, 2  ;;  %v6232_v3 = vld [vmem:[%s6515_s26 + $0x1d0] ss:$2 sm:$0xff] }
 0x1b1   : > { %v2629_v13 = vmax.f32 %v2572_v32, %v2573_v60  ;;  %v1703_v63 = vpop.permute.xlu1 %1702  ;;  %v1186_v6 = vpop.permute.xlu0 %1185  ;;  %v1321_v56 = vsel %vm1293_vm6, %v1288_v7, %v6119_v48  ;;  %v1835_v35 = vsel %vm1293_vm6, %v1803_v15, %v6120_v61 }
 0x1b2   : > { %4944 = vmatprep.mubr.msk.f32.mxu0 %vm1908_vm3, %v1186_v6  ;;  %4978 = vmatprep.mubr.msk.f32.mxu1 %vm1908_vm3, %v1703_v63  ;;  %v1354_v51 = vsel %vm1326_vm7, %v1321_v56, %v1186_v6  ;;  %v1867_v50 = vsel %vm1326_vm7, %v1835_v35, %v1703_v63 }
 0x1b3   : > { %v2668_v16 = vadd.f32 %v7818_v54, %v2629_v13  ;;  %2207 = vmatmul.mubr.f32.gmra.mxu0 %v1354_v51  ;;  %2528 = vmatmul.mubr.f32.gmra.mxu1 %v1867_v50 }
 0x1b5   : > { %v2700_v12 = vmax.f32 %v2668_v16, 0.0  ;;  %v6128_v25 = vpop.permute.xlu1 %6127  ;;  %v6123_v8 = vpop.permute.xlu0 %6122 }
 0x1b6   : > { %v6125_v42 = vunpack.i.h.bf16 %v6123_v8  ;;  %v6124_v29 = vunpack.i.l.bf16 %v6123_v8  ;;  %v2094_v43 = vpop.f32.mrf.mxu0  ;;  %v6130_v10 = vunpack.i.h.bf16 %v6128_v25  ;;  %v6129_v44 = vunpack.i.l.bf16 %v6128_v25 }
 0x1b7   : > { %2732 = vst [vmem:[#allocation2 + $0x38] sm:$0xff] %v2700_v12 }
 0x1b8   : > { %v1772_v4 = vsel %vm1227_vm4, %v6229_v45, %v6125_v42  ;;  %v1256_v9 = vsel %vm1227_vm4, %v6230_v11, %v6124_v29  ;;  %v2415_v18 = vpop.f32.mrf.mxu1  ;;  %v2096_v34 = vpop.f32.mrf.mxu0  ;;  %v6233_v11 = vld [vmem:[%s6515_s26 + $0x1e1] ss:$2 sm:$0xff] }
 0x1b9   : > { %v1188_v19 = vpop.permute.xlu1 %1187  ;;  %v6133_v52 = vpop.permute.xlu0 %6132  ;;  %v2574_v47 = vmax.f32 %v2094_v43, %v2415_v18  ;;  %v1289_v39 = vsel %vm1260_vm5, %v1256_v9, %v6129_v44  ;;  %v1804_v23 = vsel %vm1260_vm5, %v1772_v4, %v6130_v10  ;;  %v6234_v18 = vld [vmem:[%s6515_s26 + $0x1e0] ss:$2 sm:$0xff] }
 0x1ba   : > { %v6135_v24 = vunpack.i.h.bf16 %v6133_v52  ;;  %v6134_v36 = vunpack.i.l.bf16 %v6133_v52  ;;  %v2417_v37 = vpop.f32.mrf.mxu1  ;;  %4945 = vmatprep.mubr.msk.f32.mxu0 %vm1908_vm3, %v1188_v19 }
 0x1bb   : > { %v2575_v22 = vmax.f32 %v2096_v34, %v2417_v37 }
 0x1bc   : > { %v1322_v5 = vsel %vm1293_vm6, %v1289_v39, %v6134_v36  ;;  %v1836_v26 = vsel %vm1293_vm6, %v1804_v23, %v6135_v24 }
 0x1bd   : > { %v2630_v40 = vmax.f32 %v2574_v47, %v2575_v22  ;;  %v6138_v49 = vpop.permute.xlu1 %6137  ;;  %v1705_v21 = vpop.permute.xlu0 %1704  ;;  %v1355_v59 = vsel %vm1326_vm7, %v1322_v5, %v1188_v19 }
 0x1be   : > { %v6140_v57 = vunpack.i.h.bf16 %v6138_v49  ;;  %2213 = vmatmul.mubr.f32.gmra.mxu0 %v1355_v59  ;;  %4979 = vmatprep.mubr.msk.f32.mxu1 %vm1908_vm3, %v1705_v21  ;;  %v1868_v2 = vsel %vm1326_vm7, %v1836_v26, %v1705_v21  ;;  %v7959_v28 = vld [vmem:[#allocation2 + $0x30] ss:$2 sm:$0xff]  ;;  %v6139_v31 = vunpack.i.l.bf16 %v6138_v49 }
 0x1bf   : > { %v2669_v17 = vadd.f32 %v7818_v54, %v2630_v40  ;;  %2534 = vmatmul.mubr.f32.gmra.mxu1 %v1868_v2  ;;  %v2953_v62 = vrot.slane %v7959_v28, 2 }
 0x1c0   : > { %v2100_v0 = vpop.f32.mrf.mxu0  ;;  %v2421_v1 = vpop.f32.mrf.mxu1  ;;  %v1773_v38 = vsel %vm1227_vm4, %v6231_v53, %v6140_v57  ;;  %v1257_v32 = vsel %vm1227_vm4, %v6232_v3, %v6139_v31 }
 0x1c1   : > { %v2701_v55 = vmax.f32 %v2669_v17, 0.0  ;;  %v6148_v61 = vpop.permute.xlu1 %6147  ;;  %v6143_v48 = vpop.permute.xlu0 %6142  ;;  %v2576_v60 = vmax.f32 %v2100_v0, %v2421_v1  ;;  %v7973_v15 = vsel %vm709_vm1, %v9582_v46, %v2953_v62  ;;  %v2791_v0 = vld [vmem:[#allocation2 + $0x11] ss:$2 sm:$0xff] }
 0x1c2   : > { %v6150_v20 = vunpack.i.h.bf16 %v6148_v61  ;;  %v6149_v41 = vunpack.i.l.bf16 %v6148_v61  ;;  %v6145_v27 = vunpack.i.h.bf16 %v6143_v48  ;;  %v6144_v58 = vunpack.i.l.bf16 %v6143_v48  ;;  %v2102_v33 = vpop.f32.mrf.mxu0  ;;  %v2423_v30 = vpop.f32.mrf.mxu1 }
 0x1c3   : > { %2733 = vst [vmem:[#allocation2 + $0x40] sm:$0xff] %v2701_v55  ;;  %v2577_v7 = vmax.f32 %v2102_v33, %v2423_v30  ;;  %v2901_v30 = vrot.slane %v2791_v0, 1 }
 0x1c4   : > { %v1290_v13 = vsel %vm1260_vm5, %v1257_v32, %v6144_v58  ;;  %v1805_v63 = vsel %vm1260_vm5, %v1773_v38, %v6145_v27 }
 0x1c5   : > { %v2631_v6 = vmax.f32 %v2576_v60, %v2577_v7  ;;  %v1707_v56 = vpop.permute.xlu1 %1706  ;;  %v1190_v35 = vpop.permute.xlu0 %1189  ;;  %v1323_v51 = vsel %vm1293_vm6, %v1290_v13, %v6149_v41  ;;  %v1837_v50 = vsel %vm1293_vm6, %v1805_v63, %v6150_v20  ;;  %v6235_v41 = vld [vmem:[%s6515_s26 + $0x1f1] ss:$2 sm:$0xff] }
 0x1c6   : > { %4946 = vmatprep.mubr.msk.f32.mxu0 %vm1908_vm3, %v1190_v35  ;;  %4980 = vmatprep.mubr.msk.f32.mxu1 %vm1908_vm3, %v1707_v56  ;;  %v1356_v16 = vsel %vm1326_vm7, %v1323_v51, %v1190_v35  ;;  %v1869_v12 = vsel %vm1326_vm7, %v1837_v50, %v1707_v56  ;;  %v6236_v56 = vld [vmem:[%s6515_s26 + $0x1f0] ss:$2 sm:$0xff]  ;;  %s6309_s26 = scalar_lea.vmem %s4787_s15, 128 }
 0x1c7   : > { %v2670_v25 = vadd.f32 %v7818_v54, %v2631_v6  ;;  %2219 = vmatmul.mubr.f32.gmra.mxu0 %v1356_v16  ;;  %2540 = vmatmul.mubr.f32.gmra.mxu1 %v1869_v12  ;;  %v2789_v6 = vld [vmem:[#allocation2 + $0x1] ss:$2 sm:$0xff]  ;;  %v8004_v16 = vld [vmem:[#allocation2 + $0x10] ss:$2 sm:$0xff]  ;;  %p6310_p11 = scmp.ne.s32.totalorder %s4787_s15, %s6309_s26 }
 0x1c9   : > { %v2702_v8 = vmax.f32 %v2670_v25, 0.0  ;;  %v6158_v42 = vpop.permute.xlu1 %6157  ;;  %v6153_v29 = vpop.permute.xlu0 %6152  ;;  %p6311_p12 = pnand %p6310_p11, %p6477_p5 }
 0x1ca   : > { %v6155_v43 = vunpack.i.h.bf16 %v6153_v29  ;;  %v6154_v10 = vunpack.i.l.bf16 %v6153_v29  ;;  %v2106_v44 = vpop.f32.mrf.mxu0  ;;  %v6160_v45 = vunpack.i.h.bf16 %v6158_v42  ;;  %v6159_v4 = vunpack.i.l.bf16 %v6158_v42  ;;  %v2793_v42 = vld [vmem:[#allocation2 + $0x21] ss:$2 sm:$0xff] }
 0x1cb   : > { %2734 = vst [vmem:[#allocation2 + $0x48] sm:$0xff] %v2702_v8  ;;  %p6312_p13 = pneg %p6311_p12 }
 0x1cc   : > { %v1774_v9 = vsel %vm1227_vm4, %v6233_v11, %v6155_v43  ;;  %v1258_v34 = vsel %vm1227_vm4, %v6234_v18, %v6154_v10  ;;  %v2427_v19 = vpop.f32.mrf.mxu1  ;;  %v2108_v52 = vpop.f32.mrf.mxu0  ;;  %v8017_v11 = vld [vmem:[#allocation2] ss:$2 sm:$0xff]  ;;  %v2837_v18 = vrot.slane %v8004_v16, 1 }
 0x1cd   : > { %v1192_v24 = vpop.permute.xlu1 %1191  ;;  %v6163_v36 = vpop.permute.xlu0 %6162  ;;  %v2578_v39 = vmax.f32 %v2106_v44, %v2427_v19  ;;  %v1291_v5 = vsel %vm1260_vm5, %v1258_v34, %v6159_v4  ;;  %v1806_v26 = vsel %vm1260_vm5, %v1774_v9, %v6160_v45  ;;  %v2900_v4 = vrot.slane %v2789_v6, 1 }
 0x1ce   : > { %v6165_v37 = vunpack.i.h.bf16 %v6163_v36  ;;  %v6164_v47 = vunpack.i.l.bf16 %v6163_v36  ;;  %v2429_v22 = vpop.f32.mrf.mxu1  ;;  %4947 = vmatprep.mubr.msk.f32.mxu0 %vm1908_vm3, %v1192_v24  ;;  %v2795_v36 = vld [vmem:[#allocation2 + $0x31] ss:$2 sm:$0xff] }
 0x1cf   : > { %v2579_v23 = vmax.f32 %v2108_v52, %v2429_v22  ;;  %v8026_v19 = vsel %vm546_vm0, %v2900_v4, %v2901_v30  ;;  %v2903_v52 = vrot.slane %v2793_v42, 1  ;;  %v6245_v4 = vld [vmem:[%s9565_s3 + $0x58] sm:$0xff] }
 0x1d0   : > { %v1324_v40 = vsel %vm1293_vm6, %v1291_v5, %v6164_v47  ;;  %v1838_v49 = vsel %vm1293_vm6, %v1806_v26, %v6165_v37  ;;  %v2905_v5 = vrot.slane %v2795_v36, 1 }
 0x1d1   : > { %v2632_v21 = vmax.f32 %v2578_v39, %v2579_v23  ;;  %v6168_v59 = vpop.permute.xlu1 %6167  ;;  %v1709_v57 = vpop.permute.xlu0 %1708  ;;  %v1357_v2 = vsel %vm1326_vm7, %v1324_v40, %v1192_v24  ;;  %v2836_v24 = vrot.slane %v8017_v11, 1  ;;  %v2839_v39 = vrot.slane %v7957_v14, 1 }
 0x1d2   : > { %v6170_v17 = vunpack.i.h.bf16 %v6168_v59  ;;  %2225 = vmatmul.mubr.f32.gmra.mxu0 %v1357_v2  ;;  %4981 = vmatprep.mubr.msk.f32.mxu1 %vm1908_vm3, %v1709_v57  ;;  %v1870_v31 = vsel %vm1326_vm7, %v1838_v49, %v1709_v57  ;;  %v7996_v1 = vld [vmem:[#allocation2 + $0x40] ss:$2 sm:$0xff]  ;;  %v6169_v53 = vunpack.i.l.bf16 %v6168_v59  ;;  %v8037_v23 = vsel %vm546_vm0, %v2901_v30, %v2903_v52  ;;  %v2797_v49 = vld [vmem:[#allocation2 + $0x41] ss:$2 sm:$0xff] }
 0x1d3   : > { %v2671_v55 = vadd.f32 %v7818_v54, %v2632_v21  ;;  %2546 = vmatmul.mubr.f32.gmra.mxu1 %v1870_v31  ;;  %v2955_v38 = vrot.slane %v7996_v1, 2  ;;  %v8031_v22 = vsel %vm546_vm0, %v2836_v24, %v2837_v18  ;;  %v6237_v21 = vld [vmem:[%s9565_s3 + $0x78] sm:$0xff]  ;;  %v8044_v57 = vsel %vm546_vm0, %v2837_v18, %v2839_v39 }
 0x1d4   : > { %v2112_v61 = vpop.f32.mrf.mxu0  ;;  %v2433_v48 = vpop.f32.mrf.mxu1  ;;  %v1775_v27 = vsel %vm1227_vm4, %v6235_v41, %v6170_v17  ;;  %v1259_v35 = vsel %vm1227_vm4, %v6236_v56, %v6169_v53  ;;  %v2841_v2 = vrot.slane %v7959_v28, 1  ;;  %v6238_v17 = vld [vmem:[%s9565_s3 + $0xf0] sm:$0xff]  ;;  %v2907_v53 = vrot.slane %v2797_v49, 1 }
 0x1d5   : > { %v2703_v20 = vmax.f32 %v2671_v55, 0.0  ;;  %v6178_v58 = vpop.permute.xlu1 %6177  ;;  %v6173_v33 = vpop.permute.xlu0 %6172  ;;  %v2580_v51 = vmax.f32 %v2112_v61, %v2433_v48  ;;  %v8011_v12 = vsel %vm709_vm1, %v2953_v62, %v2955_v38  ;;  %v8053_v55 = vsel %vm546_vm0, %v2903_v52, %v2905_v5  ;;  %v6239_v48 = vld [vmem:[%s9565_s3 + $0x70] sm:$0xff] }
 0x1d6   : > { %v6180_v3 = vunpack.i.h.bf16 %v6178_v58  ;;  %v6179_v32 = vunpack.i.l.bf16 %v6178_v58  ;;  %v6175_v60 = vunpack.i.h.bf16 %v6173_v33  ;;  %v6174_v7 = vunpack.i.l.bf16 %v6173_v33  ;;  %v2114_v13 = vpop.f32.mrf.mxu0  ;;  %v2435_v63 = vpop.f32.mrf.mxu1  ;;  %9638 = vst [vmem:[#allocation8_spill] sm:$0xff] %v8053_v55  ;;  %v6240_v33 = vld [vmem:[%s9565_s3 + $0xe8] sm:$0xff] }
 0x1d7   : > { %2735 = vst [vmem:[#allocation2 + $0x50] sm:$0xff] %v2703_v20  ;;  %v2581_v50 = vmax.f32 %v2114_v13, %v2435_v63  ;;  %v8060_v20 = vsel %vm546_vm0, %v2839_v39, %v2841_v2  ;;  %v2843_v41 = vrot.slane %v7996_v1, 1  ;;  %v6251_v39 = vld [vmem:[%s9565_s3 + $0x40] sm:$0xff] }
 0x1d8   : > { %v1292_v25 = vsel %vm1260_vm5, %v1259_v35, %v6174_v7  ;;  %v1807_v8 = vsel %vm1260_vm5, %v1775_v27, %v6175_v60 }
 0x1d9   : > { %v2633_v29 = vmax.f32 %v2580_v51, %v2581_v50  ;;  %v1711_v43 = vpop.permute.xlu1 %1710  ;;  %v1194_v10 = vpop.permute.xlu0 %1193  ;;  %v1325_v44 = vsel %vm1293_vm6, %v1292_v25, %v6179_v32  ;;  %v1839_v45 = vsel %vm1293_vm6, %v1807_v8, %v6180_v3  ;;  %v8074_v3 = vsel %vm546_vm0, %v2905_v5, %v2907_v53  ;;  %v6242_v25 = vld [vmem:[%s9565_s3 + $0xe0] sm:$0xff] }
 0x1da   : > { %4948 = vmatprep.mubr.msk.f32.mxu0 %vm1908_vm3, %v1194_v10  ;;  %4982 = vmatprep.mubr.msk.f32.mxu1 %vm1908_vm3, %v1711_v43  ;;  %v1358_v62 = vsel %vm1326_vm7, %v1325_v44, %v1194_v10  ;;  %v1871_v9 = vsel %vm1326_vm7, %v1839_v45, %v1711_v43  ;;  %9639 = vst [vmem:[#allocation9_spill] sm:$0xff] %v8074_v3  ;;  %v6244_v44 = vld [vmem:[%s9565_s3 + $0xd8] sm:$0xff] }
 0x1db   : > { %v2672_v34 = vadd.f32 %v7818_v54, %v2633_v29  ;;  %2231 = vmatmul.mubr.f32.gmra.mxu0 %v1358_v62  ;;  %2552 = vmatmul.mubr.f32.gmra.mxu1 %v1871_v9  ;;  %v8083_v51 = vsel %vm546_vm0, %v2841_v2, %v2843_v41  ;;  %v6246_v9 = vld [vmem:[%s9565_s3 + $0xd0] sm:$0xff] }
 0x1dc   : > { %3188 = vmatprep.mubr.f32.mxu0 %v2789_v6  ;;  %3333 = vmatprep.mubr.f32.mxu1 %v8026_v19  ;;  %v6241_v6 = vld [vmem:[%s9565_s3 + $0x68] sm:$0xff] }
 0x1dd   : > { %v2704_v37 = vmax.f32 %v2672_v34, 0.0  ;;  %v6248_v34 = vld [vmem:[%s9565_s3 + $0xc8] sm:$0xff] }
 0x1de   : > { %v2118_v47 = vpop.f32.mrf.mxu0 }
 0x1df   : > { %2736 = vst [vmem:[#allocation2 + $0x58] sm:$0xff] %v2704_v37  ;;  %3189 = vmatmul.mubr.f32.vlgmr.msra.gmra.mxu0 %v8017_v11  ;;  %3334 = vmatmul.mubr.f32.vlgmr.msra.gmra.mxu1 %v8031_v22  ;;  %v6250_v37 = vld [vmem:[%s9565_s3 + $0xc0] sm:$0xff] }
 0x1e0   : > { %v2439_v26 = vpop.f32.mrf.mxu1  ;;  %v2120_v40 = vpop.f32.mrf.mxu0  ;;  %3193 = vmatprep.mubr.f32.mxu0 %v2791_v0  ;;  %3338 = vmatprep.mubr.f32.mxu1 %v8037_v23 }
 0x1e1   : > { %5196 = vmatpush3.msra.mxu1 %v6237_v21  ;;  %v2582_v31 = vmax.f32 %v2118_v47, %v2439_v26 }
 0x1e2   : > { %v2441_v59 = vpop.f32.mrf.mxu1  ;;  %5197 = vmatprep.subr.mxu1 %v6238_v17 }
 0x1e3   : > { %v2583_v0 = vmax.f32 %v2120_v40, %v2441_v59  ;;  %3194 = vmatmul.mubr.f32.gmra.mxu0 %v8004_v16  ;;  %3339 = vmatmul.mubr.f32.gmra.mxu1 %v8044_v57  ;;  %v6252_v40 = vld [vmem:[%s9565_s3 + $0xb8] sm:$0xff]  ;;  %v6254_v59 = vld [vmem:[%s9565_s3 + $0xb0] sm:$0xff] }
 0x1e4   : > { %3198 = vmatprep.mubr.f32.mxu0 %v2793_v42  ;;  %3343 = vmatprep.mubr.f32.mxu1 %v8053_v55 }
 0x1e5   : > { %v2634_v61 = vmax.f32 %v2582_v31, %v2583_v0  ;;  %5198 = vmatpush3.msra.mxu1 %v6239_v48  ;;  %v6255_v31 = vld [vmem:[%s9565_s3 + $0x30] sm:$0xff]  ;;  %v6256_v48 = vld [vmem:[%s9565_s3 + $0xa8] sm:$0xff] }
 0x1e6   : > { %v8063_v27 = vld [vmem:[#allocation2 + $0x51] ss:$2 sm:$0xff]  ;;  %v8065_v58 = vld [vmem:[#allocation2 + $0x50] ss:$2 sm:$0xff]  ;;  %5199 = vmatprep.subr.mxu1 %v6240_v33 }
 0x1e7   : > { %v2673_v30 = vadd.f32 %v7818_v54, %v2634_v61  ;;  %3199 = vmatmul.mubr.f32.gmra.mxu0 %v7957_v14  ;;  %3344 = vmatmul.mubr.f32.gmra.mxu1 %v8060_v20  ;;  %v2909_v32 = vrot.slane %v8063_v27, 1  ;;  %v2957_v60 = vrot.slane %v8065_v58, 2  ;;  %v2845_v50 = vrot.slane %v8065_v58, 1 }
 0x1e8   : > { %v2124_v7 = vpop.f32.mrf.mxu0  ;;  %v2445_v13 = vpop.f32.mrf.mxu1  ;;  %3203 = vmatprep.mubr.f32.mxu0 %v2795_v36  ;;  %3348 = vmatprep.mubr.f32.mxu1 %v8074_v3  ;;  %v6249_v36 = vld [vmem:[%s9565_s3 + $0x48] sm:$0xff] }
 0x1e9   : > { %v2705_v63 = vmax.f32 %v2673_v30, 0.0  ;;  %5200 = vmatpush3.msra.mxu1 %v6241_v6  ;;  %v8094_v8 = vsel %vm709_vm1, %v2955_v38, %v2957_v60  ;;  %v2584_v42 = vmax.f32 %v2124_v7, %v2445_v13  ;;  %v8101_v43 = vsel %vm546_vm0, %v2907_v53, %v2909_v32  ;;  %v6243_v38 = vld [vmem:[%s9565_s3 + $0x60] sm:$0xff] }
 0x1ea   : > { %v2126_v56 = vpop.f32.mrf.mxu0  ;;  %v2447_v35 = vpop.f32.mrf.mxu1  ;;  %5201 = vmatprep.subr.mxu1 %v6242_v25  ;;  %9640 = vst [vmem:[#allocation10_spill] sm:$0xff] %v8101_v43  ;;  %v8196_v25 = vld [vmem:[%s9565_s3 + $0x278] sm:$0xff] }
 0x1eb   : > { %2737 = vst [vmem:[#allocation2 + $0x60] sm:$0xff] %v2705_v63  ;;  %v2585_v29 = vmax.f32 %v2126_v56, %v2447_v35  ;;  %3204 = vmatmul.mubr.f32.gmra.mxu0 %v7959_v28  ;;  %3349 = vmatmul.mubr.f32.gmra.mxu1 %v8083_v51  ;;  %v8110_v28 = vsel %vm546_vm0, %v2843_v41, %v2845_v50  ;;  %v6258_v63 = vld [vmem:[%s9565_s3 + $0xa0] sm:$0xff] }
 0x1ec   : > { %3208 = vmatprep.mubr.f32.mxu0 %v2797_v49  ;;  %3353 = vmatprep.mubr.f32.mxu1 %v8101_v43  ;;  %v6253_v49 = vld [vmem:[%s9565_s3 + $0x38] sm:$0xff] }
 0x1ed   : > { %v2635_v10 = vmax.f32 %v2584_v42, %v2585_v29  ;;  %5202 = vmatpush3.msra.mxu1 %v6243_v38  ;;  %5485 = vmatprep.subr.mxu0 %v8196_v25  ;;  %v6260_v29 = vld [vmem:[%s9565_s3 + $0x98] sm:$0xff]  ;;  %v8221_v38 = vld [vmem:[%s9564_s2] ss:$0 sm:$0xff] }
 0x1ee   : > { %5203 = vmatprep.subr.mxu1 %v6244_v44  ;;  %5486 = vmatpush3.msra.mxu0 %v8196_v25 }
 0x1ef   : > { %v2674_v45 = vadd.f32 %v7818_v54, %v2635_v10  ;;  %3209 = vmatmul.mubr.f32.gmra.mxu0 %v7996_v1  ;;  %3354 = vmatmul.mubr.f32.gmra.mxu1 %v8110_v28  ;;  %v6247_v1 = vld [vmem:[%s9565_s3 + $0x50] sm:$0xff]  ;;  %v6261_v10 = vld [vmem:[%s9565_s3 + $0x18] sm:$0xff] }
 0x1f0   : > { %3213 = vmatprep.mubr.f32.mxu0 %v8063_v27  ;;  %5204 = vmatpush3.msra.mxu1 %v6245_v4  ;;  %v6264_v4 = vld [vmem:[%s9565_s3 + $0x10] sm:$0xff] }
 0x1f1   : > { %v2706_v62 = vmax.f32 %v2674_v45, 0.0  ;;  %5205 = vmatprep.subr.mxu1 %v6246_v9  ;;  %v6263_v45 = vld [vmem:[%s9565_s3 + $0x90] sm:$0xff]  ;;  %v6265_v9 = vld [vmem:[%s9565_s3 + $0x88] sm:$0xff] }
 0x1f2   : > { %v2130_v18 = vpop.f32.mrf.mxu0  ;;  %5206 = vmatpush3.msra.mxu1 %v6247_v1  ;;  %v6266_v1 = vld [vmem:[%s9565_s3 + $0x8] sm:$0xff] }
 0x1f3   : > { %2738 = vst [vmem:[#allocation2 + $0x68] sm:$0xff] %v2706_v62  ;;  %3214 = vmatmul.mubr.f32.gmra.mxu0 %v8065_v58  ;;  %5207 = vmatprep.subr.mxu1 %v6248_v34  ;;  %v8201_v58 = vld [vmem:[%s9565_s3 + $0x270] sm:$0xff]  ;;  %v6267_v34 = vld [vmem:[%s9565_s3 + $0x80] sm:$0xff] }
 0x1f4   : > { %v2451_v52 = vpop.f32.mrf.mxu1  ;;  %v2132_v24 = vpop.f32.mrf.mxu0  ;;  %5208 = vmatpush3.msra.mxu1 %v6249_v36  ;;  %5487 = vmatprep.subr.mxu0 %v8201_v58  ;;  %v6268_v36 = vld [vmem:[%s9565_s3] sm:$0xff] }
 0x1f5   : > { %5209 = vmatprep.subr.mxu1 %v6250_v37  ;;  %v2586_v5 = vmax.f32 %v2130_v18, %v2451_v52  ;;  %5488 = vmatpush3.msra.mxu0 %v8201_v58 }
 0x1f6   : > { %v2453_v47 = vpop.f32.mrf.mxu1  ;;  %5210 = vmatpush3.msra.mxu1 %v6251_v39  ;;  %v8251_v39 = vld [vmem:[%s9565_s3 + $0x260] sm:$0xff] }
 0x1f7   : > { %v2587_v26 = vmax.f32 %v2132_v24, %v2453_v47  ;;  %5211 = vmatprep.subr.mxu1 %v6252_v40  ;;  %v8246_v47 = vld [vmem:[%s9565_s3 + $0x268] sm:$0xff] }
 0x1f8   : > { %5212 = vmatpush3.msra.mxu1 %v6253_v49  ;;  %5489 = vmatprep.subr.mxu0 %v8246_v47 }
 0x1f9   : > { %v2636_v21 = vmax.f32 %v2586_v5, %v2587_v26  ;;  %5213 = vmatprep.subr.mxu1 %v6254_v59  ;;  %5490 = vmatpush3.msra.mxu0 %v8246_v47 }
 0x1fa   : > { %v8150_v2 = vld [vmem:[#allocation2 + $0x61] ss:$2 sm:$0xff]  ;;  %v8152_v17 = vld [vmem:[#allocation2 + $0x60] ss:$2 sm:$0xff]  ;;  %5214 = vmatpush3.msra.mxu1 %v6255_v31  ;;  %5491 = vmatprep.subr.mxu0 %v8251_v39 }
 0x1fb   : > { %v2675_v0 = vadd.f32 %v7818_v54, %v2636_v21  ;;  %3218 = vmatprep.mubr.f32.mxu0 %v8150_v2  ;;  %v2847_v53 = vrot.slane %v8152_v17, 1  ;;  %v2959_v61 = vrot.slane %v8152_v17, 2  ;;  %5215 = vmatprep.subr.mxu1 %v6256_v48  ;;  %v2911_v30 = vrot.slane %v8150_v2, 1  ;;  %v6257_v54 = vld [vmem:[%s9565_s3 + $0x28] sm:$0xff] }
 0x1fc   : > { %v2136_v41 = vpop.f32.mrf.mxu0  ;;  %v2457_v33 = vpop.f32.mrf.mxu1  ;;  %3219 = vmatmul.mubr.f32.gmra.mxu0 %v8152_v17  ;;  %5216 = vmatpush3.msra.mxu1 %v6257_v54 }
 0x1fd   : > { %v2707_v7 = vmax.f32 %v2675_v0, 0.0  ;;  %v8174_v13 = vsel %vm546_vm0, %v2845_v50, %v2847_v53  ;;  %5217 = vmatprep.subr.mxu1 %v6258_v63  ;;  %v8184_v6 = vsel %vm709_vm1, %v2957_v60, %v2959_v61  ;;  %v8191_v50 = vsel %vm546_vm0, %v2909_v32, %v2911_v30  ;;  %v6259_v60 = vld [vmem:[%s9565_s3 + $0x20] sm:$0xff]  ;;  %5492 = vmatpush3.msra.mxu0 %v8251_v39 }
 0x1fe   : > { %v2138_v56 = vpop.f32.mrf.mxu0  ;;  %v2459_v35 = vpop.f32.mrf.mxu1  ;;  %9641 = vst [vmem:[#allocation11_spill] sm:$0xff] %v8191_v50  ;;  %5218 = vmatpush3.msra.mxu1 %v6259_v60  ;;  %v2588_v27 = vmax.f32 %v2136_v41, %v2457_v33  ;;  %3358 = vmatprep.mubr.f32.mxu1 %v8191_v50  ;;  %v8276_v60 = vld [vmem:[%s9565_s3 + $0x258] sm:$0xff] }
 0x1ff   : > { %2739 = vst [vmem:[#allocation2 + $0x70] sm:$0xff] %v2707_v7  ;;  %v2589_v42 = vmax.f32 %v2138_v56, %v2459_v35  ;;  %3359 = vmatmul.mubr.f32.gmra.mxu1 %v8174_v13  ;;  %5219 = vmatprep.subr.mxu1 %v6260_v29 }
 0x200   : > { %5220 = vmatpush3.msra.mxu1 %v6261_v10  ;;  %5493 = vmatprep.subr.mxu0 %v8276_v60 }
 0x201   : > { %v2637_v32 = vmax.f32 %v2588_v27, %v2589_v42  ;;  %5221 = vmatprep.subr.mxu1 %v6263_v45  ;;  %v8281_v27 = vld [vmem:[%s9565_s3 + $0x250] sm:$0xff]  ;;  %5494 = vmatpush3.msra.mxu0 %v8276_v60 }
 0x202   : > { %5222 = vmatpush3.msra.mxu1 %v6264_v4  ;;  %5495 = vmatprep.subr.mxu0 %v8281_v27 }
 0x203   : > { %v2676_v44 = vadd.f32 %v8221_v38, %v2637_v32  ;;  %5223 = vmatprep.subr.mxu1 %v6265_v9  ;;  %v8294_v32 = vld [vmem:[%s9565_s3 + $0x248] sm:$0xff]  ;;  %5496 = vmatpush3.msra.mxu0 %v8281_v27  ;;  %v8309_v9 = vld [vmem:[%s9565_s3 + $0x238] sm:$0xff] }
 0x204   : > { %5224 = vmatpush3.msra.mxu1 %v6266_v1  ;;  %5497 = vmatprep.subr.mxu0 %v8294_v32 }
 0x205   : > { %v2708_v62 = vmax.f32 %v2676_v44, 0.0  ;;  %5225 = vmatprep.subr.mxu1 %v6267_v34  ;;  %5498 = vmatpush3.msra.mxu0 %v8294_v32 }
 0x206   : > { %v2142_v18 = vpop.f32.mrf.mxu0  ;;  %5226 = vmatpush3.msra.mxu1 %v6268_v36 }
 0x207   : > { %2740 = vst [vmem:[#allocation2 + $0x78] sm:$0xff] %v2708_v62  ;;  %5541 = vmatprep.subr.mxu1 %v8196_v25  ;;  %v8304_v62 = vld [vmem:[%s9565_s3 + $0x240] sm:$0xff] }
 0x208   : > { %v2463_v52 = vpop.f32.mrf.mxu1  ;;  %v2144_v24 = vpop.f32.mrf.mxu0  ;;  %5499 = vmatprep.subr.mxu0 %v8304_v62 }
 0x209   : > { %v2590_v5 = vmax.f32 %v2142_v18, %v2463_v52  ;;  %5500 = vmatpush3.msra.mxu0 %v8304_v62 }
 0x20a   : > { %v2465_v37 = vpop.f32.mrf.mxu1  ;;  %5501 = vmatprep.subr.mxu0 %v8309_v9 }
 0x20b   : > { %v2591_v26 = vmax.f32 %v2144_v24, %v2465_v37  ;;  %5502 = vmatpush3.msra.mxu0 %v8309_v9 }
 0x20d   : > { %v2638_v40 = vmax.f32 %v2590_v5, %v2591_v26 }
 0x20e   : > { %v8256_v49 = vld [vmem:[#allocation2 + $0x71] ss:$2 sm:$0xff]  ;;  %v2771_v21 = vld [vmem:[#allocation2 + $0x70] ss:$2 sm:$0xff] }
 0x20f   : > { %v2677_v59 = vadd.f32 %v8221_v38, %v2638_v40  ;;  %3223 = vmatprep.mubr.f32.mxu0 %v8256_v49  ;;  %v2849_v31 = vrot.slane %v2771_v21, 1  ;;  %v2961_v0 = vrot.slane %v2771_v21, 2  ;;  %v2913_v48 = vrot.slane %v8256_v49, 1 }
 0x210   : > { %v2148_v41 = vpop.f32.mrf.mxu0  ;;  %v2469_v33 = vpop.f32.mrf.mxu1  ;;  %3224 = vmatmul.mubr.f32.gmra.mxu0 %v2771_v21 }
 0x211   : > { %v2709_v54 = vmax.f32 %v2677_v59, 0.0  ;;  %v8265_v7 = vsel %vm546_vm0, %v2911_v30, %v2913_v48  ;;  %v8270_v63 = vsel %vm546_vm0, %v2847_v53, %v2849_v31  ;;  %v8286_v30 = vsel %vm709_vm1, %v2959_v61, %v2961_v0 }
 0x212   : > { %9642 = vst [vmem:[#allocation12_spill] sm:$0xff] %v8265_v7  ;;  %v2150_v56 = vpop.f32.mrf.mxu0  ;;  %v2471_v35 = vpop.f32.mrf.mxu1  ;;  %3363 = vmatprep.mubr.f32.mxu1 %v8265_v7  ;;  %v2592_v53 = vmax.f32 %v2148_v41, %v2469_v33 }
 0x213   : > { %2741 = vst [vmem:[#allocation2 + $0x80] sm:$0xff] %v2709_v54  ;;  %v2593_v42 = vmax.f32 %v2150_v56, %v2471_v35  ;;  %3364 = vmatmul.mubr.f32.gmra.mxu1 %v8270_v63 }
 0x215   : > { %v2639_v29 = vmax.f32 %v2592_v53, %v2593_v42  ;;  %v8341_v53 = vld [vmem:[%s9565_s3 + $0x230] sm:$0xff] }
 0x216   : > { %9644 = vst [vmem:[#allocation14_spill] sm:$0xff] %v8341_v53  ;;  %5503 = vmatprep.subr.mxu0 %v8341_v53 }
 0x217   : > { %v2678_v17 = vadd.f32 %v8221_v38, %v2639_v29  ;;  %5504 = vmatpush3.msra.mxu0 %v8341_v53 }
 0x219   : > { %v2710_v61 = vmax.f32 %v2678_v17, 0.0  ;;  %v8362_v17 = vld [vmem:[%s9565_s3 + $0x218] sm:$0xff] }
 0x21a   : > { %v2154_v10 = vpop.f32.mrf.mxu0  ;;  %9647 = vst [vmem:[#allocation17_spill] sm:$0xff] %v8362_v17 }
 0x21b   : > { %2742 = vst [vmem:[#allocation2 + $0x88] sm:$0xff] %v2710_v61 }
 0x21c   : > { %v2475_v44 = vpop.f32.mrf.mxu1  ;;  %v2156_v45 = vpop.f32.mrf.mxu0 }
 0x21d   : > { %v2594_v18 = vmax.f32 %v2154_v10, %v2475_v44 }
 0x21e   : > { %v2477_v4 = vpop.f32.mrf.mxu1 }
 0x21f   : > { %v2595_v1 = vmax.f32 %v2156_v45, %v2477_v4  ;;  %v8372_v45 = vld [vmem:[%s9565_s3 + $0x210] sm:$0xff] }
 0x220   : > { %9648 = vst [vmem:[#allocation18_spill] sm:$0xff] %v8372_v45 }
 0x221   : > { %v2640_v34 = vmax.f32 %v2594_v18, %v2595_v1  ;;  %v8378_v18 = vld [vmem:[%s9565_s3 + $0x208] sm:$0xff] }
 0x222   : > { %v8314_v52 = vld [vmem:[#allocation2 + $0x81] ss:$2 sm:$0xff]  ;;  %v8316_v24 = vld [vmem:[#allocation2 + $0x80] ss:$2 sm:$0xff]  ;;  %9649 = vst [vmem:[#allocation19_spill] sm:$0xff] %v8378_v18 }
 0x223   : > { %v2679_v36 = vadd.f32 %v8221_v38, %v2640_v34  ;;  %3228 = vmatprep.mubr.f32.mxu0 %v8314_v52  ;;  %v2851_v37 = vrot.slane %v8316_v24, 1  ;;  %v2963_v5 = vrot.slane %v8316_v24, 2  ;;  %v2915_v21 = vrot.slane %v8314_v52, 1 }
 0x224   : > { %v2160_v26 = vpop.f32.mrf.mxu0  ;;  %v2481_v40 = vpop.f32.mrf.mxu1  ;;  %3229 = vmatmul.mubr.f32.gmra.mxu0 %v8316_v24 }
 0x225   : > { %v2711_v59 = vmax.f32 %v2679_v36, 0.0  ;;  %v8328_v41 = vsel %vm546_vm0, %v2849_v31, %v2851_v37  ;;  %v8333_v33 = vsel %vm709_vm1, %v2961_v0, %v2963_v5  ;;  %v8336_v35 = vsel %vm546_vm0, %v2913_v48, %v2915_v21  ;;  %v8346_v31 = vld [vmem:[%s9565_s3 + $0x228] sm:$0xff]  ;;  %v8355_v0 = vld [vmem:[%s9565_s3 + $0x220] sm:$0xff] }
 0x226   : > { %v2162_v54 = vpop.f32.mrf.mxu0  ;;  %v2483_v56 = vpop.f32.mrf.mxu1  ;;  %9643 = vst [vmem:[#allocation13_spill] sm:$0xff] %v8336_v35  ;;  %9645 = vst [vmem:[#allocation15_spill] sm:$0xff] %v8346_v31  ;;  %v2596_v42 = vmax.f32 %v2160_v26, %v2481_v40  ;;  %3368 = vmatprep.mubr.f32.mxu1 %v8336_v35  ;;  %5505 = vmatprep.subr.mxu0 %v8346_v31  ;;  %v8386_v40 = vld [vmem:[%s9565_s3 + $0x200] sm:$0xff] }
 0x227   : > { %2743 = vst [vmem:[#allocation2 + $0x90] sm:$0xff] %v2711_v59  ;;  %v2597_v29 = vmax.f32 %v2162_v54, %v2483_v56  ;;  %3369 = vmatmul.mubr.f32.gmra.mxu1 %v8328_v41  ;;  %9646 = vst [vmem:[#allocation16_spill] sm:$0xff] %v8355_v0  ;;  %5506 = vmatpush3.msra.mxu0 %v8346_v31  ;;  %v6269_v54 = vld [vmem:[%s9565_s3 + $0x1f8] sm:$0xff] }
 0x228   : > { %5507 = vmatprep.subr.mxu0 %v8355_v0  ;;  %9650 = vst [vmem:[#allocation20_spill] sm:$0xff] %v8386_v40 }
 0x229   : > { %v2641_v48 = vmax.f32 %v2596_v42, %v2597_v29  ;;  %5508 = vmatpush3.msra.mxu0 %v8355_v0 }
 0x22a   : > { %5509 = vmatprep.subr.mxu0 %v8362_v17 }
 0x22b   : > { %v2680_v61 = vadd.f32 %v8221_v38, %v2641_v48  ;;  %5510 = vmatpush3.msra.mxu0 %v8362_v17 }
 0x22c   : > { %5511 = vmatprep.subr.mxu0 %v8372_v45 }
 0x22d   : > { %v2712_v10 = vmax.f32 %v2680_v61, 0.0  ;;  %5512 = vmatpush3.msra.mxu0 %v8372_v45 }
 0x22e   : > { %v2166_v44 = vpop.f32.mrf.mxu0  ;;  %5513 = vmatprep.subr.mxu0 %v8378_v18 }
 0x22f   : > { %2744 = vst [vmem:[#allocation2 + $0x98] sm:$0xff] %v2712_v10  ;;  %v2487_v4 = vpop.f32.mrf.mxu1  ;;  %5514 = vmatpush3.msra.mxu0 %v8378_v18 }
 0x230   : > { %v2168_v1 = vpop.f32.mrf.mxu0  ;;  %v2598_v36 = vmax.f32 %v2166_v44, %v2487_v4  ;;  %5515 = vmatprep.subr.mxu0 %v8386_v40 }
 0x231   : > { %v2489_v34 = vpop.f32.mrf.mxu1  ;;  %5516 = vmatpush3.msra.mxu0 %v8386_v40 }
 0x232   : > { %v2599_v26 = vmax.f32 %v2168_v1, %v2489_v34  ;;  %5275 = vmatprep.subr.mxu0 %v6269_v54 }
 0x234   : > { %v2642_v59 = vmax.f32 %v2598_v36, %v2599_v26 }
 0x236   : > { %v2681_v56 = vadd.f32 %v8221_v38, %v2642_v59  ;;  %v8394_v42 = vld [vmem:[#allocation2 + $0x91] ss:$2 sm:$0xff]  ;;  %v2775_v29 = vld [vmem:[#allocation2 + $0x90] ss:$2 sm:$0xff] }
 0x237   : > { %9651 = vst [vmem:[#allocation21_spill] sm:$0xff] %v8394_v42  ;;  %3233 = vmatprep.mubr.f32.mxu0 %v8394_v42  ;;  %v2172_v48 = vpop.f32.mrf.mxu0  ;;  %v2493_v61 = vpop.f32.mrf.mxu1  ;;  %v2853_v10 = vrot.slane %v2775_v29, 1  ;;  %v2965_v44 = vrot.slane %v2775_v29, 2  ;;  %v2917_v4 = vrot.slane %v8394_v42, 1 }
 0x238   : > { %v2713_v1 = vmax.f32 %v2681_v56, 0.0  ;;  %3234 = vmatmul.mubr.f32.gmra.mxu0 %v2775_v29  ;;  %v2600_v46 = vmax.f32 %v2172_v48, %v2493_v61 }
 0x239   : > { %v2174_v34 = vpop.f32.mrf.mxu0  ;;  %v2495_v36 = vpop.f32.mrf.mxu1  ;;  %v8399_v26 = vsel %vm546_vm0, %v2915_v21, %v2917_v4  ;;  %v8404_v59 = vsel %vm546_vm0, %v2851_v37, %v2853_v10  ;;  %v8409_v54 = vsel %vm709_vm1, %v2963_v5, %v2965_v44 }
 0x23a   : > { %9652 = vst [vmem:[#allocation22_spill] sm:$0xff] %v8399_v26  ;;  %2745 = vst [vmem:[#allocation2 + $0xa0] sm:$0xff] %v2713_v1  ;;  %v2601_v35 = vmax.f32 %v2174_v34, %v2495_v36  ;;  %3373 = vmatprep.mubr.f32.mxu1 %v8399_v26 }
 0x23b   : > { %3374 = vmatmul.mubr.f32.gmra.mxu1 %v8404_v59 }
 0x23c   : > { %v2643_v56 = vmax.f32 %v2600_v46, %v2601_v35 }
 0x23e   : > { %v2682_v21 = vadd.f32 %v8221_v38, %v2643_v56 }
 0x240   : > { %v2714_v29 = vmax.f32 %v2682_v21, 0.0 }
 0x242   : > { %2746 = vst [vmem:[#allocation2 + $0xa8] sm:$0xff] %v2714_v29  ;;  %v2178_v7 = vpop.f32.mrf.mxu0 }
 0x243   : > { %v2499_v37 = vpop.f32.mrf.mxu1 }
 0x244   : > { %v2180_v50 = vpop.f32.mrf.mxu0  ;;  %v2602_v24 = vmax.f32 %v2178_v7, %v2499_v37 }
 0x245   : > { %v2501_v40 = vpop.f32.mrf.mxu1 }
 0x246   : > { %v2603_v18 = vmax.f32 %v2180_v50, %v2501_v40 }
 0x248   : > { %v2644_v5 = vmax.f32 %v2602_v24, %v2603_v18 }
 0x249   : > { %v8414_v43 = vld [vmem:[#allocation2 + $0xa1] ss:$2 sm:$0xff]  ;;  %v2777_v48 = vld [vmem:[#allocation2 + $0xa0] ss:$2 sm:$0xff] }
 0x24a   : > { %9653 = vst [vmem:[#allocation23_spill] sm:$0xff] %v8414_v43  ;;  %v2683_v61 = vadd.f32 %v8221_v38, %v2644_v5  ;;  %3238 = vmatprep.mubr.f32.mxu0 %v8414_v43  ;;  %v2855_v1 = vrot.slane %v2777_v48, 1  ;;  %v2967_v46 = vrot.slane %v2777_v48, 2  ;;  %v2919_v36 = vrot.slane %v8414_v43, 1 }
 0x24b   : > { %v2184_v35 = vpop.f32.mrf.mxu0  ;;  %v2505_v34 = vpop.f32.mrf.mxu1  ;;  %3239 = vmatmul.mubr.f32.gmra.mxu0 %v2777_v48 }
 0x24c   : > { %v2715_v56 = vmax.f32 %v2683_v61, 0.0  ;;  %v8420_v21 = vsel %vm546_vm0, %v2853_v10, %v2855_v1  ;;  %v8423_v50 = vsel %vm709_vm1, %v2965_v44, %v2967_v46  ;;  %v8426_v40 = vsel %vm546_vm0, %v2917_v4, %v2919_v36 }
 0x24d   : > { %9654 = vst [vmem:[#allocation24_spill] sm:$0xff] %v8420_v21  ;;  %v2186_v7 = vpop.f32.mrf.mxu0  ;;  %v2507_v18 = vpop.f32.mrf.mxu1  ;;  %9655 = vst [vmem:[#allocation25_spill] sm:$0xff] %v8426_v40  ;;  %v2604_v29 = vmax.f32 %v2184_v35, %v2505_v34  ;;  %3378 = vmatprep.mubr.f32.mxu1 %v8426_v40 }
 0x24e   : > { %2747 = vst [vmem:[#allocation2 + $0xb0] sm:$0xff] %v2715_v56  ;;  %v2605_v37 = vmax.f32 %v2186_v7, %v2507_v18  ;;  %3379 = vmatmul.mubr.f32.gmra.mxu1 %v8420_v21 }
 0x250   : > { %v2645_v24 = vmax.f32 %v2604_v29, %v2605_v37 }
 0x252   : > { %v2684_v5 = vadd.f32 %v8221_v38, %v2645_v24 }
 0x254   : > { %v2716_v10 = vmax.f32 %v2684_v5, 0.0 }
 0x256   : > { %2748 = vst [vmem:[#allocation2 + $0xb8] sm:$0xff] %v2716_v10  ;;  %v2190_v48 = vpop.f32.mrf.mxu0 }
 0x257   : > { %v2511_v44 = vpop.f32.mrf.mxu1 }
 0x258   : > { %v2192_v61 = vpop.f32.mrf.mxu0  ;;  %v2606_v45 = vmax.f32 %v2190_v48, %v2511_v44 }
 0x259   : > { %v2513_v26 = vpop.f32.mrf.mxu1 }
 0x25a   : > { %v2607_v43 = vmax.f32 %v2192_v61, %v2513_v26 }
 0x25c   : > { %v2646_v4 = vmax.f32 %v2606_v45, %v2607_v43 }
 0x25d   : > { %v8431_v17 = vld [vmem:[#allocation2 + $0xb1] ss:$2 sm:$0xff]  ;;  %v2779_v35 = vld [vmem:[#allocation2 + $0xb0] ss:$2 sm:$0xff] }
 0x25e   : > { %9656 = vst [vmem:[#allocation26_spill] sm:$0xff] %v8431_v17  ;;  %v2685_v34 = vadd.f32 %v8221_v38, %v2646_v4  ;;  %3243 = vmatprep.mubr.f32.mxu0 %v8431_v17  ;;  %v2857_v56 = vrot.slane %v2779_v35, 1  ;;  %v2969_v7 = vrot.slane %v2779_v35, 2  ;;  %v2921_v18 = vrot.slane %v8431_v17, 1 }
 0x25f   : > { %v2196_v29 = vpop.f32.mrf.mxu0  ;;  %v2517_v37 = vpop.f32.mrf.mxu1  ;;  %3244 = vmatmul.mubr.f32.gmra.mxu0 %v2779_v35 }
 0x260   : > { %v2717_v24 = vmax.f32 %v2685_v34, 0.0  ;;  %v8437_v5 = vsel %vm546_vm0, %v2919_v36, %v2921_v18  ;;  %v8440_v43 = vsel %vm546_vm0, %v2855_v1, %v2857_v56  ;;  %v8444_v10 = vsel %vm709_vm1, %v2967_v46, %v2969_v7 }
 0x261   : > { %9657 = vst [vmem:[#allocation27_spill] sm:$0xff] %v8437_v5  ;;  %9658 = vst [vmem:[#allocation28_spill] sm:$0xff] %v8440_v43  ;;  %v2198_v45 = vpop.f32.mrf.mxu0  ;;  %v2519_v26 = vpop.f32.mrf.mxu1  ;;  %3383 = vmatprep.mubr.f32.mxu1 %v8437_v5  ;;  %v2608_v48 = vmax.f32 %v2196_v29, %v2517_v37 }
 0x262   : > { %2749 = vst [vmem:[#allocation2 + $0xc0] sm:$0xff] %v2717_v24  ;;  %v2609_v44 = vmax.f32 %v2198_v45, %v2519_v26  ;;  %3384 = vmatmul.mubr.f32.gmra.mxu1 %v8440_v43 }
 0x264   : > { %v2647_v61 = vmax.f32 %v2608_v48, %v2609_v44 }
 0x266   : > { %v2686_v4 = vadd.f32 %v8221_v38, %v2647_v61 }
 0x268   : > { %v2718_v36 = vmax.f32 %v2686_v4, 0.0 }
 0x26a   : > { %2750 = vst [vmem:[#allocation2 + $0xc8] sm:$0xff] %v2718_v36  ;;  %v2202_v35 = vpop.f32.mrf.mxu0 }
 0x26b   : > { %v2523_v1 = vpop.f32.mrf.mxu1 }
 0x26c   : > { %v2204_v34 = vpop.f32.mrf.mxu0  ;;  %v2610_v17 = vmax.f32 %v2202_v35, %v2523_v1 }
 0x26d   : > { %v2525_v40 = vpop.f32.mrf.mxu1 }
 0x26e   : > { %v2611_v3 = vmax.f32 %v2204_v34, %v2525_v40 }
 0x270   : > { %v2648_v5 = vmax.f32 %v2610_v17, %v2611_v3 }
 0x271   : > { %v8448_v0 = vld [vmem:[#allocation2 + $0xc1] ss:$2 sm:$0xff]  ;;  %v2781_v46 = vld [vmem:[#allocation2 + $0xc0] ss:$2 sm:$0xff] }
 0x272   : > { %9659 = vst [vmem:[#allocation29_spill] sm:$0xff] %v8448_v0  ;;  %v2687_v29 = vadd.f32 %v8221_v38, %v2648_v5  ;;  %3248 = vmatprep.mubr.f32.mxu0 %v8448_v0  ;;  %v2859_v37 = vrot.slane %v2781_v46, 1  ;;  %v2971_v24 = vrot.slane %v2781_v46, 2  ;;  %v2923_v48 = vrot.slane %v8448_v0, 1 }
 0x273   : > { %v2208_v45 = vpop.f32.mrf.mxu0  ;;  %v2529_v26 = vpop.f32.mrf.mxu1  ;;  %3249 = vmatmul.mubr.f32.gmra.mxu0 %v2781_v46 }
 0x274   : > { %v2719_v44 = vmax.f32 %v2687_v29, 0.0  ;;  %v8454_v61 = vsel %vm546_vm0, %v2857_v56, %v2859_v37  ;;  %v8457_v3 = vsel %vm709_vm1, %v2969_v7, %v2971_v24  ;;  %v8460_v5 = vsel %vm546_vm0, %v2921_v18, %v2923_v48 }
 0x275   : > { %9660 = vst [vmem:[#allocation30_spill] sm:$0xff] %v8454_v61  ;;  %v2210_v17 = vpop.f32.mrf.mxu0  ;;  %v2531_v40 = vpop.f32.mrf.mxu1  ;;  %9661 = vst [vmem:[#allocation31_spill] sm:$0xff] %v8460_v5  ;;  %v2612_v4 = vmax.f32 %v2208_v45, %v2529_v26  ;;  %3388 = vmatprep.mubr.f32.mxu1 %v8460_v5 }
 0x276   : > { %2751 = vst [vmem:[#allocation2 + $0xd0] sm:$0xff] %v2719_v44  ;;  %v2613_v36 = vmax.f32 %v2210_v17, %v2531_v40  ;;  %3389 = vmatmul.mubr.f32.gmra.mxu1 %v8454_v61 }
 0x278   : > { %v2649_v35 = vmax.f32 %v2612_v4, %v2613_v36 }
 0x27a   : > { %v2688_v1 = vadd.f32 %v8221_v38, %v2649_v35 }
 0x27c   : > { %v2720_v56 = vmax.f32 %v2688_v1, 0.0 }
 0x27e   : > { %2752 = vst [vmem:[#allocation2 + $0xd8] sm:$0xff] %v2720_v56  ;;  %v2214_v34 = vpop.f32.mrf.mxu0 }
 0x27f   : > { %v2535_v7 = vpop.f32.mrf.mxu1 }
 0x280   : > { %v2216_v46 = vpop.f32.mrf.mxu0  ;;  %v2614_v0 = vmax.f32 %v2214_v34, %v2535_v7 }
 0x281   : > { %v2537_v29 = vpop.f32.mrf.mxu1 }
 0x282   : > { %v2615_v43 = vmax.f32 %v2216_v46, %v2537_v29 }
 0x284   : > { %v2650_v18 = vmax.f32 %v2614_v0, %v2615_v43 }
 0x285   : > { %v8465_v42 = vld [vmem:[#allocation2 + $0xd1] ss:$2 sm:$0xff]  ;;  %v8467_v45 = vld [vmem:[#allocation2 + $0xd0] ss:$2 sm:$0xff] }
 0x286   : > { %9662 = vst [vmem:[#allocation32_spill] sm:$0xff] %v8465_v42  ;;  %v2689_v26 = vadd.f32 %v8221_v38, %v2650_v18  ;;  %3253 = vmatprep.mubr.f32.mxu0 %v8465_v42  ;;  %v2861_v44 = vrot.slane %v8467_v45, 1  ;;  %v9618_v17 = vrot.slane %v8467_v45, 2  ;;  %v2925_v40 = vrot.slane %v8465_v42, 1 }
 0x287   : > { %v2220_v4 = vpop.f32.mrf.mxu0  ;;  %v2541_v36 = vpop.f32.mrf.mxu1  ;;  %3254 = vmatmul.mubr.f32.gmra.mxu0 %v8467_v45 }
 0x288   : > { %v2721_v35 = vmax.f32 %v2689_v26, 0.0  ;;  %v8476_v0 = vsel %vm546_vm0, %v2923_v48, %v2925_v40  ;;  %v8479_v43 = vsel %vm546_vm0, %v2859_v37, %v2861_v44  ;;  %v8485_v34 = vsel %vm709_vm1, %v2971_v24, %v9618_v17 }
 0x289   : > { %9663 = vst [vmem:[#allocation33_spill] sm:$0xff] %v8476_v0  ;;  %9664 = vst [vmem:[#allocation34_spill] sm:$0xff] %v8479_v43  ;;  %v2222_v1 = vpop.f32.mrf.mxu0  ;;  %v2543_v56 = vpop.f32.mrf.mxu1  ;;  %3393 = vmatprep.mubr.f32.mxu1 %v8476_v0  ;;  %v2616_v7 = vmax.f32 %v2220_v4, %v2541_v36 }
 0x28a   : > { %2753 = vst [vmem:[#allocation2 + $0xe0] sm:$0xff] %v2721_v35  ;;  %v2617_v46 = vmax.f32 %v2222_v1, %v2543_v56  ;;  %3394 = vmatmul.mubr.f32.gmra.mxu1 %v8479_v43 }
 0x28c   : > { %v2651_v29 = vmax.f32 %v2616_v7, %v2617_v46 }
 0x28e   : > { %v2690_v48 = vadd.f32 %v8221_v38, %v2651_v29 }
 0x290   : > { %v2722_v18 = vmax.f32 %v2690_v48, 0.0 }
 0x292   : > { %2754 = vst [vmem:[#allocation2 + $0xe8] sm:$0xff] %v2722_v18  ;;  %v2226_v37 = vpop.f32.mrf.mxu0 }
 0x293   : > { %v2547_v26 = vpop.f32.mrf.mxu1 }
 0x294   : > { %v2228_v5 = vpop.f32.mrf.mxu0  ;;  %v2618_v0 = vmax.f32 %v2226_v37, %v2547_v26 }
 0x295   : > { %v2549_v42 = vpop.f32.mrf.mxu1 }
 0x296   : > { %v2619_v61 = vmax.f32 %v2228_v5, %v2549_v42 }
 0x298   : > { %v2652_v31 = vmax.f32 %v2618_v0, %v2619_v61 }
 0x299   : > { %v8489_v55 = vld [vmem:[#allocation2 + $0xe1] ss:$2 sm:$0xff]  ;;  %v8491_v24 = vld [vmem:[#allocation2 + $0xe0] ss:$2 sm:$0xff] }
 0x29a   : > { %9665 = vst [vmem:[#allocation35_spill] sm:$0xff] %v8489_v55  ;;  %v2691_v4 = vadd.f32 %v8221_v38, %v2652_v31  ;;  %3258 = vmatprep.mubr.f32.mxu0 %v8489_v55  ;;  %v2863_v36 = vrot.slane %v8491_v24, 1  ;;  %v2927_v56 = vrot.slane %v8489_v55, 1 }
 0x29b   : > { %v2232_v35 = vpop.f32.mrf.mxu0  ;;  %v2553_v1 = vpop.f32.mrf.mxu1  ;;  %3259 = vmatmul.mubr.f32.gmra.mxu0 %v8491_v24 }
 0x29c   : > { %v2723_v7 = vmax.f32 %v2691_v4, 0.0  ;;  %v8499_v42 = vsel %vm546_vm0, %v2861_v44, %v2863_v36  ;;  %v8502_v0 = vsel %vm546_vm0, %v2925_v40, %v2927_v56  ;;  %v2620_v31 = vmax.f32 %v2232_v35, %v2553_v1 }
 0x29d   : > { %9666 = vst [vmem:[#allocation36_spill] sm:$0xff] %v8499_v42  ;;  %v2234_v61 = vpop.f32.mrf.mxu0  ;;  %v2555_v5 = vpop.f32.mrf.mxu1  ;;  %9667 = vst [vmem:[#allocation37_spill] sm:$0xff] %v8502_v0  ;;  %3398 = vmatprep.mubr.f32.mxu1 %v8502_v0 }
 0x29e   : > { %2755 = vst [vmem:[#allocation2 + $0xf0] sm:$0xff] %v2723_v7  ;;  %v2621_v46 = vmax.f32 %v2234_v61, %v2555_v5  ;;  %3399 = vmatmul.mubr.f32.gmra.mxu1 %v8499_v42 }
 0x29f   : > { %v5035_v29 = vpop.f32.mrf.mxu0  ;;  %v5115_v48 = vpop.f32.mrf.mxu1 }
 0x2a0   : > { %v2653_v18 = vmax.f32 %v2620_v31, %v2621_v46 }
 0x2a1   : > { %v5036_v37 = vpop.f32.mrf.mxu0  ;;  %v5116_v26 = vpop.f32.mrf.mxu1 }
 0x2a2   : > { %v2692_v44 = vadd.f32 %v8221_v38, %v2653_v18  ;;  %v5037_v4 = vadd.f32 %v5036_v37, %v5035_v29  ;;  %v5117_v17 = vadd.f32 %v5116_v26, %v5115_v48  ;;  %v2949_v18 = vrot.slane %v8004_v16, 2 }
 0x2a3   : > { %v5038_v55 = vpop.f32.mrf.mxu0  ;;  %v5118_v43 = vpop.f32.mrf.mxu1 }
 0x2a4   : > { %v2724_v40 = vmax.f32 %v2692_v44, 0.0  ;;  %v8507_v21 = vadd.f32 %v5117_v17, %v5037_v4 }
 0x2a5   : > { %v5039_v35 = vpop.f32.mrf.mxu0  ;;  %v5119_v1 = vpop.f32.mrf.mxu1 }
 0x2a6   : > { %2756 = vst [vmem:[#allocation2 + $0xf8] sm:$0xff] %v2724_v40  ;;  %v5040_v7 = vadd.f32 %v5039_v35, %v5038_v55  ;;  %v5120_v61 = vadd.f32 %v5119_v1, %v5118_v43  ;;  %v2948_v43 = vrot.slane %v8017_v11, 2 }
 0x2a7   : > { %v5041_v5 = vpop.f32.mrf.mxu0  ;;  %v5121_v0 = vpop.f32.mrf.mxu1 }
 0x2a8   : > { %v8509_v42 = vadd.f32 %v5120_v61, %v5040_v7 }
 0x2a9   : > { %v5042_v31 = vpop.f32.mrf.mxu0  ;;  %v5122_v46 = vpop.f32.mrf.mxu1 }
 0x2aa   : > { %v5043_v53 = vadd.f32 %v5042_v31, %v5041_v5  ;;  %v5123_v38 = vadd.f32 %v5122_v46, %v5121_v0 }
 0x2ab   : > { %v5044_v29 = vpop.f32.mrf.mxu0  ;;  %v5124_v48 = vpop.f32.mrf.mxu1 }
 0x2ac   : > { %v8512_v37 = vadd.f32 %v5123_v38, %v5043_v53  ;;  %v8525_v53 = vsel %vm709_vm1, %v2948_v43, %v2949_v18  ;;  %v6272_v43 = vld [vmem:[%s9565_s3 + $0x170] sm:$0xff] }
 0x2ad   : > { %v5045_v17 = vpop.f32.mrf.mxu0  ;;  %v5125_v26 = vpop.f32.mrf.mxu1  ;;  %v8514_v44 = vld [vmem:[#allocation2 + $0xf1] ss:$2 sm:$0xff]  ;;  %v8516_v55 = vld [vmem:[#allocation2 + $0xf0] ss:$2 sm:$0xff] }
 0x2ae   : > { %v5046_v4 = vadd.f32 %v5045_v17, %v5044_v29  ;;  %v5126_v40 = vadd.f32 %v5125_v26, %v5124_v48  ;;  %3263 = vmatprep.mubr.f32.mxu0 %v8514_v44  ;;  %v8521_v0 = vrot.slane %v8516_v55, 1  ;;  %v8528_v1 = vrot.slane %v8514_v44, 1  ;;  %v6270_v17 = vld [vmem:[%s9565_s3 + $0x178] sm:$0xff]  ;;  %v6271_v26 = vld [vmem:[%s9565_s3 + $0x1f0] sm:$0xff] }
 0x2af   : > { %v5047_v35 = vpop.f32.mrf.mxu0  ;;  %3264 = vmatmul.mubr.f32.gmra.mxu0 %v8516_v55  ;;  %v5127_v16 = vpop.f32.mrf.mxu1  ;;  %v9668_v29 = vrot.slane %v7957_v14, 2 }
 0x2b0   : > { %5517 = vmatprep.mubr.f32.mxu0 %v8525_v53  ;;  %v8533_v11 = vsel %vm546_vm0, %v2863_v36, %v8521_v0  ;;  %v8535_v7 = vadd.f32 %v5126_v40, %v5046_v4  ;;  %v8539_v31 = vsel %vm546_vm0, %v2927_v56, %v8528_v1  ;;  %v6273_v4 = vld [vmem:[%s9565_s3 + $0x1e8] sm:$0xff] }
 0x2b1   : > { %v5048_v61 = vpop.f32.mrf.mxu0  ;;  %v5128_v5 = vpop.f32.mrf.mxu1  ;;  %3403 = vmatprep.mubr.f32.mxu1 %v8539_v31  ;;  %v8545_v48 = vsel %vm709_vm1, %v2949_v18, %v9668_v29  ;;  %v6274_v40 = vld [vmem:[%s9565_s3 + $0x168] sm:$0xff] }
 0x2b2   : > { %v5049_v46 = vadd.f32 %v5048_v61, %v5047_v35  ;;  %v5129_v38 = vadd.f32 %v5128_v5, %v5127_v16  ;;  %3404 = vmatmul.mubr.f32.gmra.mxu1 %v8533_v11  ;;  %v6275_v35 = vld [vmem:[%s9565_s3 + $0x1e0] sm:$0xff]  ;;  %v6278_v5 = vld [vmem:[%s9565_s3 + $0x1d8] sm:$0xff] }
 0x2b3   : > { %v5050_v36 = vpop.f32.mrf.mxu0  ;;  %5518 = vmatmul.mubr.f32.vlgmr.msra.gmra.mxu0 %v8545_v48  ;;  %4984 = vmatprep.mubr.msk.f32.mxu1 %vm546_vm0, %v8528_v1  ;;  %v8577_v16 = vld [vmem:[#allocation2 + $0x1] ss:$2 sm:$0xff] }
 0x2b4   : > { %5520 = vmatprep.mubr.f32.mxu0 %v7973_v15  ;;  %v8552_v56 = vadd.f32 %v5129_v38, %v5049_v46  ;;  %5276 = vmatpush3.msra.mxu0 %v6270_v17  ;;  %v6279_v38 = vld [vmem:[%s9565_s3 + $0x158] sm:$0xff]  ;;  %v6282_v17 = vld [vmem:[%s9565_s3 + $0x150] sm:$0xff] }
 0x2b5   : > { %v5051_v14 = vpop.f32.mrf.mxu0  ;;  %5277 = vmatprep.subr.mxu0 %v6271_v26  ;;  %v6283_v26 = vld [vmem:[%s9565_s3 + $0x1c8] sm:$0xff] }
 0x2b6   : > { %v5052_v18 = vadd.f32 %v5051_v14, %v5050_v36  ;;  %4985 = vmatmul.mubr.msk.f32.gmra.mxu1 %vm546_vm0, %v8521_v0  ;;  %5278 = vmatpush3.msra.mxu0 %v6272_v43  ;;  %v8599_v36 = vld [vmem:[#allocation2 + $0x11] ss:$2 sm:$0xff] }
 0x2b7   : > { %5521 = vmatmul.mubr.f32.gmra.mxu0 %v8011_v12  ;;  %3623 = vmatprep.mubr.f32.mxu1 %v8031_v22  ;;  %v6277_v22 = vld [vmem:[%s9565_s3 + $0x160] sm:$0xff] }
 0x2b8   : > { %5279 = vmatprep.subr.mxu0 %v6273_v4  ;;  %5523 = vmatprep.mubr.f32.mxu0 %v8094_v8  ;;  %v6284_v4 = vld [vmem:[%s9565_s3 + $0x148] sm:$0xff] }
 0x2b9   : > { %5280 = vmatpush3.msra.mxu0 %v6274_v40 }
 0x2ba   : > { %5281 = vmatprep.subr.mxu0 %v6275_v35  ;;  %3624 = vmatmul.mubr.f32.vlgmr.msra.gmra.mxu1 %v8577_v16  ;;  %v6287_v35 = vld [vmem:[%s9565_s3 + $0x140] sm:$0xff] }
 0x2bb   : > { %5282 = vmatpush3.msra.mxu0 %v6277_v22  ;;  %5542 = vmatpush3.msra.mxu1 %v8196_v25  ;;  %v6288_v22 = vld [vmem:[%s9565_s3 + $0x1b8] sm:$0xff] }
 0x2bc   : > { %v5053_v61 = vpop.f32.mrf.mxu0  ;;  %5524 = vmatmul.mubr.f32.gmra.mxu0 %v8184_v6  ;;  %3628 = vmatprep.mubr.f32.mxu1 %v8044_v57  ;;  %v6280_v57 = vld [vmem:[%s9565_s3 + $0x1d0] sm:$0xff] }
 0x2bd   : > { %5283 = vmatprep.subr.mxu0 %v6278_v5  ;;  %5526 = vmatprep.mubr.f32.mxu0 %v8286_v30  ;;  %v2975_v5 = vrot.slane %v8491_v24, 2  ;;  %v8665_v24 = vld [vmem:[#allocation2 + $0x41] ss:$2 sm:$0xff] }
 0x2be   : > { %v5054_v46 = vpop.f32.mrf.mxu0  ;;  %5284 = vmatpush3.msra.mxu0 %v6279_v38  ;;  %5543 = vmatprep.subr.mxu1 %v8201_v58  ;;  %v6293_v38 = vld [vmem:[%s9565_s3 + $0x1a8] sm:$0xff] }
 0x2bf   : > { %v8593_v29 = vadd.f32 %v5054_v46, %v5053_v61  ;;  %5285 = vmatprep.subr.mxu0 %v6280_v57  ;;  %v5130_v25 = vpop.f32.mrf.mxu1  ;;  %3629 = vmatmul.mubr.f32.gmra.mxu1 %v8599_v36  ;;  %v6292_v61 = vld [vmem:[%s9565_s3 + $0x130] sm:$0xff]  ;;  %v8652_v46 = vrot.slane %v8516_v55, 2  ;;  %v6297_v55 = vld [vmem:[%s9565_s3 + $0x120] sm:$0xff]  ;;  %v9669_v57 = vrot.slane %v8467_v45, 2  ;;  %v6299_v45 = vld [vmem:[%s9565_s3 + $0x118] sm:$0xff] }
 0x2c0   : > { %5286 = vmatpush3.msra.mxu0 %v6282_v17  ;;  %5544 = vmatpush3.msra.mxu1 %v8201_v58  ;;  %v8619_v58 = vld [vmem:[#allocation2 + $0x21] ss:$2 sm:$0xff] }
 0x2c1   : > { %5527 = vmatmul.mubr.f32.gmra.mxu0 %v8333_v33  ;;  %3633 = vmatprep.mubr.f32.mxu1 %v8060_v20  ;;  %v5131_v14 = vpop.f32.mrf.mxu1  ;;  %v6285_v20 = vld [vmem:[%s9565_s3 + $0x1c0] sm:$0xff] }
 0x2c2   : > { %5287 = vmatprep.subr.mxu0 %v6283_v26  ;;  %v5132_v43 = vadd.f32 %v5131_v14, %v5130_v25  ;;  %5529 = vmatprep.mubr.f32.mxu0 %v8409_v54  ;;  %v8675_v25 = vsel %vm709_vm1, %v9669_v57, %v2975_v5  ;;  %v8681_v14 = vsel %vm709_vm1, %v2975_v5, %v8652_v46  ;;  %v6298_v26 = vld [vmem:[%s9565_s3 + $0x198] sm:$0xff]  ;;  %v9679_v5 = vld [vmem:[#allocation23_spill] sm:$0xff] }
 0x2c3   : > { %5288 = vmatpush3.msra.mxu0 %v6284_v4  ;;  %5545 = vmatprep.subr.mxu1 %v8246_v47  ;;  %v6300_v4 = vld [vmem:[%s9565_s3 + $0x190] sm:$0xff] }
 0x2c4   : > { %5289 = vmatprep.subr.mxu0 %v6285_v20  ;;  %3634 = vmatmul.mubr.f32.gmra.mxu1 %v8619_v58  ;;  %v8622_v40 = vadd.f32 %v5132_v43, %v5052_v18  ;;  %v6289_v18 = vld [vmem:[%s9565_s3 + $0x138] sm:$0xff] }
 0x2c5   : > { %5290 = vmatpush3.msra.mxu0 %v6287_v35  ;;  %5546 = vmatpush3.msra.mxu1 %v8246_v47  ;;  %v6290_v47 = vld [vmem:[%s9565_s3 + $0x1b0] sm:$0xff] }
 0x2c6   : > { %5530 = vmatmul.mubr.f32.gmra.mxu0 %v8423_v50  ;;  %3638 = vmatprep.mubr.f32.mxu1 %v8083_v51  ;;  %v8641_v51 = vld [vmem:[#allocation2 + $0x31] ss:$2 sm:$0xff] }
 0x2c7   : > { %5291 = vmatprep.subr.mxu0 %v6288_v22  ;;  %5532 = vmatprep.mubr.f32.mxu0 %v8444_v10  ;;  %v8696_v20 = vld [vmem:[#allocation2 + $0x51] ss:$2 sm:$0xff] }
 0x2c8   : > { %5292 = vmatpush3.msra.mxu0 %v6289_v18  ;;  %5547 = vmatprep.subr.mxu1 %v8251_v39  ;;  %v6302_v35 = vld [vmem:[%s9565_s3 + $0x110] sm:$0xff] }
 0x2c9   : > { %5293 = vmatprep.subr.mxu0 %v6290_v47  ;;  %3639 = vmatmul.mubr.f32.gmra.mxu1 %v8641_v51  ;;  %v6303_v47 = vld [vmem:[%s9565_s3 + $0x188] sm:$0xff] }
 0x2ca   : > { %5294 = vmatpush3.msra.mxu0 %v6292_v61  ;;  %5548 = vmatpush3.msra.mxu1 %v8251_v39  ;;  %v6294_v39 = vld [vmem:[%s9565_s3 + $0x128] sm:$0xff] }
 0x2cb   : > { %5533 = vmatmul.mubr.f32.gmra.mxu0 %v8457_v3  ;;  %3643 = vmatprep.mubr.f32.mxu1 %v8110_v28  ;;  %v6295_v28 = vld [vmem:[%s9565_s3 + $0x1a0] sm:$0xff]  ;;  %v6304_v61 = vld [vmem:[%s9565_s3 + $0x108] sm:$0xff] }
 0x2cc   : > { %5295 = vmatprep.subr.mxu0 %v6293_v38  ;;  %5535 = vmatprep.mubr.f32.mxu0 %v8485_v34  ;;  %v9680_v38 = vld [vmem:[#allocation18_spill] sm:$0xff] }
 0x2cd   : > { %5296 = vmatpush3.msra.mxu0 %v6294_v39  ;;  %5549 = vmatprep.subr.mxu1 %v8276_v60  ;;  %v9681_v39 = vld [vmem:[#allocation30_spill] sm:$0xff] }
 0x2ce   : > { %5297 = vmatprep.subr.mxu0 %v6295_v28  ;;  %3644 = vmatmul.mubr.f32.gmra.mxu1 %v8665_v24 }
 0x2cf   : > { %5298 = vmatpush3.msra.mxu0 %v6297_v55  ;;  %5550 = vmatpush3.msra.mxu1 %v8276_v60  ;;  %v9682_v55 = vld [vmem:[#allocation10_spill] sm:$0xff] }
 0x2d0   : > { %v5056_v17 = vpop.f32.mrf.mxu0  ;;  %5536 = vmatmul.mubr.f32.gmra.mxu0 %v8675_v25  ;;  %3648 = vmatprep.mubr.f32.mxu1 %v8174_v13 }
 0x2d1   : > { %5299 = vmatprep.subr.mxu0 %v6298_v26  ;;  %5538 = vmatprep.mubr.f32.mxu0 %v8681_v14  ;;  %v9685_v26 = vld [vmem:[#allocation20_spill] sm:$0xff] }
 0x2d2   : > { %v5057_v60 = vpop.f32.mrf.mxu0  ;;  %5300 = vmatpush3.msra.mxu0 %v6299_v45  ;;  %5551 = vmatprep.subr.mxu1 %v8281_v27  ;;  %v9686_v45 = vld [vmem:[#allocation34_spill] sm:$0xff] }
 0x2d3   : > { %v8691_v13 = vadd.f32 %v5057_v60, %v5056_v17  ;;  %v5133_v43 = vpop.f32.mrf.mxu1  ;;  %5301 = vmatprep.subr.mxu0 %v6300_v4  ;;  %3649 = vmatmul.mubr.f32.gmra.mxu1 %v8696_v20  ;;  %v9683_v17 = vld [vmem:[#allocation19_spill] sm:$0xff]  ;;  %v9688_v4 = vld [vmem:[#allocation29_spill] sm:$0xff] }
 0x2d4   : > { %5302 = vmatpush3.msra.mxu0 %v6302_v35  ;;  %5552 = vmatpush3.msra.mxu1 %v8281_v27  ;;  %v9690_v35 = vld [vmem:[#allocation12_spill] sm:$0xff] }
 0x2d5   : > { %v5134_v22 = vpop.f32.mrf.mxu1  ;;  %5539 = vmatmul.mubr.msk.f32.gmra.mxu0 %vm709_vm1, %v8652_v46  ;;  %3653 = vmatprep.mubr.f32.mxu1 %v8270_v63  ;;  %v6305_v63 = vld [vmem:[%s9565_s3 + $0x180] sm:$0xff] }
 0x2d6   : > { %v5135_v18 = vadd.f32 %v5134_v22, %v5133_v43  ;;  %5303 = vmatprep.subr.mxu0 %v6303_v47  ;;  %3768 = vmatprep.mubr.f32.mxu0 %v8525_v53  ;;  %v6306_v53 = vld [vmem:[%s9565_s3 + $0x100] sm:$0xff]  ;;  %v9687_v43 = vld [vmem:[#allocation11_spill] sm:$0xff]  ;;  %v9691_v22 = vld [vmem:[#allocation32_spill] sm:$0xff] }
 0x2d7   : > { %5304 = vmatpush3.msra.mxu0 %v6304_v61  ;;  %5553 = vmatprep.subr.mxu1 %v8294_v32  ;;  %v9693_v47 = vld [vmem:[#allocation35_spill] sm:$0xff] }
 0x2d8   : > { %v8715_v27 = vadd.f32 %v5135_v18, %v8593_v29  ;;  %5305 = vmatprep.subr.mxu0 %v6305_v63  ;;  %3654 = vmatmul.mubr.f32.gmra.mxu1 %v8150_v2  ;;  %v9671_v2 = vld [vmem:[#allocation24_spill] sm:$0xff]  ;;  %v9678_v29 = vld [vmem:[#allocation17_spill] sm:$0xff]  ;;  %v9694_v63 = vld [vmem:[#allocation22_spill] sm:$0xff] }
 0x2d9   : > { %5306 = vmatpush3.msra.mxu0 %v6306_v53  ;;  %5554 = vmatpush3.msra.mxu1 %v8294_v32  ;;  %v9673_v32 = vld [vmem:[#allocation15_spill] sm:$0xff] }
 0x2da   : > { %3658 = vmatprep.mubr.f32.mxu1 %v8328_v41  ;;  %3769 = vmatmul.mubr.f32.vlgmr.msra.gmra.mxu0 %v8026_v19  ;;  %v9670_v19 = vld [vmem:[#allocation14_spill] sm:$0xff] }
 0x2db   : > { %3773 = vmatprep.mubr.f32.mxu0 %v8545_v48  ;;  %5555 = vmatprep.subr.mxu1 %v8304_v62 }
 0x2dc   : > { %3659 = vmatmul.mubr.f32.gmra.mxu1 %v8256_v49  ;;  %v9672_v49 = vld [vmem:[#allocation8_spill] sm:$0xff] }
 0x2dd   : > { %5556 = vmatpush3.msra.mxu1 %v8304_v62  ;;  %3663 = vmatprep.mubr.f32.mxu1 %v8404_v59  ;;  %v9675_v62 = vld [vmem:[#allocation16_spill] sm:$0xff]  ;;  %v9677_v59 = vld [vmem:[#allocation9_spill] sm:$0xff] }
 0x2de   : > { %3774 = vmatmul.mubr.f32.gmra.mxu0 %v8037_v23  ;;  %5557 = vmatprep.subr.mxu1 %v8309_v9 }
 0x2df   : > { %3778 = vmatprep.mubr.f32.mxu0 %v7973_v15  ;;  %5558 = vmatpush3.msra.mxu1 %v8309_v9  ;;  %v9674_v15 = vld [vmem:[#allocation21_spill] sm:$0xff]  ;;  %v9676_v9 = vld [vmem:[#allocation28_spill] sm:$0xff] }
 0x2e0   : > { %3664 = vmatmul.mubr.f32.gmra.mxu1 %v8314_v52  ;;  %5559 = vmatprep.subr.mxu1 %v9670_v19 }
 0x2e1   : > { %3668 = vmatprep.mubr.f32.mxu1 %v9671_v2  ;;  %5560 = vmatpush3.msra.mxu1 %v9670_v19 }
 0x2e2   : > { %3779 = vmatmul.mubr.f32.gmra.mxu0 %v9672_v49  ;;  %5561 = vmatprep.subr.mxu1 %v9673_v32  ;;  %v9695_v49 = vld [vmem:[#allocation25_spill] sm:$0xff] }
 0x2e3   : > { %3783 = vmatprep.mubr.f32.mxu0 %v8011_v12  ;;  %5562 = vmatpush3.msra.mxu1 %v9673_v32  ;;  %v3003_v32 = vrot.slane %v8665_v24, 2  ;;  %v6308_v24 = vld [vmem:[#allocation2 + $0x71] ss:$2 sm:$0xff] }
 0x2e4   : > { %v5059_v23 = vpop.f32.mrf.mxu0  ;;  %3669 = vmatmul.mubr.f32.gmra.mxu1 %v9674_v15  ;;  %5563 = vmatprep.subr.mxu1 %v9675_v62 }
 0x2e5   : > { %3673 = vmatprep.mubr.f32.mxu1 %v9676_v9  ;;  %5564 = vmatpush3.msra.mxu1 %v9675_v62  ;;  %v6307_v62 = vld [vmem:[#allocation2 + $0x61] ss:$2 sm:$0xff] }
 0x2e6   : > { %v5060_v41 = vpop.f32.mrf.mxu0  ;;  %3784 = vmatmul.mubr.f32.gmra.mxu0 %v9677_v59  ;;  %5565 = vmatprep.subr.mxu1 %v9678_v29  ;;  %v3007_v9 = vrot.slane %v6307_v62, 2  ;;  %v3009_v59 = vrot.slane %v6308_v24, 2 }
 0x2e7   : > { %v5061_v48 = vadd.f32 %v5060_v41, %v5059_v23  ;;  %3788 = vmatprep.mubr.f32.mxu0 %v8094_v8  ;;  %v5136_v12 = vpop.f32.mrf.mxu1  ;;  %5566 = vmatpush3.msra.mxu1 %v9678_v29  ;;  %v9684_v8 = vld [vmem:[#allocation26_spill] sm:$0xff]  ;;  %v3005_v23 = vrot.slane %v8696_v20, 2  ;;  %v3011_v29 = vrot.slane %v8314_v52, 2 }
 0x2e8   : > { %3674 = vmatmul.mubr.f32.gmra.mxu1 %v9679_v5  ;;  %5567 = vmatprep.subr.mxu1 %v9680_v38 }
 0x2e9   : > { %3678 = vmatprep.mubr.f32.mxu1 %v9681_v39  ;;  %v5137_v28 = vpop.f32.mrf.mxu1  ;;  %5568 = vmatpush3.msra.mxu1 %v9680_v38  ;;  %v3006_v41 = vsel %vm709_vm1, %v3003_v32, %v3005_v23  ;;  %v3008_v20 = vsel %vm709_vm1, %v3005_v23, %v3007_v9  ;;  %v9698_v38 = vld [vmem:[#allocation33_spill] sm:$0xff] }
 0x2ea   : > { %3789 = vmatmul.mubr.f32.gmra.mxu0 %v9682_v55  ;;  %v5138_v57 = vadd.f32 %v5137_v28, %v5136_v12  ;;  %5569 = vmatprep.subr.mxu1 %v9683_v17  ;;  %v3010_v12 = vsel %vm709_vm1, %v3007_v9, %v3009_v59  ;;  %v3015_v28 = vrot.slane %v9679_v5, 2  ;;  %v3012_v55 = vsel %vm709_vm1, %v3009_v59, %v3011_v29 }
 0x2eb   : > { %3793 = vmatprep.mubr.f32.mxu0 %v8184_v6  ;;  %5570 = vmatpush3.msra.mxu1 %v9683_v17  ;;  %v9689_v6 = vld [vmem:[#allocation36_spill] sm:$0xff] }
 0x2ec   : > { %3679 = vmatmul.mubr.f32.gmra.mxu1 %v9684_v8  ;;  %5571 = vmatprep.subr.mxu1 %v9685_v26  ;;  %v8763_v60 = vadd.f32 %v5138_v57, %v8691_v13  ;;  %v9692_v13 = vld [vmem:[#allocation13_spill] sm:$0xff] }
 0x2ed   : > { %3683 = vmatprep.mubr.f32.mxu1 %v9686_v45  ;;  %5572 = vmatpush3.msra.mxu1 %v9685_v26  ;;  %v9699_v26 = vld [vmem:[#allocation37_spill] sm:$0xff]  ;;  %v3019_v45 = vrot.slane %v9688_v4, 2 }
 0x2ee   : > { %3794 = vmatmul.mubr.f32.gmra.mxu0 %v9687_v43  ;;  %v3021_v43 = vrot.slane %v9691_v22, 2 }
 0x2ef   : > { %3798 = vmatprep.mubr.f32.mxu0 %v8286_v30  ;;  %v2997_v30 = vrot.slane %v8599_v36, 2  ;;  %v3001_v36 = vrot.slane %v8641_v51, 2  ;;  %v9696_v51 = vld [vmem:[#allocation27_spill] sm:$0xff] }
 0x2f0   : > { %3684 = vmatmul.mubr.f32.gmra.mxu1 %v9688_v4 }
 0x2f1   : > { %3688 = vmatprep.mubr.f32.mxu1 %v9689_v6 }
 0x2f2   : > { %3799 = vmatmul.mubr.f32.gmra.mxu0 %v9690_v35  ;;  %v3023_v35 = vrot.slane %v9693_v47, 2 }
 0x2f3   : > { %3803 = vmatprep.mubr.f32.mxu0 %v8333_v33  ;;  %v2996_v33 = vrot.slane %v8577_v16, 2 }
 0x2f4   : > { %3689 = vmatmul.mubr.f32.gmra.mxu1 %v9691_v22  ;;  %v3025_v22 = vrot.slane %v8514_v44, 2 }
 0x2f5   : > { %3693 = vmatprep.mubr.f32.mxu1 %v8533_v11  ;;  %v2998_v19 = vsel %vm709_vm1, %v2996_v33, %v2997_v30 }
 0x2f6   : > { %3804 = vmatmul.mubr.f32.gmra.mxu0 %v9692_v13  ;;  %v3022_v13 = vsel %vm709_vm1, %v3019_v45, %v3021_v43 }
 0x2f7   : > { %3808 = vmatprep.mubr.f32.mxu0 %v8409_v54  ;;  %v2999_v54 = vrot.slane %v8619_v58, 2 }
 0x2f8   : > { %v5062_v18 = vpop.f32.mrf.mxu0  ;;  %3694 = vmatmul.mubr.f32.gmra.mxu1 %v9693_v47 }
 0x2f9   : > { %4987 = vmatprep.mubr.msk.f32.mxu1 %vm546_vm0, %v8521_v0  ;;  %v3000_v16 = vsel %vm709_vm1, %v2997_v30, %v2999_v54  ;;  %v3002_v58 = vsel %vm709_vm1, %v2999_v54, %v3001_v36 }
 0x2fa   : > { %v5063_v61 = vpop.f32.mrf.mxu0  ;;  %3809 = vmatmul.mubr.f32.gmra.mxu0 %v9694_v63 }
 0x2fb   : > { %v8783_v53 = vadd.f32 %v5063_v61, %v5062_v18  ;;  %v5139_v11 = vpop.f32.mrf.mxu1  ;;  %3813 = vmatprep.mubr.f32.mxu0 %v8423_v50  ;;  %v3026_v18 = vsel %vm709_vm1, %v3023_v35, %v3025_v22 }
 0x2fc   : > { %3699 = vmatmul.mubr.f32.gmra.mxu1 %v8514_v44 }
 0x2fd   : > { %v5140_v2 = vpop.f32.mrf.mxu1  ;;  %5573 = vmatprep.mubr.f32.mxu1 %v2998_v19 }
 0x2fe   : > { %v5141_v0 = vadd.f32 %v5140_v2, %v5139_v11  ;;  %3814 = vmatmul.mubr.f32.gmra.mxu0 %v9695_v49 }
 0x2ff   : > { %3818 = vmatprep.mubr.f32.mxu0 %v8444_v10  ;;  %v3004_v10 = vsel %vm709_vm1, %v3001_v36, %v3003_v32 }
 0x300   : > { %v8794_v50 = vadd.f32 %v5141_v0, %v5061_v48  ;;  %5574 = vmatmul.mubr.f32.vlgmr.msra.gmra.mxu1 %v3000_v16  ;;  %v9697_v48 = vld [vmem:[#allocation31_spill] sm:$0xff] }
 0x301   : > { %5576 = vmatprep.mubr.f32.mxu1 %v3002_v58 }
 0x302   : > { %3819 = vmatmul.mubr.f32.gmra.mxu0 %v9696_v51 }
 0x303   : > { %3823 = vmatprep.mubr.f32.mxu0 %v8457_v3  ;;  %v3013_v3 = vrot.slane %v9674_v15, 2 }
 0x304   : > { %5577 = vmatmul.mubr.f32.gmra.mxu1 %v3004_v10 }
 0x305   : > { %5579 = vmatprep.mubr.f32.mxu1 %v3006_v41  ;;  %v3014_v52 = vsel %vm709_vm1, %v3011_v29, %v3013_v3  ;;  %v3016_v5 = vsel %vm709_vm1, %v3013_v3, %v3015_v28 }
 0x306   : > { %3824 = vmatmul.mubr.f32.gmra.mxu0 %v9697_v48 }
 0x307   : > { %3828 = vmatprep.mubr.f32.mxu0 %v8485_v34  ;;  %v3017_v34 = vrot.slane %v9684_v8, 2 }
 0x308   : > { %5580 = vmatmul.mubr.f32.gmra.mxu1 %v3008_v20 }
 0x309   : > { %5582 = vmatprep.mubr.f32.mxu1 %v3010_v12  ;;  %v3020_v4 = vsel %vm709_vm1, %v3017_v34, %v3019_v45 }
 0x30a   : > { %3829 = vmatmul.mubr.f32.gmra.mxu0 %v9698_v38 }
 0x30b   : > { %v5065_v39 = vpop.f32.mrf.mxu0  ;;  %3833 = vmatprep.mubr.f32.mxu0 %v8675_v25  ;;  %v3018_v25 = vsel %vm709_vm1, %v3015_v28, %v3017_v34 }
 0x30c   : > { %5583 = vmatmul.mubr.f32.gmra.mxu1 %v3012_v55 }
 0x30d   : > { %v5066_v57 = vpop.f32.mrf.mxu0  ;;  %5585 = vmatprep.mubr.f32.mxu1 %v3014_v52 }
 0x30e   : > { %v5067_v17 = vadd.f32 %v5066_v57, %v5065_v39  ;;  %3834 = vmatmul.mubr.f32.gmra.mxu0 %v9699_v26  ;;  %v5142_v15 = vpop.f32.mrf.mxu1 }
 0x30f   : > { %3838 = vmatprep.mubr.f32.mxu0 %v8681_v14 }
 0x310   : > { %5586 = vmatmul.mubr.f32.gmra.mxu1 %v3016_v5  ;;  %v5143_v6 = vpop.f32.mrf.mxu1 }
 0x311   : > { %5588 = vmatprep.mubr.f32.mxu1 %v3018_v25  ;;  %v5144_v8 = vadd.f32 %v5143_v6, %v5142_v15 }
 0x312   : > { %3839 = vmatmul.mubr.f32.gmra.mxu0 %v8539_v31  ;;  %v3024_v31 = vsel %vm709_vm1, %v3021_v43, %v3023_v35 }
 0x313   : > { %4988 = vmatprep.mubr.msk.f32.mxu0 %vm709_vm1, %v8652_v46  ;;  %v8826_v14 = vadd.f32 %v5144_v8, %v8783_v53 }
 0x314   : > { %5589 = vmatmul.mubr.f32.gmra.mxu1 %v3020_v4 }
 0x315   : > { %5591 = vmatprep.mubr.f32.mxu1 %v3022_v13 }
 0x316   : > { %4989 = vmatmul.mubr.msk.f32.gmra.mxu0 %vm546_vm0, %v8528_v1 }
 0x318   : > { %5592 = vmatmul.mubr.f32.gmra.mxu1 %v3024_v31 }
 0x319   : > { %5594 = vmatprep.mubr.f32.mxu1 %v3026_v18 }
 0x31c   : > { %5595 = vmatmul.mubr.msk.f32.gmra.mxu1 %vm709_vm1, %v3025_v22 }
 0x31f   : > { %v5068_v46 = vpop.f32.mrf.mxu0 }
 0x321   : > { %v5069_v47 = vpop.f32.mrf.mxu0 }
 0x322   : > { %v5070_v30 = vadd.f32 %v5069_v47, %v5068_v46  ;;  %v5145_v61 = vpop.f32.mrf.mxu1 }
 0x324   : > { %v5146_v63 = vpop.f32.mrf.mxu1 }
 0x325   : > { %v5147_v33 = vadd.f32 %v5146_v63, %v5145_v61 }
 0x327   : > { %v8835_v53 = vadd.f32 %v5147_v33, %v5067_v17 }
 0x333   : > { %v5071_v44 = vpop.f32.mrf.mxu0 }
 0x335   : > { %v5072_v11 = vpop.f32.mrf.mxu0 }
 0x336   : > { %v5073_v54 = vadd.f32 %v5072_v11, %v5071_v44  ;;  %v5148_v1 = vpop.f32.mrf.mxu1 }
 0x338   : > { %v5149_v19 = vpop.f32.mrf.mxu1 }
 0x339   : > { %v5150_v36 = vadd.f32 %v5149_v19, %v5148_v1 }
 0x33b   : > { %v3391_v2 = vadd.f32 %v5150_v36, %v5070_v30 }
 0x347   : > { %v5074_v0 = vpop.f32.mrf.mxu0 }
 0x349   : > { %v5075_v49 = vpop.f32.mrf.mxu0 }
 0x34a   : > { %v5076_v16 = vadd.f32 %v5075_v49, %v5074_v0  ;;  %v5151_v32 = vpop.f32.mrf.mxu1 }
 0x34c   : > { %v5152_v58 = vpop.f32.mrf.mxu1 }
 0x34d   : > { %v5153_v23 = vadd.f32 %v5152_v58, %v5151_v32 }
 0x34f   : > { %v3396_v51 = vadd.f32 %v5153_v23, %v5073_v54 }
 0x35b   : > { %v5077_v62 = vpop.f32.mrf.mxu0 }
 0x35d   : > { %v5078_v9 = vpop.f32.mrf.mxu0 }
 0x35e   : > { %v5079_v10 = vadd.f32 %v5078_v9, %v5077_v62  ;;  %v5154_v41 = vpop.f32.mrf.mxu1 }
 0x360   : > { %v5155_v24 = vpop.f32.mrf.mxu1 }
 0x361   : > { %v5156_v59 = vadd.f32 %v5155_v24, %v5154_v41 }
 0x363   : > { %v3401_v48 = vadd.f32 %v5156_v59, %v5076_v16 }
 0x36f   : > { %v5080_v29 = vpop.f32.mrf.mxu0 }
 0x371   : > { %v5081_v20 = vpop.f32.mrf.mxu0 }
 0x372   : > { %v5082_v12 = vadd.f32 %v5081_v20, %v5080_v29  ;;  %v5157_v3 = vpop.f32.mrf.mxu1 }
 0x373   : > { %v5519_v38 = vpop.f32.mrf.mxu0 }
 0x374   : > { %v8838_v39 = vadd.f32 %v5519_v38, %v8509_v42  ;;  %v5158_v28 = vpop.f32.mrf.mxu1 }
 0x375   : > { %v3480_v55 = vpop.f32.mrf.mxu0  ;;  %v5159_v52 = vadd.f32 %v5158_v28, %v5157_v3 }
 0x376   : > { %v8841_v34 = vadd.f32 %v3480_v55, %v8507_v21  ;;  %v5160_v57 = vpop.f32.mrf.mxu1 }
 0x377   : > { %v5522_v17 = vpop.f32.mrf.mxu0  ;;  %v3406_v26 = vadd.f32 %v5159_v52, %v5079_v10 }
 0x378   : > { %v8844_v15 = vadd.f32 %v5522_v17, %v8535_v7  ;;  %v5161_v45 = vpop.f32.mrf.mxu1 }
 0x379   : > { %v5162_v5 = vadd.f32 %v5161_v45, %v5160_v57  ;;  %v3490_v25 = vpop.f32.mrf.mxu0 }
 0x37a   : > { %v8847_v43 = vadd.f32 %v3490_v25, %v8512_v37  ;;  %v8849_v42 = vpop.f32.mrf.mxu1 }
 0x37b   : > { %v3411_v6 = vadd.f32 %v5162_v5, %v5082_v12 }
 0x37c   : > { %v5525_v8 = vpop.f32.mrf.mxu0  ;;  %v8851_v35 = vpop.f32.mrf.mxu1 }
 0x37d   : > { %v8854_v21 = vadd.f32 %v5525_v8, %v8622_v40 }
 0x37e   : > { %v3500_v4 = vpop.f32.mrf.mxu0 }
 0x37f   : > { %v8857_v13 = vadd.f32 %v3500_v4, %v8552_v56  ;;  %v5230_v7 = vpop.f32.mrf.mxu1 }
 0x381   : > { %v5528_v22 = vpop.f32.mrf.mxu0  ;;  %v5231_v31 = vpop.f32.mrf.mxu1 }
 0x382   : > { %v8860_v18 = vadd.f32 %v5528_v22, %v8763_v60  ;;  %v8862_v37 = vadd.f32 %v5231_v31, %v5230_v7 }
 0x383   : > { %v3510_v46 = vpop.f32.mrf.mxu0 }
 0x384   : > { %v8865_v47 = vadd.f32 %v3510_v46, %v8715_v27  ;;  %v8867_v30 = vpop.f32.mrf.mxu1 }
 0x386   : > { %v5531_v40 = vpop.f32.mrf.mxu0  ;;  %v8869_v61 = vpop.f32.mrf.mxu1 }
 0x387   : > { %v8872_v56 = vadd.f32 %v5531_v40, %v8826_v14 }
 0x388   : > { %v3520_v63 = vpop.f32.mrf.mxu0 }
 0x389   : > { %9700 = vst [vmem:[#allocation14_spill] sm:$0xff] %v8872_v56  ;;  %v8875_v33 = vadd.f32 %v3520_v63, %v8794_v50  ;;  %v5236_v60 = vpop.f32.mrf.mxu1 }
 0x38b   : > { %v5534_v44 = vpop.f32.mrf.mxu0  ;;  %v5237_v11 = vpop.f32.mrf.mxu1 }
 0x38c   : > { %v8877_v54 = vadd.f32 %v5534_v44, %v3391_v2  ;;  %v8879_v1 = vadd.f32 %v5237_v11, %v5236_v60 }
 0x38d   : > { %v3530_v27 = vpop.f32.mrf.mxu0 }
 0x38e   : > { %9701 = vst [vmem:[#allocation24_spill] sm:$0xff] %v8877_v54  ;;  %v8882_v19 = vadd.f32 %v3530_v27, %v8835_v53  ;;  %v8884_v36 = vpop.f32.mrf.mxu1 }
 0x390   : > { %v5537_v0 = vpop.f32.mrf.mxu0  ;;  %v8886_v14 = vpop.f32.mrf.mxu1 }
 0x391   : > { %v8888_v49 = vadd.f32 %v5537_v0, %v3401_v48 }
 0x392   : > { %v3540_v50 = vpop.f32.mrf.mxu0 }
 0x393   : > { %9702 = vst [vmem:[#allocation8_spill] sm:$0xff] %v8888_v49  ;;  %v8890_v16 = vadd.f32 %v3540_v50, %v3396_v51  ;;  %v5242_v32 = vpop.f32.mrf.mxu1  ;;  %v5229_v49 = vadd.f32 %v8851_v35, %v8849_v42 }
 0x395   : > { %v5540_v58 = vpop.f32.mrf.mxu0  ;;  %v5243_v2 = vpop.f32.mrf.mxu1 }
 0x396   : > { %v8892_v23 = vadd.f32 %v5540_v58, %v3411_v6  ;;  %v8894_v62 = vadd.f32 %v5243_v2, %v5242_v32 }
 0x397   : > { %v3550_v9 = vpop.f32.mrf.mxu0 }
 0x398   : > { %9703 = vst [vmem:[#allocation15_spill] sm:$0xff] %v8892_v23  ;;  %v8896_v53 = vadd.f32 %v3550_v9, %v3406_v26  ;;  %v8898_v10 = vpop.f32.mrf.mxu1 }
 0x39a   : > { %9704 = vst [vmem:[#allocation21_spill] sm:$0xff] %v8896_v53  ;;  %v5307_v41 = vpop.f32.mrf.mxu0  ;;  %v8900_v24 = vpop.f32.mrf.mxu1 }
 0x39c   : > { %v5308_v59 = vpop.f32.mrf.mxu0  ;;  %v5248_v48 = vpop.f32.mrf.mxu1 }
 0x39e   : > { %v5310_v29 = vpop.f32.mrf.mxu0  ;;  %v5249_v51 = vpop.f32.mrf.mxu1 }
 0x39f   : > { %v8902_v20 = vadd.f32 %v5249_v51, %v5248_v48  ;;  %v5309_v48 = vadd.f32 %v5308_v59, %v5307_v41 }
 0x3a0   : > { %v5311_v12 = vpop.f32.mrf.mxu0  ;;  %v8904_v3 = vpop.f32.mrf.mxu1 }
 0x3a1   : > { %v5312_v58 = vadd.f32 %v5311_v12, %v5310_v29  ;;  %v3771_v29 = vadd.f32 %v5309_v48, %v5229_v49  ;;  %v5235_v12 = vadd.f32 %v8869_v61, %v8867_v30  ;;  %v5241_v30 = vadd.f32 %v8886_v14, %v8884_v36 }
 0x3a2   : > { %v5313_v38 = vpop.f32.mrf.mxu0  ;;  %v8906_v28 = vpop.f32.mrf.mxu1 }
 0x3a3   : > { %v3776_v56 = vadd.f32 %v5312_v58, %v8862_v37 }
 0x3a4   : > { %v5314_v55 = vpop.f32.mrf.mxu0  ;;  %v8908_v52 = vpop.f32.mrf.mxu1 }
 0x3a6   : > { %v5316_v57 = vpop.f32.mrf.mxu0  ;;  %v8910_v17 = vpop.f32.mrf.mxu1 }
 0x3a8   : > { %v5317_v26 = vpop.f32.mrf.mxu0  ;;  %v8912_v45 = vpop.f32.mrf.mxu1 }
 0x3a9   : > { %v5318_v54 = vadd.f32 %v5317_v26, %v5316_v57 }
 0x3aa   : > { %v5319_v5 = vpop.f32.mrf.mxu0  ;;  %v8914_v25 = vpop.f32.mrf.mxu1 }
 0x3ab   : > { %v3786_v42 = vadd.f32 %v5318_v54, %v8879_v1 }
 0x3ac   : > { %v5320_v6 = vpop.f32.mrf.mxu0  ;;  %v8916_v8 = vpop.f32.mrf.mxu1 }
 0x3ad   : > { %9705 = vst [vmem:[#allocation16_spill] sm:$0xff] %v8916_v8  ;;  %v5321_v57 = vadd.f32 %v5320_v6, %v5319_v5 }
 0x3ae   : > { %v5322_v4 = vpop.f32.mrf.mxu0  ;;  %v8918_v7 = vpop.f32.mrf.mxu1 }
 0x3af   : > { %9706 = vst [vmem:[#allocation28_spill] sm:$0xff] %v8918_v7  ;;  %v5315_v7 = vadd.f32 %v5314_v55, %v5313_v38  ;;  %v3791_v5 = vadd.f32 %v5321_v57, %v5241_v30 }
 0x3b0   : > { %v5323_v22 = vpop.f32.mrf.mxu0  ;;  %v8920_v31 = vpop.f32.mrf.mxu1 }
 0x3b1   : > { %v3781_v49 = vadd.f32 %v5315_v7, %v5235_v12 }
 0x3b2   : > { %v5325_v46 = vpop.f32.mrf.mxu0  ;;  %v8922_v40 = vpop.f32.mrf.mxu1 }
 0x3b4   : > { %v5326_v63 = vpop.f32.mrf.mxu0  ;;  %v8924_v60 = vpop.f32.mrf.mxu1 }
 0x3b5   : > { %9707 = vst [vmem:[#allocation9_spill] sm:$0xff] %v8924_v60 }
 0x3b6   : > { %v5328_v44 = vpop.f32.mrf.mxu0  ;;  %v8926_v11 = vpop.f32.mrf.mxu1 }
 0x3b7   : > { %9708 = vst [vmem:[#allocation17_spill] sm:$0xff] %v8926_v11 }
 0x3b8   : > { %v5329_v27 = vpop.f32.mrf.mxu0  ;;  %v8928_v0 = vpop.f32.mrf.mxu1 }
 0x3b9   : > { %v5330_v55 = vadd.f32 %v5329_v27, %v5328_v44 }
 0x3ba   : > { %v5331_v50 = vpop.f32.mrf.mxu0  ;;  %v8930_v32 = vpop.f32.mrf.mxu1 }
 0x3bc   : > { %v5332_v2 = vpop.f32.mrf.mxu0  ;;  %v8932_v9 = vpop.f32.mrf.mxu1 }
 0x3bd   : > { %9709 = vst [vmem:[#allocation23_spill] sm:$0xff] %v8932_v9  ;;  %v5324_v9 = vadd.f32 %v5323_v22, %v5322_v4 }
 0x3be   : > { %v8934_v51 = vpop.f32.mrf.mxu0  ;;  %v8936_v23 = vpop.f32.mrf.mxu1 }
 0x3bf   : > { %9710 = vst [vmem:[#allocation18_spill] sm:$0xff] %v8936_v23 }
 0x3c0   : > { %v8941_v11 = vpop.f32.mrf.mxu0  ;;  %v5575_v60 = vpop.f32.mrf.mxu1 }
 0x3c1   : > { %v3921_v8 = vadd.f32 %v5575_v60, %v3776_v56 }
 0x3c2   : > { %v5337_v41 = vpop.f32.mrf.mxu0  ;;  %v3915_v59 = vpop.f32.mrf.mxu1 }
 0x3c3   : > { %v8946_v23 = vmax.f32 %v8838_v39, %v3921_v8  ;;  %v3916_v53 = vadd.f32 %v3915_v59, %v3771_v29  ;;  %v5259_v59 = vadd.f32 %v8914_v25, %v8912_v45 }
 0x3c4   : > { %v5338_v35 = vpop.f32.mrf.mxu0  ;;  %v5578_v37 = vpop.f32.mrf.mxu1 }
 0x3c5   : > { %v8950_v26 = vmax.f32 %v8841_v34, %v3916_v53  ;;  %v3931_v56 = vadd.f32 %v5578_v37, %v3786_v42  ;;  %v3796_v34 = vadd.f32 %v5324_v9, %v8894_v62  ;;  %v5327_v53 = vadd.f32 %v5326_v63, %v5325_v46 }
 0x3c6   : > { %v8954_v61 = vpop.f32.mrf.mxu0  ;;  %v3925_v38 = vpop.f32.mrf.mxu1  ;;  %v3806_v62 = vadd.f32 %v5330_v55, %v8902_v20 }
 0x3c7   : > { %v8957_v39 = vmax.f32 %v8844_v15, %v3931_v56  ;;  %v3926_v8 = vadd.f32 %v3925_v38, %v3781_v49  ;;  %4026 = vrot.lane.b32.xlu0 %v8950_v26, %s6375_s1  ;;  %v5247_v15 = vadd.f32 %v8900_v24, %v8898_v10 }
 0x3c8   : > { %v8962_v54 = vpop.f32.mrf.mxu0  ;;  %v5581_v1 = vpop.f32.mrf.mxu1 }
 0x3c9   : > { %v8965_v36 = vmax.f32 %v8847_v43, %v3926_v8  ;;  %v3941_v14 = vadd.f32 %v5581_v1, %v3796_v34  ;;  %v5333_v43 = vadd.f32 %v5332_v2, %v5331_v50  ;;  %v3801_v27 = vadd.f32 %v5327_v53, %v5247_v15  ;;  %v9714_v15 = vld [vmem:[#allocation9_spill] sm:$0xff] }
 0x3ca   : > { %v5343_v6 = vpop.f32.mrf.mxu0  ;;  %v3935_v4 = vpop.f32.mrf.mxu1  ;;  %v5339_v50 = vadd.f32 %v5338_v35, %v5337_v41 }
 0x3cb   : > { %v8970_v7 = vmax.f32 %v8854_v21, %v3941_v14  ;;  %v3936_v22 = vadd.f32 %v3935_v4, %v3791_v5  ;;  %4030 = vrot.lane.b32.xlu1 %v8965_v36, %s6375_s1  ;;  %v5253_v21 = vadd.f32 %v8906_v28, %v8904_v3 }
 0x3cc   : > { %v5344_v46 = vpop.f32.mrf.mxu0  ;;  %v5584_v63 = vpop.f32.mrf.mxu1  ;;  %v3821_v37 = vadd.f32 %v5339_v50, %v5259_v59  ;;  %v4289_v59 = vld [vmem:[%s9567_s5 + $0xf8] sm:$0xff] }
 0x3cd   : > { %v8976_v60 = vmax.f32 %v8857_v13, %v3936_v22  ;;  %v3951_v44 = vadd.f32 %v5584_v63, %v3806_v62  ;;  %v3811_v2 = vadd.f32 %v5333_v43, %v5253_v21  ;;  %v5345_v28 = vadd.f32 %v5344_v46, %v5343_v6  ;;  %v9716_v46 = vld [vmem:[#allocation23_spill] sm:$0xff]  ;;  %v9717_v63 = vld [vmem:[#allocation18_spill] sm:$0xff]  ;;  %5387 = vmatprep.subr.mxu0 %v4289_v59  ;;  %v4260_v59 = vld [vmem:[%s9567_s5 + $0x10] sm:$0xff] }
 0x3ce   : > { %v5346_v58 = vpop.f32.mrf.mxu0  ;;  %v3945_v9 = vpop.f32.mrf.mxu1  ;;  %v5274_v43 = vadd.f32 %v9717_v63, %v9716_v46  ;;  %v4314_v46 = vld [vmem:[%s9567_s5 + $0x1c0] sm:$0xff]  ;;  %v4263_v63 = vld [vmem:[%s9567_s5 + $0x28] sm:$0xff] }
 0x3cf   : > { %v8981_v10 = vmax.f32 %v8860_v18, %v3951_v44  ;;  %v3946_v24 = vadd.f32 %v3945_v9, %v3801_v27  ;;  %4034 = vrot.lane.b32.xlu0 %v8976_v60, %s6375_s1  ;;  %v9718_v44 = vld [vmem:[#allocation14_spill] sm:$0xff] }
 0x3d0   : > { %v5347_v20 = vpop.f32.mrf.mxu0  ;;  %v5587_v48 = vpop.f32.mrf.mxu1 }
 0x3d1   : > { %v8986_v13 = vmax.f32 %v8865_v47, %v3946_v24  ;;  %v5265_v47 = vadd.f32 %v8922_v40, %v8920_v31  ;;  %v5348_v5 = vadd.f32 %v5347_v20, %v5346_v58  ;;  %v9719_v24 = vld [vmem:[#allocation24_spill] sm:$0xff] }
 0x3d2   : > { %v5349_v29 = vpop.f32.mrf.mxu0  ;;  %v3955_v12 = vpop.f32.mrf.mxu1 }
 0x3d3   : > { %v3956_v3 = vadd.f32 %v3955_v12, %v3811_v2  ;;  %4038 = vrot.lane.b32.xlu1 %v8986_v13, %s6375_s1  ;;  %v3831_v49 = vadd.f32 %v5345_v28, %v5265_v47  ;;  %v4272_v28 = vld [vmem:[%s9567_s5 + $0x70] sm:$0xff]  ;;  %v4270_v47 = vld [vmem:[%s9567_s5 + $0x60] sm:$0xff] }
 0x3d4   : > { %v5590_v18 = vpop.f32.mrf.mxu1  ;;  %v5350_v41 = vpop.f32.mrf.mxu0 }
 0x3d5   : > { %v8993_v42 = vmax.f32 %v8875_v33, %v3956_v3  ;;  %v5351_v25 = vadd.f32 %v5350_v41, %v5349_v29  ;;  %v5271_v33 = vadd.f32 %v8930_v32, %v8928_v0  ;;  %v5256_v0 = vadd.f32 %v8910_v17, %v8908_v52  ;;  %v9711_v32 = vld [vmem:[#allocation21_spill] sm:$0xff]  ;;  %v9721_v29 = vld [vmem:[#allocation15_spill] sm:$0xff] }
 0x3d6   : > { %v3965_v35 = vpop.f32.mrf.mxu1  ;;  %v5352_v8 = vpop.f32.mrf.mxu0  ;;  %v9715_v52 = vld [vmem:[#allocation17_spill] sm:$0xff]  ;;  %v4271_v41 = vld [vmem:[%s9567_s5 + $0x68] sm:$0xff] }
 0x3d7   : > { %v3966_v57 = vadd.f32 %v3965_v35, %v3821_v37  ;;  %4042 = vrot.lane.b32.xlu0 %v8993_v42, %s6375_s1  ;;  %v3841_v40 = vadd.f32 %v5351_v25, %v5271_v33  ;;  %v5268_v17 = vadd.f32 %v9715_v52, %v9714_v15  ;;  %v4273_v3 = vld [vmem:[%s9567_s5 + $0x78] sm:$0xff]  ;;  %v4287_v37 = vld [vmem:[%s9567_s5 + $0xe8] sm:$0xff]  ;;  %v4286_v35 = vld [vmem:[%s9567_s5 + $0xe0] sm:$0xff] }
 0x3d8   : > { %v5593_v45 = vpop.f32.mrf.mxu1  ;;  %v5353_v14 = vpop.f32.mrf.mxu0  ;;  %5388 = vmatpush3.msra.mxu0 %v4273_v3  ;;  %v4305_v25 = vld [vmem:[%s9567_s5 + $0x178] sm:$0xff]  ;;  %v4304_v33 = vld [vmem:[%s9567_s5 + $0x170] sm:$0xff]  ;;  %v4315_v52 = vld [vmem:[%s9567_s5 + $0x1c8] sm:$0xff] }
 0x3d9   : > { %v9000_v56 = vmax.f32 %v8882_v19, %v3966_v57  ;;  %v5336_v19 = vadd.f32 %v8941_v11, %v8934_v51  ;;  %v9712_v11 = vld [vmem:[#allocation16_spill] sm:$0xff]  ;;  %v5354_v62 = vadd.f32 %v5353_v14, %v5352_v8  ;;  %v4285_v57 = vld [vmem:[%s9567_s5 + $0xd8] sm:$0xff]  ;;  %v4303_v8 = vld [vmem:[%s9567_s5 + $0x168] sm:$0xff] }
 0x3da   : > { %v3975_v30 = vpop.f32.mrf.mxu1  ;;  %v9713_v51 = vld [vmem:[#allocation28_spill] sm:$0xff]  ;;  %v4317_v14 = vld [vmem:[%s9567_s5 + $0x1d8] sm:$0xff]  ;;  %v4295_v3 = vld [vmem:[%s9567_s5 + $0x128] sm:$0xff] }
 0x3db   : > { %v3976_v38 = vadd.f32 %v3975_v30, %v3831_v49  ;;  %4046 = vrot.lane.b32.xlu1 %v9000_v56, %s6375_s1  ;;  %v3816_v6 = vadd.f32 %v5336_v19, %v5256_v0  ;;  %v5262_v4 = vadd.f32 %v9713_v51, %v9712_v11  ;;  %v3846_v21 = vadd.f32 %v5354_v62, %v5274_v43  ;;  %v4320_v49 = vld [vmem:[%s9567_s5 + $0x1f0] sm:$0xff]  ;;  %v4269_v30 = vld [vmem:[%s9567_s5 + $0x58] sm:$0xff]  ;;  %v4318_v19 = vld [vmem:[%s9567_s5 + $0x1e0] sm:$0xff] }
 0x3dc   : > { %v5596_v55 = vpop.f32.mrf.mxu1  ;;  %v4302_v0 = vld [vmem:[%s9567_s5 + $0x160] sm:$0xff]  ;;  %v4316_v11 = vld [vmem:[%s9567_s5 + $0x1d0] sm:$0xff]  ;;  %v4265_v51 = vld [vmem:[%s9567_s5 + $0x38] sm:$0xff] }
 0x3dd   : > { %v9007_v31 = vmax.f32 %v8890_v16, %v3976_v38  ;;  %v5342_v16 = vadd.f32 %v8962_v54, %v8954_v61  ;;  %v3961_v22 = vadd.f32 %v5587_v48, %v3816_v6  ;;  %v3836_v54 = vadd.f32 %v5348_v5, %v5268_v17  ;;  %v9720_v48 = vld [vmem:[#allocation8_spill] sm:$0xff]  ;;  %v4301_v5 = vld [vmem:[%s9567_s5 + $0x158] sm:$0xff]  ;;  %v4279_v62 = vld [vmem:[%s9567_s5 + $0xa8] sm:$0xff] }
 0x3de   : > { %v3985_v34 = vpop.f32.mrf.mxu1  ;;  %v3991_v2 = vadd.f32 %v5596_v55, %v3846_v21  ;;  %v4284_v38 = vld [vmem:[%s9567_s5 + $0xd0] sm:$0xff]  ;;  %v4319_v55 = vld [vmem:[%s9567_s5 + $0x1e8] sm:$0xff]  ;;  %v4281_v6 = vld [vmem:[%s9567_s5 + $0xb8] sm:$0xff] }
 0x3df   : > { %v3986_v1 = vadd.f32 %v3985_v34, %v3841_v40  ;;  %4050 = vrot.lane.b32.xlu0 %v9007_v31, %s6375_s1  ;;  %v3826_v61 = vadd.f32 %v5342_v16, %v5262_v4  ;;  %v9035_v27 = vmax.f32 %v9718_v44, %v3961_v22  ;;  %v3981_v9 = vadd.f32 %v5593_v45, %v3836_v54  ;;  %v4321_v45 = vld [vmem:[%s9567_s5 + $0x1f8] sm:$0xff]  ;;  %v4268_v40 = vld [vmem:[%s9567_s5 + $0x50] sm:$0xff]  ;;  %v4283_v34 = vld [vmem:[%s9567_s5 + $0xc8] sm:$0xff] }
 0x3e0   : > { %v9052_v12 = vmax.f32 %v9721_v29, %v3991_v2  ;;  %5422 = vmatprep.subr.mxu1 %v4321_v45  ;;  %v4266_v16 = vld [vmem:[%s9567_s5 + $0x40] sm:$0xff]  ;;  %v4300_v4 = vld [vmem:[%s9567_s5 + $0x150] sm:$0xff]  ;;  %v4299_v22 = vld [vmem:[%s9567_s5 + $0x148] sm:$0xff] }
 0x3e1   : > { %v9016_v53 = vmax.f32 %v9711_v32, %v3986_v1  ;;  %v3971_v58 = vadd.f32 %v5590_v18, %v3826_v61  ;;  %v9045_v50 = vmax.f32 %v9720_v48, %v3981_v9  ;;  %v4288_v18 = vld [vmem:[%s9567_s5 + $0xf0] sm:$0xff]  ;;  %5423 = vmatpush3.msra.mxu1 %v4305_v25  ;;  %v4267_v1 = vld [vmem:[%s9567_s5 + $0x48] sm:$0xff]  ;;  %v4282_v32 = vld [vmem:[%s9567_s5 + $0xc0] sm:$0xff] }
 0x3e2   : > { %5389 = vmatprep.subr.mxu0 %v4288_v18  ;;  %5424 = vmatprep.subr.mxu1 %v4320_v49  ;;  %v4280_v15 = vld [vmem:[%s9567_s5 + $0xb0] sm:$0xff]  ;;  %v4298_v43 = vld [vmem:[%s9567_s5 + $0x140] sm:$0xff]  ;;  %v4313_v54 = vld [vmem:[%s9567_s5 + $0x1b8] sm:$0xff] }
 0x3e3   : > { %4028 = vrot.lane.b32.xlu0 %v8946_v23, %s6375_s1  ;;  %4054 = vrot.lane.b32.xlu1 %v9016_v53, %s6375_s1  ;;  %v9042_v20 = vmax.f32 %v9719_v24, %v3971_v58  ;;  %v4264_v17 = vld [vmem:[%s9567_s5 + $0x30] sm:$0xff]  ;;  %v4278_v61 = vld [vmem:[%s9567_s5 + $0xa0] sm:$0xff] }
 0x3e4   : > { %5390 = vmatpush3.msra.mxu0 %v4272_v28  ;;  %5425 = vmatpush3.msra.mxu1 %v4304_v33  ;;  %v4262_v44 = vld [vmem:[%s9567_s5 + $0x20] sm:$0xff]  ;;  %v4297_v58 = vld [vmem:[%s9567_s5 + $0x138] sm:$0xff]  ;;  %v4312_v21 = vld [vmem:[%s9567_s5 + $0x1b0] sm:$0xff] }
 0x3e5   : > { %5391 = vmatprep.subr.mxu0 %v4287_v37  ;;  %5426 = vmatprep.subr.mxu1 %v4319_v55  ;;  %v4277_v9 = vld [vmem:[%s9567_s5 + $0x98] sm:$0xff]  ;;  %v4296_v48 = vld [vmem:[%s9567_s5 + $0x130] sm:$0xff]  ;;  %v4311_v29 = vld [vmem:[%s9567_s5 + $0x1a8] sm:$0xff] }
 0x3e6   : > { %5392 = vmatpush3.msra.mxu0 %v4271_v41  ;;  %5427 = vmatpush3.msra.mxu1 %v4303_v8  ;;  %v4261_v24 = vld [vmem:[%s9567_s5 + $0x18] sm:$0xff]  ;;  %v4276_v2 = vld [vmem:[%s9567_s5 + $0x90] sm:$0xff]  ;;  %v4310_v18 = vld [vmem:[%s9567_s5 + $0x1a0] sm:$0xff] }
 0x3e7   : > { %4036 = vrot.lane.b32.xlu0 %v8970_v7, %s6375_s1  ;;  %4032 = vrot.lane.b32.xlu1 %v8957_v39, %s6375_s1  ;;  %v4275_v28 = vld [vmem:[%s9567_s5 + $0x88] sm:$0xff]  ;;  %v4294_v37 = vld [vmem:[%s9567_s5 + $0x120] sm:$0xff] }
 0x3e8   : > { %5393 = vmatprep.subr.mxu0 %v4286_v35  ;;  %5428 = vmatprep.subr.mxu1 %v4318_v19  ;;  %v4259_v41 = vld [vmem:[%s9567_s5 + $0x8] sm:$0xff]  ;;  %v4309_v35 = vld [vmem:[%s9567_s5 + $0x198] sm:$0xff]  ;;  %v4308_v45 = vld [vmem:[%s9567_s5 + $0x190] sm:$0xff] }
 0x3e9   : > { %5394 = vmatpush3.msra.mxu0 %v4270_v47  ;;  %5429 = vmatpush3.msra.mxu1 %v4302_v0  ;;  %v4274_v47 = vld [vmem:[%s9567_s5 + $0x80] sm:$0xff]  ;;  %v4292_v25 = vld [vmem:[%s9567_s5 + $0x110] sm:$0xff] }
 0x3ea   : > { %5395 = vmatprep.subr.mxu0 %v4285_v57  ;;  %5430 = vmatprep.subr.mxu1 %v4317_v14  ;;  %v4293_v57 = vld [vmem:[%s9567_s5 + $0x118] sm:$0xff]  ;;  %v9236_v49 = vld [vmem:[%s9566_s4] ss:$0 sm:$0xff] }
 0x3eb   : > { %4044 = vrot.lane.b32.xlu0 %v9035_v27, %s6375_s1  ;;  %4040 = vrot.lane.b32.xlu1 %v8981_v10, %s6375_s1 }
 0x3ec   : > { %5396 = vmatpush3.msra.mxu0 %v4269_v30  ;;  %5431 = vmatpush3.msra.mxu1 %v4301_v5 }
 0x3ed   : > { %5397 = vmatprep.subr.mxu0 %v4284_v38  ;;  %5432 = vmatprep.subr.mxu1 %v4316_v11 }
 0x3ee   : > { %5398 = vmatpush3.msra.mxu0 %v4268_v40  ;;  %5433 = vmatpush3.msra.mxu1 %v4300_v4 }
 0x3ef   : > { %4052 = vrot.lane.b32.xlu0 %v9045_v50, %s6375_s1  ;;  %4048 = vrot.lane.b32.xlu1 %v9042_v20, %s6375_s1 }
 0x3f0   : > { %5399 = vmatprep.subr.mxu0 %v4283_v34  ;;  %5434 = vmatprep.subr.mxu1 %v4315_v52 }
 0x3f1   : > { %5400 = vmatpush3.msra.mxu0 %v4267_v1  ;;  %5435 = vmatpush3.msra.mxu1 %v4299_v22 }
 0x3f2   : > { %5401 = vmatprep.subr.mxu0 %v4282_v32  ;;  %5436 = vmatprep.subr.mxu1 %v4314_v46 }
 0x3f3   : > { %4056 = vrot.lane.b32.xlu1 %v9052_v12, %s6375_s1  ;;  %5402 = vmatpush3.msra.mxu0 %v4266_v16 }
 0x3f4   : > { %5403 = vmatprep.subr.mxu0 %v4281_v6  ;;  %5437 = vmatpush3.msra.mxu1 %v4298_v43 }
 0x3f5   : > { %5404 = vmatpush3.msra.mxu0 %v4265_v51  ;;  %5438 = vmatprep.subr.mxu1 %v4313_v54 }
 0x3f6   : > { %5405 = vmatprep.subr.mxu0 %v4280_v15  ;;  %5439 = vmatpush3.msra.mxu1 %v4297_v58 }
 0x3f7   : > { %5406 = vmatpush3.msra.mxu0 %v4264_v17  ;;  %5440 = vmatprep.subr.mxu1 %v4312_v21 }
 0x3f8   : > { %5407 = vmatprep.subr.mxu0 %v4279_v62  ;;  %5441 = vmatpush3.msra.mxu1 %v4296_v48 }
 0x3f9   : > { %5408 = vmatpush3.msra.mxu0 %v4263_v63  ;;  %5442 = vmatprep.subr.mxu1 %v4311_v29 }
 0x3fa   : > { %5409 = vmatprep.subr.mxu0 %v4278_v61  ;;  %5443 = vmatpush3.msra.mxu1 %v4295_v3 }
 0x3fb   : > { %5410 = vmatpush3.msra.mxu0 %v4262_v44  ;;  %5444 = vmatprep.subr.mxu1 %v4310_v18 }
 0x3fc   : > { %5411 = vmatprep.subr.mxu0 %v4277_v9  ;;  %5445 = vmatpush3.msra.mxu1 %v4294_v37 }
 0x3fd   : > { %5412 = vmatpush3.msra.mxu0 %v4261_v24  ;;  %5446 = vmatprep.subr.mxu1 %v4309_v35 }
 0x3fe   : > { %5413 = vmatprep.subr.mxu0 %v4276_v2  ;;  %5447 = vmatpush3.msra.mxu1 %v4293_v57 }
 0x3ff   : > { %5414 = vmatpush3.msra.mxu0 %v4260_v59  ;;  %5448 = vmatprep.subr.mxu1 %v4308_v45 }
 0x400   : > { %5415 = vmatprep.subr.mxu0 %v4275_v28  ;;  %5449 = vmatpush3.msra.mxu1 %v4292_v25  ;;  %v4258_v25 = vld [vmem:[%s9567_s5] sm:$0xff] }
 0x401   : > { %5416 = vmatpush3.msra.mxu0 %v4259_v41 }
 0x402   : > { %5417 = vmatprep.subr.mxu0 %v4274_v47 }
 0x403   : > { %5418 = vmatpush3.msra.mxu0 %v4258_v25 }
 0x439   : > { %v4027_v30 = vpop.permute.xlu0 %4026 }
 0x43a   : > { %v4074_v33 = vmax.f32 %v8950_v26, %v4027_v30  ;;  %v4307_v30 = vld [vmem:[%s9567_s5 + $0x188] sm:$0xff] }
 0x43b   : > { %5450 = vmatprep.subr.mxu1 %v4307_v30 }
 0x43c   : > { %v4097_v38 = vadd.f32 %v9236_v49, %v4074_v33  ;;  %v4291_v33 = vld [vmem:[%s9567_s5 + $0x108] sm:$0xff] }
 0x43d   : > { %v4031_v55 = vpop.permute.xlu1 %4030  ;;  %5451 = vmatpush3.msra.mxu1 %v4291_v33 }
 0x43e   : > { %v4113_v40 = vmax.f32 %v4097_v38, 0.0  ;;  %v4076_v8 = vmax.f32 %v8965_v36, %v4031_v55 }
 0x440   : > { %4130 = vst.msk [vmem:[#allocation3] sm:$0xff] %vm4129_vm8, %v4113_v40  ;;  %v4099_v34 = vadd.f32 %v9236_v49, %v4076_v8 }
 0x441   : > { %v4035_v19 = vpop.permute.xlu0 %4034 }
 0x442   : > { %v4115_v1 = vmax.f32 %v4099_v34, 0.0  ;;  %v4078_v0 = vmax.f32 %v8976_v60, %v4035_v19 }
 0x444   : > { %4132 = vst.msk [vmem:[#allocation3 + $0x10] sm:$0xff] %vm4129_vm8, %v4115_v1  ;;  %v4101_v32 = vadd.f32 %v9236_v49, %v4078_v0  ;;  %v6376_v0 = vmov 0.0  }
 0x445   : > { %v4039_v26 = vpop.permute.xlu1 %4038  ;;  %4496 = vmatprep.subr.mxu0 %v6376_v0 }
 0x446   : > { %v4117_v14 = vmax.f32 %v4101_v32, 0.0  ;;  %v4080_v16 = vmax.f32 %v8986_v13, %v4039_v26 }
 0x448   : > { %4134 = vst.msk [vmem:[#allocation3 + $0x20] sm:$0xff] %vm4129_vm8, %v4117_v14  ;;  %v4103_v36 = vadd.f32 %v9236_v49, %v4080_v16 }
 0x449   : > { %v4043_v5 = vpop.permute.xlu0 %4042 }
 0x44a   : > { %v4119_v6 = vmax.f32 %v4103_v36, 0.0  ;;  %v4082_v11 = vmax.f32 %v8993_v42, %v4043_v5 }
 0x44b   : > { %v4186_v29 = vld [vmem:[#allocation3 + $0x5] ss:$16 sm:$0x3]  ;;  %v4202_v59 = vld [vmem:[#allocation3 + $0x7] ss:$16 sm:$0x3] }
 0x44c   : > { %4136 = vst.msk [vmem:[#allocation3 + $0x30] sm:$0xff] %vm4129_vm8, %v4119_v6  ;;  %v4105_v60 = vadd.f32 %v9236_v49, %v4082_v11  ;;  %v4154_v45 = vld [vmem:[#allocation3 + $0x1] ss:$16 sm:$0x3] }
 0x44d   : > { %v4047_v51 = vpop.permute.xlu1 %4046  ;;  %v4170_v40 = vld [vmem:[#allocation3 + $0x3] ss:$16 sm:$0x3] }
 0x44e   : > { %v4121_v4 = vmax.f32 %v4105_v60, 0.0  ;;  %v4084_v15 = vmax.f32 %v9000_v56, %v4047_v51 }
 0x450   : > { %4138 = vst.msk [vmem:[#allocation3 + $0x40] sm:$0xff] %vm4129_vm8, %v4121_v4  ;;  %v4107_v13 = vadd.f32 %v9236_v49, %v4084_v15 }
 0x451   : > { %v4051_v52 = vpop.permute.xlu0 %4050 }
 0x452   : > { %v4123_v17 = vmax.f32 %v4107_v13, 0.0  ;;  %v4086_v22 = vmax.f32 %v9007_v31, %v4051_v52 }
 0x453   : > { %v4187_v48 = vld [vmem:[#allocation3 + $0x5] ss:$16 sm:$0xc]  ;;  %v4203_v2 = vld [vmem:[#allocation3 + $0x7] ss:$16 sm:$0xc] }
 0x454   : > { %4140 = vst.msk [vmem:[#allocation3 + $0x50] sm:$0xff] %vm4129_vm8, %v4123_v17  ;;  %v4109_v42 = vadd.f32 %v9236_v49, %v4086_v22  ;;  %v4155_v3 = vld [vmem:[#allocation3 + $0x1] ss:$16 sm:$0xc]  ;;  %v4188_v38 = vor.u32 %v4187_v48, %v4186_v29  ;;  %v4204_v55 = vor.u32 %v4203_v2, %v4202_v59 }
 0x455   : > { %v4029_v62 = vpop.permute.xlu0 %4028  ;;  %v4055_v46 = vpop.permute.xlu1 %4054  ;;  %v4171_v18 = vld [vmem:[#allocation3 + $0x3] ss:$16 sm:$0xc]  ;;  %v4156_v36 = vor.u32 %v4155_v3, %v4154_v45  ;;  %v4178_v29 = vld [vmem:[#allocation3 + $0x4] ss:$16 sm:$0x3] }
 0x456   : > { %v4125_v63 = vmax.f32 %v4109_v42, 0.0  ;;  %v4075_v43 = vmax.f32 %v8946_v23, %v4029_v62  ;;  %v4088_v61 = vmax.f32 %v9016_v53, %v4055_v46  ;;  %v4172_v5 = vor.u32 %v4171_v18, %v4170_v40  ;;  %v4179_v59 = vld [vmem:[#allocation3 + $0x4] ss:$16 sm:$0xc] }
 0x457   : > { %v4147_v3 = vld [vmem:[#allocation3] ss:$16 sm:$0xc]  ;;  %v4195_v18 = vld [vmem:[#allocation3 + $0x6] ss:$16 sm:$0xc] }
 0x458   : > { %4142 = vst.msk [vmem:[#allocation3 + $0x60] sm:$0xff] %vm4129_vm8, %v4125_v63  ;;  %v4098_v56 = vadd.f32 %v9236_v49, %v4075_v43  ;;  %v4111_v54 = vadd.f32 %v9236_v49, %v4088_v61 }
 0x459   : > { %v4037_v44 = vpop.permute.xlu0 %4036  ;;  %v4033_v58 = vpop.permute.xlu1 %4032 }
 0x45a   : > { %v4114_v31 = vmax.f32 %v4098_v56, 0.0  ;;  %v4127_v9 = vmax.f32 %v4111_v54, 0.0  ;;  %v4079_v21 = vmax.f32 %v8970_v7, %v4037_v44  ;;  %v4077_v24 = vmax.f32 %v8957_v39, %v4033_v58 }
 0x45b   : > { %v4189_v41 = vld [vmem:[#allocation3 + $0x5] ss:$16 sm:$0x30]  ;;  %v4205_v7 = vld [vmem:[#allocation3 + $0x7] ss:$16 sm:$0x30] }
 0x45c   : > { %4131 = vst.msk [vmem:[#allocation3 + $0x8] sm:$0xff] %vm4129_vm8, %v4114_v31  ;;  %4144 = vst.msk [vmem:[#allocation3 + $0x70] sm:$0xff] %vm4129_vm8, %v4127_v9  ;;  %v4102_v23 = vadd.f32 %v9236_v49, %v4079_v21  ;;  %v4100_v53 = vadd.f32 %v9236_v49, %v4077_v24  ;;  %v4157_v19 = vld [vmem:[#allocation3 + $0x1] ss:$16 sm:$0x30]  ;;  %v4190_v14 = vor.u32 %v4189_v41, %v4188_v38 }
 0x45d   : > { %v4045_v28 = vpop.permute.xlu0 %4044  ;;  %v4041_v37 = vpop.permute.xlu1 %4040  ;;  %v4173_v1 = vld [vmem:[#allocation3 + $0x3] ss:$16 sm:$0x30]  ;;  %v4206_v16 = vor.u32 %v4205_v7, %v4204_v55  ;;  %v4158_v13 = vor.u32 %v4157_v19, %v4156_v36  ;;  %v4162_v41 = vld [vmem:[#allocation3 + $0x2] ss:$16 sm:$0x3] }
 0x45e   : > { %v4118_v35 = vmax.f32 %v4102_v23, 0.0  ;;  %v4116_v39 = vmax.f32 %v4100_v53, 0.0  ;;  %v4083_v47 = vmax.f32 %v9035_v27, %v4045_v28  ;;  %v4081_v57 = vmax.f32 %v8981_v10, %v4041_v37  ;;  %v4306_v10 = vld [vmem:[%s9567_s5 + $0x180] sm:$0xff] }
 0x45f   : > { %v4290_v27 = vld [vmem:[%s9567_s5 + $0x100] sm:$0xff]  ;;  %5452 = vmatprep.subr.mxu1 %v4306_v10  ;;  %v4174_v52 = vor.u32 %v4173_v1, %v4172_v5 }
 0x460   : > { %4135 = vst.msk [vmem:[#allocation3 + $0x28] sm:$0xff] %vm4129_vm8, %v4118_v35  ;;  %4133 = vst.msk [vmem:[#allocation3 + $0x18] sm:$0xff] %vm4129_vm8, %v4116_v39  ;;  %v4106_v8 = vadd.f32 %v9236_v49, %v4083_v47  ;;  %v4104_v34 = vadd.f32 %v9236_v49, %v4081_v57  ;;  %5453 = vmatpush3.msra.mxu1 %v4290_v27  ;;  %v4146_v28 = vld [vmem:[#allocation3] ss:$16 sm:$0x3]  ;;  %v4180_v39 = vor.u32 %v4179_v59, %v4178_v29  ;;  %v4343_v29 = vld [vmem:[%s9567_s5 + $0x2a8] sm:$0xff] }
 0x461   : > { %v4053_v32 = vpop.permute.xlu0 %4052  ;;  %v4049_v26 = vpop.permute.xlu1 %4048  ;;  %5597 = vmatprep.subr.mxu1 %v6376_v0  ;;  %v4181_v37 = vld [vmem:[#allocation3 + $0x4] ss:$16 sm:$0x30]  ;;  %v4163_v7 = vld [vmem:[#allocation3 + $0x2] ss:$16 sm:$0xc]  ;;  %v4148_v30 = vor.u32 %v4147_v3, %v4146_v28 }
 0x462   : > { %v4122_v6 = vmax.f32 %v4106_v8, 0.0  ;;  %v4120_v11 = vmax.f32 %v4104_v34, 0.0  ;;  %v4087_v60 = vmax.f32 %v9045_v50, %v4053_v32  ;;  %v4085_v51 = vmax.f32 %v9042_v20, %v4049_v26  ;;  %v4149_v35 = vld [vmem:[#allocation3] ss:$16 sm:$0x30] }
 0x463   : > { %v4191_v4 = vld [vmem:[#allocation3 + $0x5] ss:$16 sm:$0xc0]  ;;  %v4207_v15 = vld [vmem:[#allocation3 + $0x7] ss:$16 sm:$0xc0]  ;;  %v4182_v33 = vor.u32 %v4181_v37, %v4180_v39  ;;  %v4164_v38 = vor.u32 %v4163_v7, %v4162_v41  ;;  %v4150_v34 = vor.u32 %v4149_v35, %v4148_v30 }
 0x464   : > { %4139 = vst.msk [vmem:[#allocation3 + $0x48] sm:$0xff] %vm4129_vm8, %v4122_v6  ;;  %4137 = vst.msk [vmem:[#allocation3 + $0x38] sm:$0xff] %vm4129_vm8, %v4120_v11  ;;  %v4110_v17 = vadd.f32 %v9236_v49, %v4087_v60  ;;  %v4108_v22 = vadd.f32 %v9236_v49, %v4085_v51  ;;  %v4192_v42 = vor.u32 %v4191_v4, %v4190_v14  ;;  %v4159_v50 = vld [vmem:[#allocation3 + $0x1] ss:$16 sm:$0xc0]  ;;  %v4339_v35 = vld [vmem:[%s9567_s5 + $0x288] sm:$0xff] }
 0x465   : > { %v4208_v62 = vor.u32 %v4207_v15, %v4206_v16  ;;  %v4175_v46 = vld [vmem:[#allocation3 + $0x3] ss:$16 sm:$0xc0]  ;;  %v4057_v20 = vpop.permute.xlu1 %4056  ;;  %v4160_v63 = vor.u32 %v4159_v50, %v4158_v13  ;;  %v4197_v47 = vld [vmem:[#allocation3 + $0x6] ss:$16 sm:$0x30] }
 0x466   : > { %v4176_v43 = vor.u32 %v4175_v46, %v4174_v52  ;;  %v4126_v61 = vmax.f32 %v4110_v17, 0.0  ;;  %v4124_v56 = vmax.f32 %v4108_v22, 0.0  ;;  %v4089_v54 = vmax.f32 %v9052_v12, %v4057_v20  ;;  %v4183_v57 = vld [vmem:[#allocation3 + $0x4] ss:$16 sm:$0xc0]  ;;  %v4337_v50 = vld [vmem:[%s9567_s5 + $0x278] sm:$0xff] }
 0x467   : > { %v6186_v44 = vpack.i.bf16 %v4192_v42, %v4208_v62  ;;  %v4218_v24 = vld [vmem:[#allocation3 + $0x9] ss:$16 sm:$0x3]  ;;  %v4165_v45 = vld [vmem:[#allocation3 + $0x2] ss:$16 sm:$0x30]  ;;  %v4184_v19 = vor.u32 %v4183_v57, %v4182_v33 }
 0x468   : > { %v6181_v58 = vpack.i.bf16 %v4160_v63, %v4176_v43  ;;  %4143 = vst.msk [vmem:[#allocation3 + $0x68] sm:$0xff] %vm4129_vm8, %v4126_v61  ;;  %4141 = vst.msk [vmem:[#allocation3 + $0x58] sm:$0xff] %vm4129_vm8, %v4124_v56  ;;  %v4112_v31 = vadd.f32 %v9236_v49, %v4089_v54  ;;  %v4194_v49 = vld [vmem:[#allocation3 + $0x6] ss:$16 sm:$0x3]  ;;  %v4166_v32 = vor.u32 %v4165_v45, %v4164_v38  ;;  %v4335_v63 = vld [vmem:[%s9567_s5 + $0x268] sm:$0xff] }
 0x469   : > { %6187 = vrot.lane.b32.xlu1 %v6186_v44, %s6375_s1  ;;  %v4196_v25 = vor.u32 %v4195_v18, %v4194_v49  ;;  %v4199_v55 = vld [vmem:[#allocation3 + $0x6] ss:$16 sm:$0xc0]  ;;  %v4151_v10 = vld [vmem:[#allocation3] ss:$16 sm:$0xc0] }
 0x46a   : > { %6182 = vrot.lane.b32.xlu0 %v6181_v58, %s6375_s1  ;;  %v4128_v9 = vmax.f32 %v4112_v31, 0.0  ;;  %v4167_v27 = vld [vmem:[#allocation3 + $0x2] ss:$16 sm:$0xc0]  ;;  %v4152_v4 = vor.u32 %v4151_v10, %v4150_v34  ;;  %v4333_v61 = vld [vmem:[%s9567_s5 + $0x258] sm:$0xff]  ;;  %v4331_v54 = vld [vmem:[%s9567_s5 + $0x248] sm:$0xff] }
 0x46b   : > { %v4219_v21 = vld [vmem:[#allocation3 + $0x9] ss:$16 sm:$0xc]  ;;  %v4227_v40 = vld [vmem:[#allocation3 + $0xa] ss:$16 sm:$0xc]  ;;  %v4198_v8 = vor.u32 %v4197_v47, %v4196_v25  ;;  %v4168_v15 = vor.u32 %v4167_v27, %v4166_v32 }
 0x46c   : > { %4145 = vst.msk [vmem:[#allocation3 + $0x78] sm:$0xff] %vm4129_vm8, %v4128_v9  ;;  %v4220_v2 = vor.u32 %v4219_v21, %v4218_v24  ;;  %v4226_v26 = vld [vmem:[#allocation3 + $0xa] ss:$16 sm:$0x3]  ;;  %v4336_v20 = vld [vmem:[%s9567_s5 + $0x270] sm:$0xff]  ;;  %v4334_v43 = vld [vmem:[%s9567_s5 + $0x260] sm:$0xff] }
 0x46d   : > { %v4200_v6 = vor.u32 %v4199_v55, %v4198_v8  ;;  %v4228_v11 = vor.u32 %v4227_v40, %v4226_v26  ;;  %v4332_v56 = vld [vmem:[%s9567_s5 + $0x250] sm:$0xff]  ;;  %v4330_v44 = vld [vmem:[%s9567_s5 + $0x240] sm:$0xff]  ;;  %v4329_v58 = vld [vmem:[%s9567_s5 + $0x238] sm:$0xff] }
 0x46e   : > { %v4328_v31 = vld [vmem:[%s9567_s5 + $0x230] sm:$0xff]  ;;  %v4327_v9 = vld [vmem:[%s9567_s5 + $0x228] sm:$0xff]  ;;  %v4326_v21 = vld [vmem:[%s9567_s5 + $0x220] sm:$0xff] }
 0x46f   : > { %v4221_v48 = vld [vmem:[#allocation3 + $0x9] ss:$16 sm:$0x30]  ;;  %v4229_v14 = vld [vmem:[#allocation3 + $0xa] ss:$16 sm:$0x30] }
 0x470   : > { %v4222_v12 = vor.u32 %v4221_v48, %v4220_v2  ;;  %v4230_v22 = vor.u32 %v4229_v14, %v4228_v11  ;;  %v4325_v24 = vld [vmem:[%s9567_s5 + $0x218] sm:$0xff]  ;;  %v4324_v48 = vld [vmem:[%s9567_s5 + $0x210] sm:$0xff]  ;;  %v4323_v2 = vld [vmem:[%s9567_s5 + $0x208] sm:$0xff] }
 0x471   : > { %v4342_v59 = vld [vmem:[%s9567_s5 + $0x2a0] sm:$0xff]  ;;  %v4211_v3 = vld [vmem:[#allocation3 + $0x8] ss:$16 sm:$0xc]  ;;  %v4340_v37 = vld [vmem:[%s9567_s5 + $0x290] sm:$0xff] }
 0x472   : > { %v4341_v49 = vld [vmem:[%s9567_s5 + $0x298] sm:$0xff]  ;;  %v4338_v57 = vld [vmem:[%s9567_s5 + $0x280] sm:$0xff]  ;;  %v4581_v30 = vld [vmem:[%s9569_s7 + $0x70] sm:$0xff] }
 0x473   : > { %v4223_v23 = vld [vmem:[#allocation3 + $0x9] ss:$16 sm:$0xc0]  ;;  %v4231_v13 = vld [vmem:[#allocation3 + $0xa] ss:$16 sm:$0xc0] }
 0x474   : > { %v4224_v53 = vor.u32 %v4223_v23, %v4222_v12  ;;  %v4232_v46 = vor.u32 %v4231_v13, %v4230_v22  ;;  %v4322_v12 = vld [vmem:[%s9567_s5 + $0x200] sm:$0xff]  ;;  %v4345_v23 = vld [vmem:[%s9567_s5 + $0x2b8] sm:$0xff]  ;;  %v4580_v33 = vld [vmem:[%s9569_s7 + $0x68] sm:$0xff] }
 0x475   : > { %v4210_v18 = vld [vmem:[#allocation3 + $0x8] ss:$16 sm:$0x3]  ;;  %v4579_v38 = vld [vmem:[%s9569_s7 + $0x60] sm:$0xff]  ;;  %v4577_v40 = vld [vmem:[%s9569_s7 + $0x50] sm:$0xff] }
 0x476   : > { %4250 = vrot.lane.b32.xlu0 %v4224_v53, %s6375_s1  ;;  %v4344_v53 = vld [vmem:[%s9567_s5 + $0x2b0] sm:$0xff]  ;;  %v4213_v28 = vld [vmem:[#allocation3 + $0x8] ss:$16 sm:$0x30]  ;;  %v4212_v41 = vor.u32 %v4211_v3, %v4210_v18  ;;  %v4575_v27 = vld [vmem:[%s9569_s7 + $0x40] sm:$0xff]  ;;  %s6313_s1 = sshll.u32 %s6378_s13, 4  ;;  %s6314_s1 = int_to_ptr.vmem [resolvable:$false] %s6313_s1 }
 0x477   : > { %v4215_v7 = vld [vmem:[#allocation3 + $0x8] ss:$16 sm:$0xc0]  ;;  %v4573_v34 = vld [vmem:[%s9569_s7 + $0x30] sm:$0xff]  ;;  %s6315_s21 = scalar_lea.vmem %s6314_s1, 256  ;;  %p6316_p0 = scmp.lt.s32.totalorder %s4787_s15, %s6314_s1 }
 0x478   : > { %v4214_v39 = vor.u32 %v4213_v28, %v4212_v41  ;;  %v4578_v55 = vld [vmem:[%s9569_s7 + $0x58] sm:$0xff]  ;;  %v4576_v10 = vld [vmem:[%s9569_s7 + $0x48] sm:$0xff]  ;;  %v4569_v26 = vld [vmem:[%s9569_s7 + $0x10] sm:$0xff]  ;;  %p6317_p1 = scmp.lt.s32.totalorder %s6315_s21, %s6309_s26 }
 0x479   : > { %v4574_v8 = vld [vmem:[%s9569_s7 + $0x38] sm:$0xff]  ;;  %v4568_v14 = vld [vmem:[%s9569_s7 + $0x8] sm:$0xff] }
 0x47a   : > { %v4216_v45 = vor.u32 %v4215_v7, %v4214_v39  ;;  %v4570_v32 = vld [vmem:[%s9569_s7 + $0x18] sm:$0xff]  ;;  %p6318_p2 = por %p6317_p1, %p6316_p0 }
 0x47c   : > { %p6319_p3 = pnand %p6318_p2, %p6312_p13 }
 0x4db   : > { %v6188_v1 = vpop.permute.xlu1 %6187 }
 0x4dc   : > { %v6183_v16 = vpop.permute.xlu0 %6182  ;;  %v6190_v36 = vunpack.i.h.bf16 %v6188_v1  ;;  %v6189_v5 = vunpack.i.l.bf16 %v6188_v1  ;;  %v4571_v1 = vld [vmem:[%s9569_s7 + $0x20] sm:$0xff] }
 0x4dd   : > { %v6185_v60 = vunpack.i.h.bf16 %v6183_v16  ;;  %v6184_v51 = vunpack.i.l.bf16 %v6183_v16  ;;  %v4567_v16 = vld [vmem:[%s9569_s7] sm:$0xff] }
 0x4de   : > { %v4255_v52 = vsel %vm4129_vm8, %v4184_v19, %v6190_v36  ;;  %v4256_v17 = vsel %vm4129_vm8, %v4200_v6, %v6189_v5  ;;  %v4572_v19 = vld [vmem:[%s9569_s7 + $0x28] sm:$0xff] }
 0x4df   : > { %v4253_v42 = vsel %vm4129_vm8, %v4152_v4, %v6185_v60  ;;  %v4254_v62 = vsel %vm4129_vm8, %v4168_v15, %v6184_v51  ;;  %4490 = vmatprep.mubr.f32.mxu1 %v4256_v17  ;;  %v4992_v60 = vld [vmem:[%s9568_s6] ss:$0 sm:$0xff] }
 0x4e0   : > { %4420 = vmatprep.mubr.f32.mxu0 %v4254_v62  ;;  %4491 = vmatmul.mubr.f32.vlgmr.msra.gmra.mxu1 %v4255_v52  ;;  %v4674_v62 = vld [vmem:[%s9571_s9 + $0x50] sm:$0xf] }
 0x4e1   : > { %4421 = vmatmul.mubr.f32.vlgmr.msra.gmra.mxu0 %v4253_v42  ;;  %5598 = vmatpush3.msra.mxu1 %v4581_v30 }
 0x4e2   : > { %4497 = vmatpush1.msra.mxu0 %v4337_v50  ;;  %4993 = vmatprep.mubr.msk.f32.mxu0 %vm4129_vm8, %v4232_v46  ;;  %v4673_v50 = vld [vmem:[%s9571_s9 + $0x48] sm:$0xff]  ;;  %v4672_v46 = vld [vmem:[%s9571_s9 + $0x40] sm:$0xff] }
 0x4e3   : > { %4498 = vmatprep.subr.mxu0 %v6376_v0  ;;  %5599 = vmatprep.subr.mxu1 %v6376_v0 }
 0x4e4   : > { %4499 = vmatpush1.msra.mxu0 %v4336_v20  ;;  %5600 = vmatpush3.msra.mxu1 %v4580_v33  ;;  %v4671_v20 = vld [vmem:[%s9571_s9 + $0x38] sm:$0xff] }
 0x4e5   : > { %4500 = vmatprep.subr.mxu0 %v6376_v0  ;;  %5601 = vmatprep.subr.mxu1 %v6376_v0 }
 0x4e6   : > { %4501 = vmatpush1.msra.mxu0 %v4335_v63  ;;  %5602 = vmatpush3.msra.mxu1 %v4579_v38  ;;  %v4670_v63 = vld [vmem:[%s9571_s9 + $0x30] sm:$0xff] }
 0x4e7   : > { %4502 = vmatprep.subr.mxu0 %v6376_v0  ;;  %5603 = vmatprep.subr.mxu1 %v6376_v0 }
 0x4e8   : > { %4503 = vmatpush1.msra.mxu0 %v4334_v43  ;;  %v4251_v47 = vpop.permute.xlu0 %4250  ;;  %5604 = vmatpush3.msra.mxu1 %v4578_v55  ;;  %v4669_v43 = vld [vmem:[%s9571_s9 + $0x28] sm:$0xff] }
 0x4e9   : > { %4504 = vmatprep.subr.mxu0 %v6376_v0  ;;  %v4257_v25 = vsel %vm4129_vm8, %v4216_v45, %v4251_v47  ;;  %5605 = vmatprep.subr.mxu1 %v6376_v0 }
 0x4ea   : > { %4505 = vmatpush1.msra.mxu0 %v4333_v61  ;;  %5606 = vmatpush3.msra.mxu1 %v4577_v40  ;;  %v4668_v61 = vld [vmem:[%s9571_s9 + $0x20] sm:$0xff] }
 0x4eb   : > { %4506 = vmatprep.subr.mxu0 %v6376_v0  ;;  %5607 = vmatprep.subr.mxu1 %v6376_v0 }
 0x4ec   : > { %4507 = vmatpush1.msra.mxu0 %v4332_v56  ;;  %5608 = vmatpush3.msra.mxu1 %v4576_v10  ;;  %v4667_v56 = vld [vmem:[%s9571_s9 + $0x18] sm:$0xff] }
 0x4ed   : > { %4508 = vmatprep.subr.mxu0 %v6376_v0  ;;  %5609 = vmatprep.subr.mxu1 %v6376_v0 }
 0x4ee   : > { %4509 = vmatpush1.msra.mxu0 %v4331_v54  ;;  %5610 = vmatpush3.msra.mxu1 %v4575_v27  ;;  %v4666_v54 = vld [vmem:[%s9571_s9 + $0x10] sm:$0xff] }
 0x4ef   : > { %4510 = vmatprep.subr.mxu0 %v6376_v0  ;;  %5611 = vmatprep.subr.mxu1 %v6376_v0 }
 0x4f0   : > { %4511 = vmatpush1.msra.mxu0 %v4330_v44  ;;  %5612 = vmatpush3.msra.mxu1 %v4574_v8  ;;  %v4665_v44 = vld [vmem:[%s9571_s9 + $0x8] sm:$0xff] }
 0x4f1   : > { %4512 = vmatprep.subr.mxu0 %v6376_v0  ;;  %5613 = vmatprep.subr.mxu1 %v6376_v0 }
 0x4f2   : > { %4513 = vmatpush1.msra.mxu0 %v4329_v58  ;;  %5614 = vmatpush3.msra.mxu1 %v4573_v34  ;;  %v4664_v58 = vld [vmem:[%s9571_s9] sm:$0xff] }
 0x4f3   : > { %4514 = vmatprep.subr.mxu0 %v6376_v0  ;;  %5615 = vmatprep.subr.mxu1 %v6376_v0 }
 0x4f4   : > { %4515 = vmatpush1.msra.mxu0 %v4328_v31  ;;  %5616 = vmatpush3.msra.mxu1 %v4572_v19  ;;  %v4994_v31 = vld [vmem:[%s9570_s8] ss:$0 sm:$0xff] }
 0x4f5   : > { %4516 = vmatprep.subr.mxu0 %v6376_v0  ;;  %5617 = vmatprep.subr.mxu1 %v6376_v0 }
 0x4f6   : > { %4517 = vmatpush1.msra.mxu0 %v4327_v9  ;;  %5618 = vmatpush3.msra.mxu1 %v4571_v1 }
 0x4f7   : > { %4518 = vmatprep.subr.mxu0 %v6376_v0  ;;  %5619 = vmatprep.subr.mxu1 %v6376_v0 }
 0x4f8   : > { %4519 = vmatpush1.msra.mxu0 %v4326_v21  ;;  %5620 = vmatpush3.msra.mxu1 %v4570_v32 }
 0x4f9   : > { %4520 = vmatprep.subr.mxu0 %v6376_v0  ;;  %5621 = vmatprep.subr.mxu1 %v6376_v0 }
 0x4fa   : > { %4521 = vmatpush1.msra.mxu0 %v4325_v24  ;;  %5622 = vmatpush3.msra.mxu1 %v4569_v26 }
 0x4fb   : > { %4522 = vmatprep.subr.mxu0 %v6376_v0  ;;  %5623 = vmatprep.subr.mxu1 %v6376_v0 }
 0x4fc   : > { %4523 = vmatpush1.msra.mxu0 %v4324_v48  ;;  %5627 = vmatprep.mubr.msk.f32.mxu1 %vm6377_vm9, %v6376_v0 }
 0x4fd   : > { %4524 = vmatprep.subr.mxu0 %v6376_v0  ;;  %5624 = vmatpush3.msra.mxu1 %v4568_v14 }
 0x4fe   : > { %4525 = vmatpush1.msra.mxu0 %v4323_v2  ;;  %5625 = vmatprep.subr.mxu1 %v6376_v0  ;;  %v4996_v2 = vld [vmem:[%s9572_s10] ss:$0 sm:$0xff] }
 0x4ff   : > { %4526 = vmatprep.subr.mxu0 %v6376_v0  ;;  %5626 = vmatpush3.msra.mxu1 %v4567_v16 }
 0x500   : > { %4527 = vmatpush1.msra.mxu0 %v4322_v12  ;;  %5630 = vmatprep.subr.mxu1 %v6376_v0 }
 0x501   : > { %4544 = vmatprep.subr.mxu0 %v6376_v0 }
 0x502   : > { %4545 = vmatpush2.msra.mxu0 %v4345_v23 }
 0x503   : > { %4546 = vmatprep.subr.mxu0 %v6376_v0 }
 0x504   : > { %4547 = vmatpush2.msra.mxu0 %v4344_v53 }
 0x505   : > { %4548 = vmatprep.subr.mxu0 %v6376_v0 }
 0x506   : > { %4549 = vmatpush2.msra.mxu0 %v4343_v29 }
 0x507   : > { %4550 = vmatprep.subr.mxu0 %v6376_v0 }
 0x508   : > { %4551 = vmatpush2.msra.mxu0 %v4342_v59 }
 0x509   : > { %4552 = vmatprep.subr.mxu0 %v6376_v0 }
 0x50a   : > { %4553 = vmatpush2.msra.mxu0 %v4341_v49 }
 0x50b   : > { %4554 = vmatprep.subr.mxu0 %v6376_v0 }
 0x50c   : > { %4555 = vmatpush2.msra.mxu0 %v4340_v37 }
 0x50d   : > { %4556 = vmatprep.subr.mxu0 %v6376_v0 }
 0x50e   : > { %4557 = vmatpush2.msra.mxu0 %v4339_v35 }
 0x50f   : > { %4558 = vmatprep.subr.mxu0 %v6376_v0 }
 0x510   : > { %4559 = vmatpush2.msra.mxu0 %v4338_v57 }
 0x511   : > { %4561 = vmatmul.mubr.f32.vlgmr.msra.gmra.mxu0 %v4257_v25 }
 0x5a0   : > { %v5454_v6 = vpop.f32.mrf.mxu1 }
 0x5a1   : > { %v5419_v36 = vpop.f32.mrf.mxu0 }
 0x5a2   : > { %v5455_v51 = vpop.f32.mrf.mxu1 }
 0x5a3   : > { %v5420_v5 = vpop.f32.mrf.mxu0  ;;  %v5456_v15 = vadd.f32 %v5455_v51, %v5454_v6 }
 0x5a4   : > { %v5421_v11 = vadd.f32 %v5420_v5, %v5419_v36 }
 0x5a6   : > { %v4423_v4 = vadd.f32 %v5421_v11, %v4992_v60 }
 0x5a8   : > { %v4493_v13 = vadd.f32 %v5456_v15, %v4423_v4 }
 0x5d1   : > { %v4562_v52 = vpop.f32.mrf.mxu0 }
 0x5d2   : > { %v4563_v17 = vadd.f32 %v4562_v52, %v4493_v13 }
 0x5d3   : > { %v4564_v22 = vpop.f32.mrf.mxu0 }
 0x5d4   : > { %v4566_v42 = vmax.f32 %v4563_v17, 0.0 }
 0x5d6   : > { %5628 = vmatmul.mubr.msk.f32.vlgmr.msra.gmra.mxu1 %vm4589_vm10, %v4566_v42 }
 0x5d7   : > { %5631 = vmatpush3.msk.msra.mxu1 %vm1973_vm2, %v4674_v62  ;;  %5652 = vmatprep.mubr.msk.f32.mxu1 %vm6377_vm9, %v6376_v0 }
 0x5d8   : > { %5632 = vmatprep.subr.mxu1 %v6376_v0 }
 0x5d9   : > { %5633 = vmatpush3.msra.mxu1 %v4673_v50 }
 0x5da   : > { %5634 = vmatprep.subr.mxu1 %v6376_v0 }
 0x5db   : > { %5635 = vmatpush3.msra.mxu1 %v4672_v46 }
 0x5dc   : > { %5636 = vmatprep.subr.mxu1 %v6376_v0 }
 0x5dd   : > { %5637 = vmatpush3.msra.mxu1 %v4671_v20 }
 0x5de   : > { %5638 = vmatprep.subr.mxu1 %v6376_v0 }
 0x5df   : > { %5639 = vmatpush3.msra.mxu1 %v4670_v63 }
 0x5e0   : > { %5640 = vmatprep.subr.mxu1 %v6376_v0 }
 0x5e1   : > { %5641 = vmatpush3.msra.mxu1 %v4669_v43 }
 0x5e2   : > { %5642 = vmatprep.subr.mxu1 %v6376_v0 }
 0x5e3   : > { %5643 = vmatpush3.msra.mxu1 %v4668_v61 }
 0x5e4   : > { %5644 = vmatprep.subr.mxu1 %v6376_v0 }
 0x5e5   : > { %5645 = vmatpush3.msra.mxu1 %v4667_v56 }
 0x5e6   : > { %5646 = vmatprep.subr.mxu1 %v6376_v0 }
 0x5e7   : > { %5647 = vmatpush3.msra.mxu1 %v4666_v54 }
 0x5e8   : > { %5648 = vmatprep.subr.mxu1 %v6376_v0 }
 0x5e9   : > { %5649 = vmatpush3.msra.mxu1 %v4665_v44 }
 0x5ea   : > { %5650 = vmatprep.subr.mxu1 %v6376_v0 }
 0x5eb   : > { %5651 = vmatpush3.msra.mxu1 %v4664_v58 }
 0x696   : > { %v4659_v9 = vpop.f32.mrf.mxu1 }
 0x697   : > { %v4660_v21 = vadd.f32 %v4994_v31, %v4659_v9 }
 0x698   : > { %v5629_v24 = vpop.f32.mrf.mxu1 }
 0x699   : > { %v4663_v48 = vmax.f32 %v4660_v21, 0.0 }
 0x69b   : > { %5653 = vmatmul.mubr.msk.f32.vlgmr.msra.gmra.mxu1 %vm1293_vm6, %v4663_v48 }
 0x75b   : > { %v4754_v12 = vpop.f32.mrf.mxu1 }
 0x75c   : > { %v4755_v23 = vadd.f32 %v4996_v2, %v4754_v12 }
 0x75d   : > { %v5654_v0 = vpop.f32.mrf.mxu1 }
 0x75e   : > { %v4759_v53 = vsel %vm4758_vm11, %v4755_v23, -inf }
 0x75f   : > { %4760 = vmax.xlane.f32.xlu1 %v4759_v53 }
 0x7e8   : > { %v4761_v29 = vpop.xlane.xlu1 %4760 }
 0x7e9   : > { %v4762_v59 = vsub.f32 %v4755_v23, %v4761_v29 }
 0x7eb   : > { %v4763_v3 = vmul.f32 1.442695, %v4762_v59 }
 0x7ed   : > { %6191 = vpow2.f32 %v4763_v3 }
 0x7fa   : > { %v6192_v49 = vpop.eup %6191 }
 0x7fb   : > { %v4765_v18 = vsel %vm4758_vm11, %v6192_v49, 0.0 }
 0x7fc   : > { %4766 = vadd.xlane.f32.xlu0 %v4765_v18 }
 0x885   : > { %v4767_v28 = vpop.xlane.xlu0 %4766 }
 0x886   : > { %6193 = vlog2.f32 %v4767_v28 }
 0x893   : > { %v6194_v37 = vpop.eup %6193 }
 0x894   : > { %v4769_v41 = vmul.f32 0.6931472, %v6194_v37 }
 0x896   : > { %v4770_v7 = vsub.f32 %v4762_v59, %v4769_v41 }
 0x898   : > { %4771 = vst.msk [vmem:[%s380_s30] sm:$0xff] %vm4758_vm11, %v4770_v7 }
 0x899   : > { %6322 = shalt.err (!%p6319_p3)
}
 0x89a   : > { %s6323_s14 = scalar_lea.hbm %s4784_s24, 128  ;;  %s6327_s29 = scalar_lea.hbm %s9573_s11, 256 }
 0x89b   : > { %p6324_p4 = scmp.ne.s32.totalorder %s4784_s24, %s6323_s14  ;;  %p6328_p9 = scmp.lt.s32.totalorder %s4784_s24, %s9573_s11 }
 0x89c   : > { %p6329_p10 = scmp.lt.s32.totalorder %s6327_s29, %s6323_s14 }
 0x89d   : > { %p6325_p7 = pnand %p6324_p4, %p6477_p5 }
 0x89e   : > { %p6330_p11 = por %p6329_p10, %p6328_p9 }
 0x89f   : > { %p6326_p8 = pneg %p6325_p7 }
 0x8a1   : > { %p6331_p12 = pnand %p6330_p11, %p6326_p8 }
 0x8a3   : > { %6334 = shalt.err (!%p6331_p12)
}
 0x8a4   : > { %5655 = dma.vmem_to_hbm [thread:$0]  (%p6477_p5), %s4787_s15, 128, %s4784_s24, %s4773_s25  }
 0x8a5 PF: > { %p5661_p13 = scmp.ge.s32.totalorder %s6369_s20, 2  ;;  %s4798_s16 = sand.u32 1, %s6357_s17  }
 0x8a6   : > { %s4799_s26 = scalar_lea.sflag [#allocation5], %s4798_s16 }
 0x8a7   : > { %p5658_p0 = pnand %p5661_p13, %p6481_p6 }
 0x8a9   : > { %p5659_p1 = pneg %p5658_p0 }
 0x8ab   : > { %6352 = dma.done.wait (%p5659_p1), %s4799_s26, 128  }
 0x8ac   : > { %6354 = vsyncadd (%p5659_p1), %s4799_s26, 4294967168  ;;  %s9722_s13 = sld [smem:[#allocation7_spill]]  ;;  %p21_p2 = scmp.ge.s32.totalorder %s6464_s23, 4  }
 0x8ad   : > { %s9723_s17 = smov %s6361_s18  ;;  %s9724_s18 = smov %s6365_s19 }
 0x8ae   : > { %s9726_s20 = smov %s6464_s23  ;;  %23 = sbr.rel (!%p21_p2) target bundleno = 6 (0x6), region = 203 }
 0x8b2   : > { %s9725_s19 = smov %s9722_s13 }
 0x8b3   :  { %4804 = vsyncpa [#allocation5], 1 }
 0x8b4   :  { %4806 = vsyncpa [#allocation5 + $0x1], 1 }

</bundles_post_ra>
